<compile_context>
chip_gen: v7x
topology: tpu7x:2x2x1
jax: 0.10.0
libtpu: 0.0.40
codegen_flags: <defaults>
</compile_context>

<pallas_src>
import jax
import jax.numpy as jnp
from jax.experimental import pallas as pl
from jax.experimental.pallas import tpu as pltpu

# ---- config (scaled down from the module's globals for a small smoke test) ----
VOCAB_SIZE = 65            # len(chars) in the original script
VOCAB_PAD = 128            # lm_head lane padding (sliced back to VOCAB_SIZE)
N_EMBD = 48                # original: 384
N_HEAD = 6                 # original: 6
HEAD_SIZE = N_EMBD // N_HEAD
N_LAYER = 2                # original: 6
BLOCK_SIZE = 16            # original: 256 (max context length)
EPS = 1e-5                 # torch.nn.LayerNorm default
NEG_INF = -1e30            # finite "-inf": exp() underflows to 0, no inf-inf NaNs

# per-layer parameters, each stacked with a leading N_LAYER dim (kernel arg order)
_BLOCK_PARAMS = ("ln1_g", "ln1_b", "w_qkv", "w_proj", "b_proj",
                 "ln2_g", "ln2_b", "w1", "b1", "w2", "b2")


def _layernorm(x, g, b):
    # PyTorch LayerNorm: biased variance over the last axis, eps inside sqrt.
    mu = jnp.mean(x, axis=-1, keepdims=True)
    var = jnp.mean((x - mu) ** 2, axis=-1, keepdims=True)
    return (x - mu) * jax.lax.rsqrt(var + EPS) * g + b


# ----------------------------- fused Pallas kernel -----------------------------

def gpt_forward_kernel(x_ref,
                       ln1g_ref, ln1b_ref, wqkv_ref, wproj_ref, bproj_ref,
                       ln2g_ref, ln2b_ref, w1_ref, b1_ref, w2_ref, b2_ref,
                       wlm_ref, blm_ref,
                       o_ref):
    """Full forward pass (all transformer blocks + lm_head) for one batch element."""
    x = x_ref[0].astype(jnp.float32)                     # (T, C) residual stream, f32
    T, C = x.shape
    scale = float(C) ** -0.5                             # reference quirk: n_embd scaling

    # causal mask, hoisted out of the layer loop
    row = jax.lax.broadcasted_iota(jnp.int32, (T, T), 0)
    col = jax.lax.broadcasted_iota(jnp.int32, (T, T), 1)
    causal = (row >= col)[None]                          # (1, T, T), broadcasts over heads

    for l in range(N_LAYER):                             # static unroll over layers
        # -------- x = x + proj(multi_head_attention(ln1(x))) --------
        xn = _layernorm(x, ln1g_ref[l], ln1b_ref[l]).astype(jnp.bfloat16)   # (T, C)
        # one head-batched MXU pass for all of Q, K, V (no per-head Python loop)
        xn_b = jnp.broadcast_to(xn[None], (3 * N_HEAD, T, C))
        qkv = jnp.einsum('gtc,gcd->gtd', xn_b, wqkv_ref[l],
                         preferred_element_type=jnp.float32)                # (3H, T, hs)
        q = qkv[:N_HEAD].astype(jnp.bfloat16)
        k = qkv[N_HEAD:2 * N_HEAD].astype(jnp.bfloat16)
        v = qkv[2 * N_HEAD:].astype(jnp.bfloat16)

        wei = jnp.einsum('htd,hsd->hts', q, k,
                         preferred_element_type=jnp.float32) * scale        # (H, T, T)
        wei = jnp.where(causal, wei, NEG_INF)
        wei = wei - jnp.max(wei, axis=-1, keepdims=True)
        p = jnp.exp(wei)
        p = p * pl.reciprocal(jnp.sum(p, axis=-1, keepdims=True), approx=True)

        heads = jnp.einsum('hts,hsd->htd', p.astype(jnp.bfloat16), v,
                           preferred_element_type=jnp.float32)              # (H, T, hs)
        # concat-free output projection: sum_h heads[h] @ Wproj[h*hs:(h+1)*hs, :]
        sa = jnp.einsum('htd,hdc->htc', heads.astype(jnp.bfloat16), wproj_ref[l],
                        preferred_element_type=jnp.float32)                 # (H, T, C)
        sa = jnp.sum(sa, axis=0) + bproj_ref[l]                             # (T, C)
        # TODO(synk): attention / projection dropout skipped (eval-mode identity).
        x = x + sa

        # -------- x = x + ffwd(ln2(x)) --------
        xn2 = _layernorm(x, ln2g_ref[l], ln2b_ref[l]).astype(jnp.bfloat16)
        h1 = jnp.dot(xn2, w1_ref[l], preferred_element_type=jnp.float32) + b1_ref[l]
        h1 = jnp.maximum(h1, 0.0).astype(jnp.bfloat16)
        ff = jnp.dot(h1, w2_ref[l], preferred_element_type=jnp.float32) + b2_ref[l]
        x = x + ff

    # ---- lm_head (reference forward() does NOT apply ln_f; matched exactly) ----
    logits = jnp.dot(x.astype(jnp.bfloat16), wlm_ref[...],
                     preferred_element_type=jnp.float32) + blm_ref[...]     # (T, VOCAB_PAD)
    o_ref[0] = logits.astype(o_ref.dtype)


# ----------------------------- wrappers ---------------------------------------

def _const_spec(p):
    """Grid-invariant, VMEM-resident parameter block covering the full array."""
    return pl.BlockSpec(p.shape, lambda b, _n=p.ndim: (0,) * _n)


def run_gpt_fused(x, params):
    B, T, C = x.shape
    plist = [params["blk_" + n] for n in _BLOCK_PARAMS] + [params["w_lm"], params["b_lm"]]
    in_specs = [pl.BlockSpec((1, T, C), lambda b: (b, 0, 0))]
    in_specs += [_const_spec(p) for p in plist]
    return pl.pallas_call(
        gpt_forward_kernel,
        out_shape=jax.ShapeDtypeStruct((B, T, VOCAB_PAD), jnp.float32),
        grid=(B,),
        in_specs=in_specs,
        out_specs=pl.BlockSpec((1, T, VOCAB_PAD), lambda b: (b, 0, 0)),
        compiler_params=pltpu.CompilerParams(
            # batch axis is parallel -> v7x can shard it across its 2 TensorCores;
            # no-op on single-TC v5e/v6e.
            dimension_semantics=("parallel",),
            # explicit VMEM budget; raise toward ~64-96 MiB for the real
            # (C=384, 6-layer) config on v5e/v6e, keep <= ~48 MiB on v7x (64 MiB phys).
            vmem_limit_bytes=32 * 1024 * 1024,
        ),
    )(x, *plist)


# ----------------------------- model ------------------------------------------

def init_params(key):
    keys = iter(jax.random.split(key, 3 + 4 * N_LAYER))

    def nrm(shape, dtype, std=0.02):
        return (std * jax.random.normal(next(keys), shape)).astype(dtype)

    tok_emb = nrm((VOCAB_SIZE, N_EMBD), jnp.float32)
    pos_emb = nrm((BLOCK_SIZE, N_EMBD), jnp.float32)

    # lm_head padded to VOCAB_PAD lanes (extra columns are zero, sliced off later)
    w_lm = jnp.zeros((N_EMBD, VOCAB_PAD), jnp.bfloat16)
    w_lm = w_lm.at[:, :VOCAB_SIZE].set(nrm((N_EMBD, VOCAB_SIZE), jnp.bfloat16))
    b_lm = jnp.zeros((1, VOCAB_PAD), jnp.float32)

    blocks = {n: [] for n in _BLOCK_PARAMS}
    for _ in range(N_LAYER):
        blocks["ln1_g"].append(jnp.ones((1, N_EMBD), jnp.float32))
        blocks["ln1_b"].append(jnp.zeros((1, N_EMBD), jnp.float32))
        # stacked per-head Q/K/V weights: [0:H]=Q, [H:2H]=K, [2H:3H]=V (bias=False)
        blocks["w_qkv"].append(nrm((3 * N_HEAD, N_EMBD, HEAD_SIZE), jnp.bfloat16))
        # proj weight (C, C) stored head-split as (H, hs, C) so the kernel needs no concat
        blocks["w_proj"].append(
            nrm((N_EMBD, N_EMBD), jnp.bfloat16).reshape(N_HEAD, HEAD_SIZE, N_EMBD))
        blocks["b_proj"].append(jnp.zeros((1, N_EMBD), jnp.float32))
        blocks["ln2_g"].append(jnp.ones((1, N_EMBD), jnp.float32))
        blocks["ln2_b"].append(jnp.zeros((1, N_EMBD), jnp.float32))
        blocks["w1"].append(nrm((N_EMBD, 4 * N_EMBD), jnp.bfloat16))
        blocks["b1"].append(jnp.zeros((1, 4 * N_EMBD), jnp.float32))
        blocks["w2"].append(nrm((4 * N_EMBD, N_EMBD), jnp.bfloat16))
        blocks["b2"].append(jnp.zeros((1, N_EMBD), jnp.float32))

    params = {"tok_emb": tok_emb, "pos_emb": pos_emb, "w_lm": w_lm, "b_lm": b_lm}
    params.update({"blk_" + n: jnp.stack(v, axis=0) for n, v in blocks.items()})
    return params


def bigram_forward(params, idx):
    """Equivalent of BigramLanguageModel.forward(idx, targets=None) -> logits."""
    B, T = idx.shape
    # Embedding gather + positional add: plain-JAX glue outside the kernel.
    tok_emb = params["tok_emb"][idx]                    # (B, T, C)
    pos_emb = params["pos_emb"][:T]                     # (T, C)
    x = (tok_emb + pos_emb[None]).astype(jnp.float32)
    # NOTE: the reference forward() applies lm_head directly to the blocks' output
    # (self.ln_f is defined but never called there); we match that exactly.
    logits_pad = run_gpt_fused(x, params)               # (B, T, VOCAB_PAD)
    return logits_pad[..., :VOCAB_SIZE]                 # (B, T, vocab); loss is None


if __name__ == "__main__":
    key = jax.random.PRNGKey(0)
    pkey, ikey = jax.random.split(key)
    params = init_params(pkey)

    B, T = 2, BLOCK_SIZE
    idx = jax.random.randint(ikey, (B, T), 0, VOCAB_SIZE, dtype=jnp.int32)

    logits = jax.jit(bigram_forward)(params, idx)
    jax.block_until_ready(logits)
    assert logits.shape == (B, T, VOCAB_SIZE)
    assert bool(jnp.all(jnp.isfinite(logits)))
    print("KERNEL_OK")
</pallas_src>

<mosaic_0001>
module attributes {stable_mosaic.version = 11 : i64} {
  func.func @gpt_forward_kernel(%arg0: i32, %arg1: memref<1x16x48xf32, #tpu.memory_space<vmem>>, %arg2: memref<2x1x48xf32, #tpu.memory_space<vmem>>, %arg3: memref<2x1x48xf32, #tpu.memory_space<vmem>>, %arg4: memref<2x18x48x8xbf16, #tpu.memory_space<vmem>>, %arg5: memref<2x6x8x48xbf16, #tpu.memory_space<vmem>>, %arg6: memref<2x1x48xf32, #tpu.memory_space<vmem>>, %arg7: memref<2x1x48xf32, #tpu.memory_space<vmem>>, %arg8: memref<2x1x48xf32, #tpu.memory_space<vmem>>, %arg9: memref<2x48x192xbf16, #tpu.memory_space<vmem>>, %arg10: memref<2x1x192xf32, #tpu.memory_space<vmem>>, %arg11: memref<2x192x48xbf16, #tpu.memory_space<vmem>>, %arg12: memref<2x1x48xf32, #tpu.memory_space<vmem>>, %arg13: memref<48x128xbf16, #tpu.memory_space<vmem>>, %arg14: memref<1x128xf32, #tpu.memory_space<vmem>>, %arg15: memref<1x16x128xf32, #tpu.memory_space<vmem>>) attributes {dimension_semantics = [#tpu.dimension_semantics<parallel>], iteration_bounds = array<i64: 2>, scalar_prefetch = 0 : i64, scratch_operands = 0 : i64, tpu.core_type = #tpu.core_type<tc>, window_params = [{transform_indices = @transform_0, window_bounds = array<i64: 1, 16, 48>}, {pipeline_mode = #tpu.pipeline_mode<synchronous>, transform_indices = @transform_1, window_bounds = array<i64: 2, 1, 48>}, {pipeline_mode = #tpu.pipeline_mode<synchronous>, transform_indices = @transform_2, window_bounds = array<i64: 2, 1, 48>}, {pipeline_mode = #tpu.pipeline_mode<synchronous>, transform_indices = @transform_3, window_bounds = array<i64: 2, 18, 48, 8>}, {pipeline_mode = #tpu.pipeline_mode<synchronous>, transform_indices = @transform_4, window_bounds = array<i64: 2, 6, 8, 48>}, {pipeline_mode = #tpu.pipeline_mode<synchronous>, transform_indices = @transform_5, window_bounds = array<i64: 2, 1, 48>}, {pipeline_mode = #tpu.pipeline_mode<synchronous>, transform_indices = @transform_6, window_bounds = array<i64: 2, 1, 48>}, {pipeline_mode = #tpu.pipeline_mode<synchronous>, transform_indices = @transform_7, window_bounds = array<i64: 2, 1, 48>}, {pipeline_mode = #tpu.pipeline_mode<synchronous>, transform_indices = @transform_8, window_bounds = array<i64: 2, 48, 192>}, {pipeline_mode = #tpu.pipeline_mode<synchronous>, transform_indices = @transform_9, window_bounds = array<i64: 2, 1, 192>}, {pipeline_mode = #tpu.pipeline_mode<synchronous>, transform_indices = @transform_10, window_bounds = array<i64: 2, 192, 48>}, {pipeline_mode = #tpu.pipeline_mode<synchronous>, transform_indices = @transform_11, window_bounds = array<i64: 2, 1, 48>}, {pipeline_mode = #tpu.pipeline_mode<synchronous>, transform_indices = @transform_12, window_bounds = array<i64: 48, 128>}, {pipeline_mode = #tpu.pipeline_mode<synchronous>, transform_indices = @transform_13, window_bounds = array<i64: 1, 128>}, {transform_indices = @transform_14, window_bounds = array<i64: 1, 16, 128>}]} {
    %c0 = arith.constant 0 : index
    %c0_0 = arith.constant 0 : index
    %c0_1 = arith.constant 0 : index
    %0 = vector.load %arg1[%c0, %c0_0, %c0_1] : memref<1x16x48xf32, #tpu.memory_space<vmem>>, vector<1x16x48xf32>
    %1 = vector.shape_cast %0 : vector<1x16x48xf32> to vector<16x48xf32>
    %2 = tpu.iota {dimensions = array<i32: 0>} : vector<16x16xi32>
    %3 = tpu.iota {dimensions = array<i32: 1>} : vector<16x16xi32>
    %4 = arith.cmpi sge, %2, %3 : vector<16x16xi32>
    %5 = vector.shape_cast %4 : vector<16x16xi1> to vector<1x16x16xi1>
    %c0_2 = arith.constant 0 : index
    %c0_3 = arith.constant 0 : index
    %c0_4 = arith.constant 0 : index
    %6 = vector.load %arg2[%c0_2, %c0_3, %c0_4] : memref<2x1x48xf32, #tpu.memory_space<vmem>>, vector<1x1x48xf32>
    %7 = vector.shape_cast %6 : vector<1x1x48xf32> to vector<1x48xf32>
    %c0_5 = arith.constant 0 : index
    %c0_6 = arith.constant 0 : index
    %c0_7 = arith.constant 0 : index
    %8 = vector.load %arg3[%c0_5, %c0_6, %c0_7] : memref<2x1x48xf32, #tpu.memory_space<vmem>>, vector<1x1x48xf32>
    %9 = vector.shape_cast %8 : vector<1x1x48xf32> to vector<1x48xf32>
    %cst = arith.constant dense<0.000000e+00> : vector<16xf32>
    %10 = vector.multi_reduction <add>, %1, %cst [1] : vector<16x48xf32> to vector<16xf32>
    %11 = vector.shape_cast %10 : vector<16xf32> to vector<16x1xf32>
    %cst_8 = arith.constant 4.800000e+01 : f32
    %12 = vector.broadcast %cst_8 : f32 to vector<16x1xf32>
    %13 = arith.divf %11, %12 : vector<16x1xf32>
    %14 = vector.broadcast %13 : vector<16x1xf32> to vector<16x48xf32>
    %15 = arith.subf %1, %14 : vector<16x48xf32>
    %16 = arith.mulf %15, %15 : vector<16x48xf32>
    %cst_9 = arith.constant dense<0.000000e+00> : vector<16xf32>
    %17 = vector.multi_reduction <add>, %16, %cst_9 [1] : vector<16x48xf32> to vector<16xf32>
    %18 = vector.shape_cast %17 : vector<16xf32> to vector<16x1xf32>
    %cst_10 = arith.constant 4.800000e+01 : f32
    %19 = vector.broadcast %cst_10 : f32 to vector<16x1xf32>
    %20 = arith.divf %18, %19 : vector<16x1xf32>
    %21 = vector.broadcast %13 : vector<16x1xf32> to vector<16x48xf32>
    %22 = arith.subf %1, %21 : vector<16x48xf32>
    %cst_11 = arith.constant 9.99999974E-6 : f32
    %23 = vector.broadcast %cst_11 : f32 to vector<16x1xf32>
    %24 = arith.addf %20, %23 : vector<16x1xf32>
    %25 = math.rsqrt %24 : vector<16x1xf32>
    %26 = vector.broadcast %25 : vector<16x1xf32> to vector<16x48xf32>
    %27 = arith.mulf %22, %26 : vector<16x48xf32>
    %28 = vector.broadcast %7 : vector<1x48xf32> to vector<16x48xf32>
    %29 = arith.mulf %27, %28 : vector<16x48xf32>
    %30 = vector.broadcast %9 : vector<1x48xf32> to vector<16x48xf32>
    %31 = arith.addf %29, %30 : vector<16x48xf32>
    %32 = arith.truncf %31 : vector<16x48xf32> to vector<16x48xbf16>
    %33 = vector.shape_cast %32 : vector<16x48xbf16> to vector<1x16x48xbf16>
    %34 = vector.shape_cast %33 : vector<1x16x48xbf16> to vector<1x16x48xbf16>
    %35 = vector.broadcast %34 : vector<1x16x48xbf16> to vector<18x16x48xbf16>
    %c0_12 = arith.constant 0 : index
    %c0_13 = arith.constant 0 : index
    %c0_14 = arith.constant 0 : index
    %c0_15 = arith.constant 0 : index
    %36 = vector.load %arg4[%c0_12, %c0_13, %c0_14, %c0_15] : memref<2x18x48x8xbf16, #tpu.memory_space<vmem>>, vector<1x18x48x8xbf16>
    %37 = vector.shape_cast %36 : vector<1x18x48x8xbf16> to vector<18x48x8xbf16>
    "tpu.trace_start"() <{level = 10 : i32, message = "gtc,gcd->gtd"}> : () -> ()
    %cst_16 = arith.constant dense<0.000000e+00> : vector<18x16x8xf32>
    %38 = tpu.matmul %35, %37, %cst_16 {dimension_numbers = #tpu.dot_dimension_numbers<[2], [1], [1], [2], [0, 0, 0, 1, 1, 2], [0], [0]>} : vector<18x16x48xbf16>, vector<18x48x8xbf16>, vector<18x16x8xf32> -> vector<18x16x8xf32>
    "tpu.trace_stop"() : () -> ()
    %39 = vector.extract_strided_slice %38 {offsets = [0, 0, 0], sizes = [6, 16, 8], strides = [1, 1, 1]} : vector<18x16x8xf32> to vector<6x16x8xf32>
    %40 = arith.truncf %39 : vector<6x16x8xf32> to vector<6x16x8xbf16>
    %41 = vector.extract_strided_slice %38 {offsets = [6, 0, 0], sizes = [6, 16, 8], strides = [1, 1, 1]} : vector<18x16x8xf32> to vector<6x16x8xf32>
    %42 = arith.truncf %41 : vector<6x16x8xf32> to vector<6x16x8xbf16>
    %43 = vector.extract_strided_slice %38 {offsets = [12, 0, 0], sizes = [6, 16, 8], strides = [1, 1, 1]} : vector<18x16x8xf32> to vector<6x16x8xf32>
    %44 = arith.truncf %43 : vector<6x16x8xf32> to vector<6x16x8xbf16>
    "tpu.trace_start"() <{level = 10 : i32, message = "htd,hsd->hts"}> : () -> ()
    %cst_17 = arith.constant dense<0.000000e+00> : vector<6x16x16xf32>
    %45 = tpu.matmul %40, %42, %cst_17 {dimension_numbers = #tpu.dot_dimension_numbers<[2], [2], [1], [1], [0, 0, 0, 1, 1, 1], [0], [0]>} : vector<6x16x8xbf16>, vector<6x16x8xbf16>, vector<6x16x16xf32> -> vector<6x16x16xf32>
    "tpu.trace_stop"() : () -> ()
    %cst_18 = arith.constant 0.144337565 : f32
    %46 = vector.broadcast %cst_18 : f32 to vector<6x16x16xf32>
    %47 = arith.mulf %45, %46 : vector<6x16x16xf32>
    %cst_19 = arith.constant -1.000000e+30 : f32
    %48 = vector.shape_cast %5 : vector<1x16x16xi1> to vector<1x16x16xi1>
    %49 = vector.broadcast %48 : vector<1x16x16xi1> to vector<6x16x16xi1>
    %50 = vector.broadcast %cst_19 : f32 to vector<6x16x16xf32>
    %51 = arith.select %49, %47, %50 : vector<6x16x16xi1>, vector<6x16x16xf32>
    %cst_20 = arith.constant dense<0xFF800000> : vector<6x16xf32>
    %52 = vector.multi_reduction <maximumf>, %51, %cst_20 [2] : vector<6x16x16xf32> to vector<6x16xf32>
    %53 = vector.shape_cast %52 : vector<6x16xf32> to vector<6x16x1xf32>
    %54 = vector.broadcast %53 : vector<6x16x1xf32> to vector<6x16x16xf32>
    %55 = arith.subf %51, %54 : vector<6x16x16xf32>
    %56 = math.exp %55 : vector<6x16x16xf32>
    %cst_21 = arith.constant dense<0.000000e+00> : vector<6x16xf32>
    %57 = vector.multi_reduction <add>, %56, %cst_21 [2] : vector<6x16x16xf32> to vector<6x16xf32>
    %58 = vector.shape_cast %57 : vector<6x16xf32> to vector<6x16x1xf32>
    %59 = tpu.reciprocal %58 {approx = true} : vector<6x16x1xf32> -> vector<6x16x1xf32>
    %60 = vector.broadcast %59 : vector<6x16x1xf32> to vector<6x16x16xf32>
    %61 = arith.mulf %56, %60 : vector<6x16x16xf32>
    %62 = arith.truncf %61 : vector<6x16x16xf32> to vector<6x16x16xbf16>
    "tpu.trace_start"() <{level = 10 : i32, message = "hts,hsd->htd"}> : () -> ()
    %cst_22 = arith.constant dense<0.000000e+00> : vector<6x16x8xf32>
    %63 = tpu.matmul %62, %44, %cst_22 {dimension_numbers = #tpu.dot_dimension_numbers<[2], [1], [1], [2], [0, 0, 0, 1, 1, 2], [0], [0]>} : vector<6x16x16xbf16>, vector<6x16x8xbf16>, vector<6x16x8xf32> -> vector<6x16x8xf32>
    "tpu.trace_stop"() : () -> ()
    %64 = arith.truncf %63 : vector<6x16x8xf32> to vector<6x16x8xbf16>
    %c0_23 = arith.constant 0 : index
    %c0_24 = arith.constant 0 : index
    %c0_25 = arith.constant 0 : index
    %c0_26 = arith.constant 0 : index
    %65 = vector.load %arg5[%c0_23, %c0_24, %c0_25, %c0_26] : memref<2x6x8x48xbf16, #tpu.memory_space<vmem>>, vector<1x6x8x48xbf16>
    %66 = vector.shape_cast %65 : vector<1x6x8x48xbf16> to vector<6x8x48xbf16>
    "tpu.trace_start"() <{level = 10 : i32, message = "htd,hdc->htc"}> : () -> ()
    %cst_27 = arith.constant dense<0.000000e+00> : vector<6x16x48xf32>
    %67 = tpu.matmul %64, %66, %cst_27 {dimension_numbers = #tpu.dot_dimension_numbers<[2], [1], [1], [2], [0, 0, 0, 1, 1, 2], [0], [0]>} : vector<6x16x8xbf16>, vector<6x8x48xbf16>, vector<6x16x48xf32> -> vector<6x16x48xf32>
    "tpu.trace_stop"() : () -> ()
    %cst_28 = arith.constant dense<0.000000e+00> : vector<16x48xf32>
    %68 = vector.multi_reduction <add>, %67, %cst_28 [0] : vector<6x16x48xf32> to vector<16x48xf32>
    %c0_29 = arith.constant 0 : index
    %c0_30 = arith.constant 0 : index
    %c0_31 = arith.constant 0 : index
    %69 = vector.load %arg6[%c0_29, %c0_30, %c0_31] : memref<2x1x48xf32, #tpu.memory_space<vmem>>, vector<1x1x48xf32>
    %70 = vector.shape_cast %69 : vector<1x1x48xf32> to vector<1x48xf32>
    %71 = vector.broadcast %70 : vector<1x48xf32> to vector<16x48xf32>
    %72 = arith.addf %68, %71 : vector<16x48xf32>
    %73 = arith.addf %1, %72 : vector<16x48xf32>
    %c0_32 = arith.constant 0 : index
    %c0_33 = arith.constant 0 : index
    %c0_34 = arith.constant 0 : index
    %74 = vector.load %arg7[%c0_32, %c0_33, %c0_34] : memref<2x1x48xf32, #tpu.memory_space<vmem>>, vector<1x1x48xf32>
    %75 = vector.shape_cast %74 : vector<1x1x48xf32> to vector<1x48xf32>
    %c0_35 = arith.constant 0 : index
    %c0_36 = arith.constant 0 : index
    %c0_37 = arith.constant 0 : index
    %76 = vector.load %arg8[%c0_35, %c0_36, %c0_37] : memref<2x1x48xf32, #tpu.memory_space<vmem>>, vector<1x1x48xf32>
    %77 = vector.shape_cast %76 : vector<1x1x48xf32> to vector<1x48xf32>
    %cst_38 = arith.constant dense<0.000000e+00> : vector<16xf32>
    %78 = vector.multi_reduction <add>, %73, %cst_38 [1] : vector<16x48xf32> to vector<16xf32>
    %79 = vector.shape_cast %78 : vector<16xf32> to vector<16x1xf32>
    %cst_39 = arith.constant 4.800000e+01 : f32
    %80 = vector.broadcast %cst_39 : f32 to vector<16x1xf32>
    %81 = arith.divf %79, %80 : vector<16x1xf32>
    %82 = vector.broadcast %81 : vector<16x1xf32> to vector<16x48xf32>
    %83 = arith.subf %73, %82 : vector<16x48xf32>
    %84 = arith.mulf %83, %83 : vector<16x48xf32>
    %cst_40 = arith.constant dense<0.000000e+00> : vector<16xf32>
    %85 = vector.multi_reduction <add>, %84, %cst_40 [1] : vector<16x48xf32> to vector<16xf32>
    %86 = vector.shape_cast %85 : vector<16xf32> to vector<16x1xf32>
    %cst_41 = arith.constant 4.800000e+01 : f32
    %87 = vector.broadcast %cst_41 : f32 to vector<16x1xf32>
    %88 = arith.divf %86, %87 : vector<16x1xf32>
    %89 = vector.broadcast %81 : vector<16x1xf32> to vector<16x48xf32>
    %90 = arith.subf %73, %89 : vector<16x48xf32>
    %cst_42 = arith.constant 9.99999974E-6 : f32
    %91 = vector.broadcast %cst_42 : f32 to vector<16x1xf32>
    %92 = arith.addf %88, %91 : vector<16x1xf32>
    %93 = math.rsqrt %92 : vector<16x1xf32>
    %94 = vector.broadcast %93 : vector<16x1xf32> to vector<16x48xf32>
    %95 = arith.mulf %90, %94 : vector<16x48xf32>
    %96 = vector.broadcast %75 : vector<1x48xf32> to vector<16x48xf32>
    %97 = arith.mulf %95, %96 : vector<16x48xf32>
    %98 = vector.broadcast %77 : vector<1x48xf32> to vector<16x48xf32>
    %99 = arith.addf %97, %98 : vector<16x48xf32>
    %100 = arith.truncf %99 : vector<16x48xf32> to vector<16x48xbf16>
    %c0_43 = arith.constant 0 : index
    %c0_44 = arith.constant 0 : index
    %c0_45 = arith.constant 0 : index
    %101 = vector.load %arg9[%c0_43, %c0_44, %c0_45] : memref<2x48x192xbf16, #tpu.memory_space<vmem>>, vector<1x48x192xbf16>
    %102 = vector.shape_cast %101 : vector<1x48x192xbf16> to vector<48x192xbf16>
    %cst_46 = arith.constant dense<0.000000e+00> : vector<16x192xf32>
    %103 = tpu.matmul %100, %102, %cst_46 {dimension_numbers = #tpu.dot_dimension_numbers<[1], [0], [0], [1], [0, 0, 1, 1], [], []>} : vector<16x48xbf16>, vector<48x192xbf16>, vector<16x192xf32> -> vector<16x192xf32>
    %c0_47 = arith.constant 0 : index
    %c0_48 = arith.constant 0 : index
    %c0_49 = arith.constant 0 : index
    %104 = vector.load %arg10[%c0_47, %c0_48, %c0_49] : memref<2x1x192xf32, #tpu.memory_space<vmem>>, vector<1x1x192xf32>
    %105 = vector.shape_cast %104 : vector<1x1x192xf32> to vector<1x192xf32>
    %106 = vector.broadcast %105 : vector<1x192xf32> to vector<16x192xf32>
    %107 = arith.addf %103, %106 : vector<16x192xf32>
    %cst_50 = arith.constant 0.000000e+00 : f32
    %108 = vector.broadcast %cst_50 : f32 to vector<16x192xf32>
    %109 = arith.maximumf %107, %108 : vector<16x192xf32>
    %110 = arith.truncf %109 : vector<16x192xf32> to vector<16x192xbf16>
    %c0_51 = arith.constant 0 : index
    %c0_52 = arith.constant 0 : index
    %c0_53 = arith.constant 0 : index
    %111 = vector.load %arg11[%c0_51, %c0_52, %c0_53] : memref<2x192x48xbf16, #tpu.memory_space<vmem>>, vector<1x192x48xbf16>
    %112 = vector.shape_cast %111 : vector<1x192x48xbf16> to vector<192x48xbf16>
    %cst_54 = arith.constant dense<0.000000e+00> : vector<16x48xf32>
    %113 = tpu.matmul %110, %112, %cst_54 {dimension_numbers = #tpu.dot_dimension_numbers<[1], [0], [0], [1], [0, 0, 1, 1], [], []>} : vector<16x192xbf16>, vector<192x48xbf16>, vector<16x48xf32> -> vector<16x48xf32>
    %c0_55 = arith.constant 0 : index
    %c0_56 = arith.constant 0 : index
    %c0_57 = arith.constant 0 : index
    %114 = vector.load %arg12[%c0_55, %c0_56, %c0_57] : memref<2x1x48xf32, #tpu.memory_space<vmem>>, vector<1x1x48xf32>
    %115 = vector.shape_cast %114 : vector<1x1x48xf32> to vector<1x48xf32>
    %116 = vector.broadcast %115 : vector<1x48xf32> to vector<16x48xf32>
    %117 = arith.addf %113, %116 : vector<16x48xf32>
    %118 = arith.addf %73, %117 : vector<16x48xf32>
    %c1 = arith.constant 1 : index
    %c0_58 = arith.constant 0 : index
    %c0_59 = arith.constant 0 : index
    %119 = vector.load %arg2[%c1, %c0_58, %c0_59] : memref<2x1x48xf32, #tpu.memory_space<vmem>>, vector<1x1x48xf32>
    %120 = vector.shape_cast %119 : vector<1x1x48xf32> to vector<1x48xf32>
    %c1_60 = arith.constant 1 : index
    %c0_61 = arith.constant 0 : index
    %c0_62 = arith.constant 0 : index
    %121 = vector.load %arg3[%c1_60, %c0_61, %c0_62] : memref<2x1x48xf32, #tpu.memory_space<vmem>>, vector<1x1x48xf32>
    %122 = vector.shape_cast %121 : vector<1x1x48xf32> to vector<1x48xf32>
    %cst_63 = arith.constant dense<0.000000e+00> : vector<16xf32>
    %123 = vector.multi_reduction <add>, %118, %cst_63 [1] : vector<16x48xf32> to vector<16xf32>
    %124 = vector.shape_cast %123 : vector<16xf32> to vector<16x1xf32>
    %cst_64 = arith.constant 4.800000e+01 : f32
    %125 = vector.broadcast %cst_64 : f32 to vector<16x1xf32>
    %126 = arith.divf %124, %125 : vector<16x1xf32>
    %127 = vector.broadcast %126 : vector<16x1xf32> to vector<16x48xf32>
    %128 = arith.subf %118, %127 : vector<16x48xf32>
    %129 = arith.mulf %128, %128 : vector<16x48xf32>
    %cst_65 = arith.constant dense<0.000000e+00> : vector<16xf32>
    %130 = vector.multi_reduction <add>, %129, %cst_65 [1] : vector<16x48xf32> to vector<16xf32>
    %131 = vector.shape_cast %130 : vector<16xf32> to vector<16x1xf32>
    %cst_66 = arith.constant 4.800000e+01 : f32
    %132 = vector.broadcast %cst_66 : f32 to vector<16x1xf32>
    %133 = arith.divf %131, %132 : vector<16x1xf32>
    %134 = vector.broadcast %126 : vector<16x1xf32> to vector<16x48xf32>
    %135 = arith.subf %118, %134 : vector<16x48xf32>
    %cst_67 = arith.constant 9.99999974E-6 : f32
    %136 = vector.broadcast %cst_67 : f32 to vector<16x1xf32>
    %137 = arith.addf %133, %136 : vector<16x1xf32>
    %138 = math.rsqrt %137 : vector<16x1xf32>
    %139 = vector.broadcast %138 : vector<16x1xf32> to vector<16x48xf32>
    %140 = arith.mulf %135, %139 : vector<16x48xf32>
    %141 = vector.broadcast %120 : vector<1x48xf32> to vector<16x48xf32>
    %142 = arith.mulf %140, %141 : vector<16x48xf32>
    %143 = vector.broadcast %122 : vector<1x48xf32> to vector<16x48xf32>
    %144 = arith.addf %142, %143 : vector<16x48xf32>
    %145 = arith.truncf %144 : vector<16x48xf32> to vector<16x48xbf16>
    %146 = vector.shape_cast %145 : vector<16x48xbf16> to vector<1x16x48xbf16>
    %147 = vector.shape_cast %146 : vector<1x16x48xbf16> to vector<1x16x48xbf16>
    %148 = vector.broadcast %147 : vector<1x16x48xbf16> to vector<18x16x48xbf16>
    %c1_68 = arith.constant 1 : index
    %c0_69 = arith.constant 0 : index
    %c0_70 = arith.constant 0 : index
    %c0_71 = arith.constant 0 : index
    %149 = vector.load %arg4[%c1_68, %c0_69, %c0_70, %c0_71] : memref<2x18x48x8xbf16, #tpu.memory_space<vmem>>, vector<1x18x48x8xbf16>
    %150 = vector.shape_cast %149 : vector<1x18x48x8xbf16> to vector<18x48x8xbf16>
    "tpu.trace_start"() <{level = 10 : i32, message = "gtc,gcd->gtd"}> : () -> ()
    %cst_72 = arith.constant dense<0.000000e+00> : vector<18x16x8xf32>
    %151 = tpu.matmul %148, %150, %cst_72 {dimension_numbers = #tpu.dot_dimension_numbers<[2], [1], [1], [2], [0, 0, 0, 1, 1, 2], [0], [0]>} : vector<18x16x48xbf16>, vector<18x48x8xbf16>, vector<18x16x8xf32> -> vector<18x16x8xf32>
    "tpu.trace_stop"() : () -> ()
    %152 = vector.extract_strided_slice %151 {offsets = [0, 0, 0], sizes = [6, 16, 8], strides = [1, 1, 1]} : vector<18x16x8xf32> to vector<6x16x8xf32>
    %153 = arith.truncf %152 : vector<6x16x8xf32> to vector<6x16x8xbf16>
    %154 = vector.extract_strided_slice %151 {offsets = [6, 0, 0], sizes = [6, 16, 8], strides = [1, 1, 1]} : vector<18x16x8xf32> to vector<6x16x8xf32>
    %155 = arith.truncf %154 : vector<6x16x8xf32> to vector<6x16x8xbf16>
    %156 = vector.extract_strided_slice %151 {offsets = [12, 0, 0], sizes = [6, 16, 8], strides = [1, 1, 1]} : vector<18x16x8xf32> to vector<6x16x8xf32>
    %157 = arith.truncf %156 : vector<6x16x8xf32> to vector<6x16x8xbf16>
    "tpu.trace_start"() <{level = 10 : i32, message = "htd,hsd->hts"}> : () -> ()
    %cst_73 = arith.constant dense<0.000000e+00> : vector<6x16x16xf32>
    %158 = tpu.matmul %153, %155, %cst_73 {dimension_numbers = #tpu.dot_dimension_numbers<[2], [2], [1], [1], [0, 0, 0, 1, 1, 1], [0], [0]>} : vector<6x16x8xbf16>, vector<6x16x8xbf16>, vector<6x16x16xf32> -> vector<6x16x16xf32>
    "tpu.trace_stop"() : () -> ()
    %cst_74 = arith.constant 0.144337565 : f32
    %159 = vector.broadcast %cst_74 : f32 to vector<6x16x16xf32>
    %160 = arith.mulf %158, %159 : vector<6x16x16xf32>
    %cst_75 = arith.constant -1.000000e+30 : f32
    %161 = vector.shape_cast %5 : vector<1x16x16xi1> to vector<1x16x16xi1>
    %162 = vector.broadcast %161 : vector<1x16x16xi1> to vector<6x16x16xi1>
    %163 = vector.broadcast %cst_75 : f32 to vector<6x16x16xf32>
    %164 = arith.select %162, %160, %163 : vector<6x16x16xi1>, vector<6x16x16xf32>
    %cst_76 = arith.constant dense<0xFF800000> : vector<6x16xf32>
    %165 = vector.multi_reduction <maximumf>, %164, %cst_76 [2] : vector<6x16x16xf32> to vector<6x16xf32>
    %166 = vector.shape_cast %165 : vector<6x16xf32> to vector<6x16x1xf32>
    %167 = vector.broadcast %166 : vector<6x16x1xf32> to vector<6x16x16xf32>
    %168 = arith.subf %164, %167 : vector<6x16x16xf32>
    %169 = math.exp %168 : vector<6x16x16xf32>
    %cst_77 = arith.constant dense<0.000000e+00> : vector<6x16xf32>
    %170 = vector.multi_reduction <add>, %169, %cst_77 [2] : vector<6x16x16xf32> to vector<6x16xf32>
    %171 = vector.shape_cast %170 : vector<6x16xf32> to vector<6x16x1xf32>
    %172 = tpu.reciprocal %171 {approx = true} : vector<6x16x1xf32> -> vector<6x16x1xf32>
    %173 = vector.broadcast %172 : vector<6x16x1xf32> to vector<6x16x16xf32>
    %174 = arith.mulf %169, %173 : vector<6x16x16xf32>
    %175 = arith.truncf %174 : vector<6x16x16xf32> to vector<6x16x16xbf16>
    "tpu.trace_start"() <{level = 10 : i32, message = "hts,hsd->htd"}> : () -> ()
    %cst_78 = arith.constant dense<0.000000e+00> : vector<6x16x8xf32>
    %176 = tpu.matmul %175, %157, %cst_78 {dimension_numbers = #tpu.dot_dimension_numbers<[2], [1], [1], [2], [0, 0, 0, 1, 1, 2], [0], [0]>} : vector<6x16x16xbf16>, vector<6x16x8xbf16>, vector<6x16x8xf32> -> vector<6x16x8xf32>
    "tpu.trace_stop"() : () -> ()
    %177 = arith.truncf %176 : vector<6x16x8xf32> to vector<6x16x8xbf16>
    %c1_79 = arith.constant 1 : index
    %c0_80 = arith.constant 0 : index
    %c0_81 = arith.constant 0 : index
    %c0_82 = arith.constant 0 : index
    %178 = vector.load %arg5[%c1_79, %c0_80, %c0_81, %c0_82] : memref<2x6x8x48xbf16, #tpu.memory_space<vmem>>, vector<1x6x8x48xbf16>
    %179 = vector.shape_cast %178 : vector<1x6x8x48xbf16> to vector<6x8x48xbf16>
    "tpu.trace_start"() <{level = 10 : i32, message = "htd,hdc->htc"}> : () -> ()
    %cst_83 = arith.constant dense<0.000000e+00> : vector<6x16x48xf32>
    %180 = tpu.matmul %177, %179, %cst_83 {dimension_numbers = #tpu.dot_dimension_numbers<[2], [1], [1], [2], [0, 0, 0, 1, 1, 2], [0], [0]>} : vector<6x16x8xbf16>, vector<6x8x48xbf16>, vector<6x16x48xf32> -> vector<6x16x48xf32>
    "tpu.trace_stop"() : () -> ()
    %cst_84 = arith.constant dense<0.000000e+00> : vector<16x48xf32>
    %181 = vector.multi_reduction <add>, %180, %cst_84 [0] : vector<6x16x48xf32> to vector<16x48xf32>
    %c1_85 = arith.constant 1 : index
    %c0_86 = arith.constant 0 : index
    %c0_87 = arith.constant 0 : index
    %182 = vector.load %arg6[%c1_85, %c0_86, %c0_87] : memref<2x1x48xf32, #tpu.memory_space<vmem>>, vector<1x1x48xf32>
    %183 = vector.shape_cast %182 : vector<1x1x48xf32> to vector<1x48xf32>
    %184 = vector.broadcast %183 : vector<1x48xf32> to vector<16x48xf32>
    %185 = arith.addf %181, %184 : vector<16x48xf32>
    %186 = arith.addf %118, %185 : vector<16x48xf32>
    %c1_88 = arith.constant 1 : index
    %c0_89 = arith.constant 0 : index
    %c0_90 = arith.constant 0 : index
    %187 = vector.load %arg7[%c1_88, %c0_89, %c0_90] : memref<2x1x48xf32, #tpu.memory_space<vmem>>, vector<1x1x48xf32>
    %188 = vector.shape_cast %187 : vector<1x1x48xf32> to vector<1x48xf32>
    %c1_91 = arith.constant 1 : index
    %c0_92 = arith.constant 0 : index
    %c0_93 = arith.constant 0 : index
    %189 = vector.load %arg8[%c1_91, %c0_92, %c0_93] : memref<2x1x48xf32, #tpu.memory_space<vmem>>, vector<1x1x48xf32>
    %190 = vector.shape_cast %189 : vector<1x1x48xf32> to vector<1x48xf32>
    %cst_94 = arith.constant dense<0.000000e+00> : vector<16xf32>
    %191 = vector.multi_reduction <add>, %186, %cst_94 [1] : vector<16x48xf32> to vector<16xf32>
    %192 = vector.shape_cast %191 : vector<16xf32> to vector<16x1xf32>
    %cst_95 = arith.constant 4.800000e+01 : f32
    %193 = vector.broadcast %cst_95 : f32 to vector<16x1xf32>
    %194 = arith.divf %192, %193 : vector<16x1xf32>
    %195 = vector.broadcast %194 : vector<16x1xf32> to vector<16x48xf32>
    %196 = arith.subf %186, %195 : vector<16x48xf32>
    %197 = arith.mulf %196, %196 : vector<16x48xf32>
    %cst_96 = arith.constant dense<0.000000e+00> : vector<16xf32>
    %198 = vector.multi_reduction <add>, %197, %cst_96 [1] : vector<16x48xf32> to vector<16xf32>
    %199 = vector.shape_cast %198 : vector<16xf32> to vector<16x1xf32>
    %cst_97 = arith.constant 4.800000e+01 : f32
    %200 = vector.broadcast %cst_97 : f32 to vector<16x1xf32>
    %201 = arith.divf %199, %200 : vector<16x1xf32>
    %202 = vector.broadcast %194 : vector<16x1xf32> to vector<16x48xf32>
    %203 = arith.subf %186, %202 : vector<16x48xf32>
    %cst_98 = arith.constant 9.99999974E-6 : f32
    %204 = vector.broadcast %cst_98 : f32 to vector<16x1xf32>
    %205 = arith.addf %201, %204 : vector<16x1xf32>
    %206 = math.rsqrt %205 : vector<16x1xf32>
    %207 = vector.broadcast %206 : vector<16x1xf32> to vector<16x48xf32>
    %208 = arith.mulf %203, %207 : vector<16x48xf32>
    %209 = vector.broadcast %188 : vector<1x48xf32> to vector<16x48xf32>
    %210 = arith.mulf %208, %209 : vector<16x48xf32>
    %211 = vector.broadcast %190 : vector<1x48xf32> to vector<16x48xf32>
    %212 = arith.addf %210, %211 : vector<16x48xf32>
    %213 = arith.truncf %212 : vector<16x48xf32> to vector<16x48xbf16>
    %c1_99 = arith.constant 1 : index
    %c0_100 = arith.constant 0 : index
    %c0_101 = arith.constant 0 : index
    %214 = vector.load %arg9[%c1_99, %c0_100, %c0_101] : memref<2x48x192xbf16, #tpu.memory_space<vmem>>, vector<1x48x192xbf16>
    %215 = vector.shape_cast %214 : vector<1x48x192xbf16> to vector<48x192xbf16>
    %cst_102 = arith.constant dense<0.000000e+00> : vector<16x192xf32>
    %216 = tpu.matmul %213, %215, %cst_102 {dimension_numbers = #tpu.dot_dimension_numbers<[1], [0], [0], [1], [0, 0, 1, 1], [], []>} : vector<16x48xbf16>, vector<48x192xbf16>, vector<16x192xf32> -> vector<16x192xf32>
    %c1_103 = arith.constant 1 : index
    %c0_104 = arith.constant 0 : index
    %c0_105 = arith.constant 0 : index
    %217 = vector.load %arg10[%c1_103, %c0_104, %c0_105] : memref<2x1x192xf32, #tpu.memory_space<vmem>>, vector<1x1x192xf32>
    %218 = vector.shape_cast %217 : vector<1x1x192xf32> to vector<1x192xf32>
    %219 = vector.broadcast %218 : vector<1x192xf32> to vector<16x192xf32>
    %220 = arith.addf %216, %219 : vector<16x192xf32>
    %cst_106 = arith.constant 0.000000e+00 : f32
    %221 = vector.broadcast %cst_106 : f32 to vector<16x192xf32>
    %222 = arith.maximumf %220, %221 : vector<16x192xf32>
    %223 = arith.truncf %222 : vector<16x192xf32> to vector<16x192xbf16>
    %c1_107 = arith.constant 1 : index
    %c0_108 = arith.constant 0 : index
    %c0_109 = arith.constant 0 : index
    %224 = vector.load %arg11[%c1_107, %c0_108, %c0_109] : memref<2x192x48xbf16, #tpu.memory_space<vmem>>, vector<1x192x48xbf16>
    %225 = vector.shape_cast %224 : vector<1x192x48xbf16> to vector<192x48xbf16>
    %cst_110 = arith.constant dense<0.000000e+00> : vector<16x48xf32>
    %226 = tpu.matmul %223, %225, %cst_110 {dimension_numbers = #tpu.dot_dimension_numbers<[1], [0], [0], [1], [0, 0, 1, 1], [], []>} : vector<16x192xbf16>, vector<192x48xbf16>, vector<16x48xf32> -> vector<16x48xf32>
    %c1_111 = arith.constant 1 : index
    %c0_112 = arith.constant 0 : index
    %c0_113 = arith.constant 0 : index
    %227 = vector.load %arg12[%c1_111, %c0_112, %c0_113] : memref<2x1x48xf32, #tpu.memory_space<vmem>>, vector<1x1x48xf32>
    %228 = vector.shape_cast %227 : vector<1x1x48xf32> to vector<1x48xf32>
    %229 = vector.broadcast %228 : vector<1x48xf32> to vector<16x48xf32>
    %230 = arith.addf %226, %229 : vector<16x48xf32>
    %231 = arith.addf %186, %230 : vector<16x48xf32>
    %232 = arith.truncf %231 : vector<16x48xf32> to vector<16x48xbf16>
    %c0_114 = arith.constant 0 : index
    %c0_115 = arith.constant 0 : index
    %233 = vector.load %arg13[%c0_114, %c0_115] : memref<48x128xbf16, #tpu.memory_space<vmem>>, vector<48x128xbf16>
    %cst_116 = arith.constant dense<0.000000e+00> : vector<16x128xf32>
    %234 = tpu.matmul %232, %233, %cst_116 {dimension_numbers = #tpu.dot_dimension_numbers<[1], [0], [0], [1], [0, 0, 1, 1], [], []>} : vector<16x48xbf16>, vector<48x128xbf16>, vector<16x128xf32> -> vector<16x128xf32>
    %c0_117 = arith.constant 0 : index
    %c0_118 = arith.constant 0 : index
    %235 = vector.load %arg14[%c0_117, %c0_118] : memref<1x128xf32, #tpu.memory_space<vmem>>, vector<1x128xf32>
    %236 = vector.broadcast %235 : vector<1x128xf32> to vector<16x128xf32>
    %237 = arith.addf %234, %236 : vector<16x128xf32>
    %c0_119 = arith.constant 0 : index
    %c0_120 = arith.constant 0 : index
    %c0_121 = arith.constant 0 : index
    %238 = vector.load %arg15[%c0_119, %c0_120, %c0_121] : memref<1x16x128xf32, #tpu.memory_space<vmem>>, vector<1x16x128xf32>
    %239 = vector.shape_cast %238 : vector<1x16x128xf32> to vector<16x128xf32>
    %240 = vector.shape_cast %237 : vector<16x128xf32> to vector<1x16x128xf32>
    tpu.vector_store %arg15[%c0_119, %c0_120, %c0_121], %240 {strides = array<i32>} : memref<1x16x128xf32, #tpu.memory_space<vmem>>, vector<1x16x128xf32>,
    return
  }
  func.func @transform_0(%arg0: i32) -> (i32, i32, i32) {
    %c0_i32 = arith.constant 0 : i32
    %c0_i32_0 = arith.constant 0 : i32
    %c0_i32_1 = arith.constant 0 : i32
    return %arg0, %c0_i32, %c0_i32_0 : i32, i32, i32
  }
  func.func @transform_1(%arg0: i32) -> (i32, i32, i32) {
    %c0_i32 = arith.constant 0 : i32
    %c0_i32_0 = arith.constant 0 : i32
    %c0_i32_1 = arith.constant 0 : i32
    %c0_i32_2 = arith.constant 0 : i32
    return %c0_i32, %c0_i32_0, %c0_i32_1 : i32, i32, i32
  }
  func.func @transform_2(%arg0: i32) -> (i32, i32, i32) {
    %c0_i32 = arith.constant 0 : i32
    %c0_i32_0 = arith.constant 0 : i32
    %c0_i32_1 = arith.constant 0 : i32
    %c0_i32_2 = arith.constant 0 : i32
    return %c0_i32, %c0_i32_0, %c0_i32_1 : i32, i32, i32
  }
  func.func @transform_3(%arg0: i32) -> (i32, i32, i32, i32) {
    %c0_i32 = arith.constant 0 : i32
    %c0_i32_0 = arith.constant 0 : i32
    %c0_i32_1 = arith.constant 0 : i32
    %c0_i32_2 = arith.constant 0 : i32
    %c0_i32_3 = arith.constant 0 : i32
    return %c0_i32, %c0_i32_0, %c0_i32_1, %c0_i32_2 : i32, i32, i32, i32
  }
  func.func @transform_4(%arg0: i32) -> (i32, i32, i32, i32) {
    %c0_i32 = arith.constant 0 : i32
    %c0_i32_0 = arith.constant 0 : i32
    %c0_i32_1 = arith.constant 0 : i32
    %c0_i32_2 = arith.constant 0 : i32
    %c0_i32_3 = arith.constant 0 : i32
    return %c0_i32, %c0_i32_0, %c0_i32_1, %c0_i32_2 : i32, i32, i32, i32
  }
  func.func @transform_5(%arg0: i32) -> (i32, i32, i32) {
    %c0_i32 = arith.constant 0 : i32
    %c0_i32_0 = arith.constant 0 : i32
    %c0_i32_1 = arith.constant 0 : i32
    %c0_i32_2 = arith.constant 0 : i32
    return %c0_i32, %c0_i32_0, %c0_i32_1 : i32, i32, i32
  }
  func.func @transform_6(%arg0: i32) -> (i32, i32, i32) {
    %c0_i32 = arith.constant 0 : i32
    %c0_i32_0 = arith.constant 0 : i32
    %c0_i32_1 = arith.constant 0 : i32
    %c0_i32_2 = arith.constant 0 : i32
    return %c0_i32, %c0_i32_0, %c0_i32_1 : i32, i32, i32
  }
  func.func @transform_7(%arg0: i32) -> (i32, i32, i32) {
    %c0_i32 = arith.constant 0 : i32
    %c0_i32_0 = arith.constant 0 : i32
    %c0_i32_1 = arith.constant 0 : i32
    %c0_i32_2 = arith.constant 0 : i32
    return %c0_i32, %c0_i32_0, %c0_i32_1 : i32, i32, i32
  }
  func.func @transform_8(%arg0: i32) -> (i32, i32, i32) {
    %c0_i32 = arith.constant 0 : i32
    %c0_i32_0 = arith.constant 0 : i32
    %c0_i32_1 = arith.constant 0 : i32
    %c0_i32_2 = arith.constant 0 : i32
    return %c0_i32, %c0_i32_0, %c0_i32_1 : i32, i32, i32
  }
  func.func @transform_9(%arg0: i32) -> (i32, i32, i32) {
    %c0_i32 = arith.constant 0 : i32
    %c0_i32_0 = arith.constant 0 : i32
    %c0_i32_1 = arith.constant 0 : i32
    %c0_i32_2 = arith.constant 0 : i32
    return %c0_i32, %c0_i32_0, %c0_i32_1 : i32, i32, i32
  }
  func.func @transform_10(%arg0: i32) -> (i32, i32, i32) {
    %c0_i32 = arith.constant 0 : i32
    %c0_i32_0 = arith.constant 0 : i32
    %c0_i32_1 = arith.constant 0 : i32
    %c0_i32_2 = arith.constant 0 : i32
    return %c0_i32, %c0_i32_0, %c0_i32_1 : i32, i32, i32
  }
  func.func @transform_11(%arg0: i32) -> (i32, i32, i32) {
    %c0_i32 = arith.constant 0 : i32
    %c0_i32_0 = arith.constant 0 : i32
    %c0_i32_1 = arith.constant 0 : i32
    %c0_i32_2 = arith.constant 0 : i32
    return %c0_i32, %c0_i32_0, %c0_i32_1 : i32, i32, i32
  }
  func.func @transform_12(%arg0: i32) -> (i32, i32) {
    %c0_i32 = arith.constant 0 : i32
    %c0_i32_0 = arith.constant 0 : i32
    %c0_i32_1 = arith.constant 0 : i32
    return %c0_i32, %c0_i32_0 : i32, i32
  }
  func.func @transform_13(%arg0: i32) -> (i32, i32) {
    %c0_i32 = arith.constant 0 : i32
    %c0_i32_0 = arith.constant 0 : i32
    %c0_i32_1 = arith.constant 0 : i32
    return %c0_i32, %c0_i32_0 : i32, i32
  }
  func.func @transform_14(%arg0: i32) -> (i32, i32, i32) {
    %c0_i32 = arith.constant 0 : i32
    %c0_i32_0 = arith.constant 0 : i32
    %c0_i32_1 = arith.constant 0 : i32
    return %arg0, %c0_i32, %c0_i32_0 : i32, i32, i32
  }
}

</mosaic_0001>

<bundles_post_ra>
// kernel: bigram_forward.1
= control target key start
LH: loop header
LB: loop body
LE: loop exit
PB: predicated region body
PF: predicated region fallthrough
CT: control target
= control target key end

     0   :  { %s8981_s0 = inlined_call_operand.vmem [shape: f32[2,16,48], index: 0, kind: input, shape index: {}]   ;;  %s8982_s1 = inlined_call_operand.vmem [shape: f32[2,1,48], index: 1, kind: input, shape index: {}]   ;;  %s8983_s2 = inlined_call_operand.vmem [shape: f32[2,1,48], index: 2, kind: input, shape index: {}]   ;;  %s8984_s3 = inlined_call_operand.vmem [shape: bf16[2,18,48,8], index: 3, kind: input, shape index: {}]   ;;  %s8985_s4 = inlined_call_operand.vmem [shape: bf16[2,6,8,48], index: 4, kind: input, shape index: {}]   ;;  %s8986_s5 = inlined_call_operand.vmem [shape: f32[2,1,48], index: 5, kind: input, shape index: {}]   ;;  %s8987_s6 = inlined_call_operand.vmem [shape: f32[2,1,48], index: 6, kind: input, shape index: {}]   ;;  %s8988_s7 = inlined_call_operand.vmem [shape: f32[2,1,48], index: 7, kind: input, shape index: {}]   ;;  %s8989_s8 = inlined_call_operand.vmem [shape: bf16[2,48,192], index: 8, kind: input, shape index: {}]   ;;  %s8990_s9 = inlined_call_operand.vmem [shape: f32[2,1,192], index: 9, kind: input, shape index: {}]   ;;  %s8991_s10 = inlined_call_operand.vmem [shape: bf16[2,192,48], index: 10, kind: input, shape index: {}]   ;;  %s8992_s11 = inlined_call_operand.vmem [shape: f32[2,1,48], index: 11, kind: input, shape index: {}]   ;;  %s8993_s12 = inlined_call_operand.vmem [shape: bf16[48,128], index: 12, kind: input, shape index: {}]   ;;  %s8994_s13 = inlined_call_operand.vmem [shape: f32[1,128], index: 13, kind: input, shape index: {}]   ;;  %s8995_s14 = inlined_call_operand.hbm [shape: f32[2,16,128], index: 14, kind: output, shape index: {}]  }
   0x1   :  { %8997 = sst [smem:[#allocation7_spill]] %s8981_s0 }
   0x2   :  { %8998 = sst [smem:[#allocation8_spill]] %s8982_s1 }
   0x3   :  { %19 = vsyncpa [#allocation3], 0 }
   0x4   :  { %21 = vsyncpa [#allocation3 + $0x1], 0  ;;  %s7445_s29 = smov 0   ;;  %s7447_s30 = smov 0  }
   0x5   :  { %s7449_s15 = smov 0   ;;  %s7451_s16 = smov 0  }
   0x6 LB: > { %8999 = sst [smem:[#allocation5_spill]] %s7358_s15  ;;  %s7466_s17 = sadd.s32 4294967295, %s7362_s16   ;;  %s7362_s16 = sphi %s7451_s16, %s9014_s16   ;;  %s7358_s15 = sphi %s7449_s15, %s9013_s15   ;;  %s7354_s30 = sphi %s7447_s30, %s9012_s30   ;;  %s7350_s29 = sphi %s7445_s29, %s9011_s29  }
   0x7   : > { %s5781_s18 = sadd.s32 4294967294, %s7362_s16   ;;  %s7470_s19 = sadd.s32 1, %s7362_s16  }
   0x8   : > { %s333_s20 = sadd.s32 1, %s7358_s15  ;;  %s330_s21 = ssub.s32 %s7362_s16, %s7470_s19 }
   0x9   : > { %p343_p0 = scmp.ne.s32.totalorder %s7358_s15, %s7354_s30  ;;  %p331_p1 = scmp.eq.s32.totalorder %s330_s21, 0 }
   0xa   : > { %p344_p2 = scmp.eq.s32.totalorder %s7466_s17, 1  ;;  %p349_p3 = scmp.ne.s32.totalorder %s7354_s30, %s7350_s29 }
   0xb   : > { %p350_p4 = scmp.eq.s32.totalorder %s5781_s18, 1  ;;  %p5784_p7 = scmp.ge.s32.totalorder %s7362_s16, 1 }
   0xc   : > { %s7481_s22 = scalar_select %p331_p1, %s7358_s15, %s333_s20  }
   0xd   : > { %p7483_p5 = por %p344_p2, %p343_p0  ;;  %p7487_p6 = por %p350_p4, %p349_p3 }
   0xe   : > { %9000 = sst [smem:[#allocation6_spill]] %s7481_s22  ;;  %p415_p8 = scmp.lt.s32.totalorder %s7362_s16, 3 }
  0x10   : > { %p416_p9 = pnand %p5784_p7, %p415_p8 }
  0x11   : > { %p461_p10 = scmp.lt.s32.totalorder (!%p416_p9), %s7466_s17, 1  ;;  %vm478_vm0 = vcmask (!%p416_p9), 392192   ;;  %s9003_s0 = sld [smem:[#allocation7_spill]] (!%p416_p9)  ;;  %v7033_v14 = vld [vmem:[%s8984_s3] sm:$0xff] (!%p416_p9)   ;;  %v7034_v15 = vld [vmem:[%s8984_s3 + $0x48] sm:$0xff] (!%p416_p9)   ;;  %v7364_v16 = vmov (!%p416_p9), 0.0  }
  0x12   : > { %419 = sbr.rel (%p416_p9) target bundleno = 4955 (0x135b), region = 76  ;;  %6403 = vmatprep.subr.bf16.mxu0 (!%p416_p9), %v7364_v16  ;;  %6433 = vmatprep.subr.bf16.mxu1 (!%p416_p9), %v7364_v16  ;;  %v7035_v17 = vld [vmem:[%s8984_s3 + $0x8] sm:$0xff] (!%p416_p9)   ;;  %v7036_v18 = vld [vmem:[%s8984_s3 + $0x50] sm:$0xff] (!%p416_p9)   ;;  %v7038_v20 = vld [vmem:[%s8984_s3 + $0x58] sm:$0xff] (!%p416_p9)   ;;  %vm7365_vm1 = vmmov (!%p416_p9), 0   ;;  %s9004_s1 = sld [smem:[#allocation8_spill]] (!%p416_p9) }
  0x13   : > { %6404 = vmatpush3.bf16.msra.mxu0 (!%p416_p9), %v7033_v14  ;;  %6434 = vmatpush3.bf16.msra.mxu1 (!%p416_p9), %v7034_v15  ;;  %v7037_v19 = vld [vmem:[%s8984_s3 + $0x10] sm:$0xff] (!%p416_p9)   ;;  %v5789_v33 = vld [vmem:[%s8983_s2] ss:$0 sm:$0xff] (!%p416_p9)  ;;  %v7039_v37 = vld [vmem:[%s8984_s3 + $0x18] sm:$0xff] (!%p416_p9)   ;;  %vm1714_vm2 = vcmask (!%p416_p9), 64512   ;;  %vm2025_vm4 = vcmask (!%p416_p9), 130048  }
  0x14   : > { %6405 = vmatprep.subr.bf16.mxu0 (!%p416_p9), %v7364_v16  ;;  %6435 = vmatprep.subr.bf16.mxu1 (!%p416_p9), %v7364_v16  ;;  %v7040_v38 = vld [vmem:[%s8984_s3 + $0x78] sm:$0xff] (!%p416_p9)   ;;  %v7041_v40 = vld [vmem:[%s8984_s3 + $0x20] sm:$0xff] (!%p416_p9)   ;;  %v7043_v42 = vld [vmem:[%s8984_s3 + $0x28] sm:$0xff] (!%p416_p9)   ;;  %vm2443_vm6 = vcmask (!%p416_p9), 1043456   ;;  %vm3004_vm7 = vcmask (!%p416_p9), 523264   ;;  %s7367_s28 = smov (!%p416_p9), [#allocation2]  }
  0x15   : > { %6409 = vmatprep.mubr.msk.bf16.mxu0 (!%p416_p9), %vm7365_vm1, %v7364_v16  ;;  %6439 = vmatprep.mubr.msk.bf16.mxu1 (!%p416_p9), %vm7365_vm1, %v7364_v16  ;;  %v7042_v41 = vld [vmem:[%s8984_s3 + $0x80] sm:$0xff] (!%p416_p9)   ;;  %v7044_v43 = vld [vmem:[%s8984_s3 + $0x88] sm:$0xff] (!%p416_p9)   ;;  %v7045_v44 = vld [vmem:[%s8984_s3 + $0x30] sm:$0xff] (!%p416_p9)   ;;  %s7304_s20 = sshll.u32 (!%p416_p9), %s7367_s28, 4  ;;  %s7305_s20 = int_to_ptr.vmem [resolvable:$false] %s7304_s20 }
  0x16   : > { %v7046_v45 = vld [vmem:[%s8984_s3 + $0xa8] sm:$0xff] (!%p416_p9)   ;;  %v7047_v46 = vld [vmem:[%s8984_s3 + $0x38] sm:$0xff] (!%p416_p9)   ;;  %v7048_v47 = vld [vmem:[%s8984_s3 + $0xb0] sm:$0xff] (!%p416_p9)  }
  0x17   : > { %6406 = vmatpush3.bf16.msra.mxu0 (!%p416_p9), %v7035_v17  ;;  %6436 = vmatpush3.bf16.msra.mxu1 (!%p416_p9), %v7036_v18  ;;  %v7049_v48 = vld [vmem:[%s8984_s3 + $0x40] sm:$0xff] (!%p416_p9)   ;;  %v7050_v49 = vld [vmem:[%s8984_s3 + $0xb8] sm:$0xff] (!%p416_p9)   ;;  %v7053_v52 = vld [vmem:[%s8984_s3 + $0x68] sm:$0xff] (!%p416_p9)  }
  0x18   : > { %6407 = vmatprep.subr.bf16.mxu0 (!%p416_p9), %v7364_v16  ;;  %6437 = vmatprep.subr.bf16.mxu1 (!%p416_p9), %v7364_v16  ;;  %v5788_v29 = vld [vmem:[%s9004_s1] ss:$0 sm:$0xff] (!%p416_p9)  ;;  %v7052_v51 = vld [vmem:[%s8984_s3 + $0xd8] sm:$0xff] (!%p416_p9)   ;;  %v7055_v54 = vld [vmem:[%s8984_s3 + $0x70] sm:$0xff] (!%p416_p9)  }
  0x19   : > { %s462_s25 = scalar_select %p461_p10, %s7466_s17, 1  ;;  %v7051_v50 = vld [vmem:[%s8984_s3 + $0x60] sm:$0xff]   ;;  %v7056_v55 = vld [vmem:[%s8984_s3 + $0xe8] sm:$0xff]   ;;  %v7057_v56 = vld [vmem:[%s8984_s3 + $0x90] sm:$0xff]  }
  0x1a   : > { %v7054_v53 = vld [vmem:[%s8984_s3 + $0xe0] sm:$0xff]   ;;  %v7058_v57 = vld [vmem:[%s8984_s3 + $0x108] sm:$0xff]   ;;  %v7059_v58 = vld [vmem:[%s8984_s3 + $0x98] sm:$0xff]  }
  0x1b   : > { %s6181_s26 = sshll.u32 %s462_s25, 4  ;;  %6408 = vmatpush3.bf16.msra.mxu0 %v7037_v19  ;;  %6438 = vmatpush3.bf16.msra.mxu1 %v7038_v20  ;;  %v7060_v59 = vld [vmem:[%s8984_s3 + $0x110] sm:$0xff]   ;;  %v7061_v60 = vld [vmem:[%s8984_s3 + $0xa0] sm:$0xff]   ;;  %v7062_v61 = vld [vmem:[%s8984_s3 + $0x118] sm:$0xff]   ;;  %s6182_s25 = sshll.u32 %s7466_s17, 8 }
  0x1c   : > { %s7498_s18 = scalar_lea.vmem %s9003_s0, %s6181_s26  ;;  %6413 = vmatprep.subr.bf16.mxu0 %v7364_v16  ;;  %6453 = vmatprep.subr.bf16.mxu1 %v7364_v16  ;;  %v7063_v62 = vld [vmem:[%s8984_s3 + $0xc0] sm:$0xff]   ;;  %v7064_v63 = vld [vmem:[%s8984_s3 + $0x138] sm:$0xff]   ;;  %v7079_v14 = vld [vmem:[%s8984_s3 + $0x130] sm:$0xff]   ;;  %s8938_s22 = scalar_lea.hbm %s8995_s14, %s6182_s25 }
  0x1d   : > { %v467_v0 = vld [vmem:[%s7498_s18] sm:$0xff]  ;;  %v468_v1 = vld [vmem:[%s7498_s18 + $0x8] sm:$0xff]  ;;  %v7081_v17 = vld [vmem:[%s8984_s3 + $0x150] sm:$0xff]  }
  0x1e   : > { %v479_v2 = vsel %vm478_vm0, %v467_v0, 0.0  ;;  %v482_v3 = vsel %vm478_vm0, %v468_v1, 0.0  ;;  %v7080_v15 = vld [vmem:[%s8984_s3 + $0x1a8] sm:$0xff]   ;;  %v7082_v18 = vld [vmem:[%s8984_s3 + $0x158] sm:$0xff]   ;;  %v7083_v19 = vld [vmem:[%s8984_s3 + $0x160] sm:$0xff]  }
  0x1f   : > { %480 = vadd.xlane.f32.xlu0 %v479_v2  ;;  %v7067_v2 = vld [vmem:[%s8984_s3 + $0xd0] sm:$0xff]   ;;  %v7084_v20 = vld [vmem:[%s8984_s3 + $0x180] sm:$0xff]  }
  0x23   : > { %483 = vadd.xlane.f32.xlu0 %v482_v3  ;;  %v7068_v3 = vld [vmem:[%s8984_s3 + $0x148] sm:$0xff]  }
  0xac   : > { %v481_v4 = vpop.xlane.xlu0 %480 }
  0xad   : > { %v486_v5 = vmul.f32 0.020833334, %v481_v4  ;;  %v7069_v4 = vld [vmem:[%s8984_s3 + $0xf0] sm:$0xff]  }
  0xaf   : > { %v488_v6 = vsub.f32 %v467_v0, %v486_v5  ;;  %v7065_v0 = vld [vmem:[%s8984_s3 + $0xc8] sm:$0xff]  }
  0xb0   : > { %v484_v7 = vpop.xlane.xlu0 %483  ;;  %v7070_v5 = vld [vmem:[%s8984_s3 + $0x168] sm:$0xff]  }
  0xb1   : > { %v487_v8 = vmul.f32 0.020833334, %v484_v7  ;;  %v490_v9 = vmul.f32 %v488_v6, %v488_v6  ;;  %v7072_v7 = vld [vmem:[%s8984_s3 + $0x170] sm:$0xff]  }
  0xb3   : > { %v489_v10 = vsub.f32 %v468_v1, %v487_v8  ;;  %v492_v11 = vsel %vm478_vm0, %v490_v9, 0.0  ;;  %v7066_v1 = vld [vmem:[%s8984_s3 + $0x140] sm:$0xff]   ;;  %v7074_v9 = vld [vmem:[%s8984_s3 + $0x178] sm:$0xff]  }
  0xb4   : > { %493 = vadd.xlane.f32.xlu1 %v492_v11  ;;  %v7073_v8 = vld [vmem:[%s8984_s3 + $0x100] sm:$0xff]   ;;  %v7076_v11 = vld [vmem:[%s8984_s3 + $0x198] sm:$0xff]  }
  0xb5   : > { %v491_v12 = vmul.f32 %v489_v10, %v489_v10 }
  0xb7   : > { %v495_v13 = vsel %vm478_vm0, %v491_v12, 0.0  ;;  %v7077_v12 = vld [vmem:[%s8984_s3 + $0x128] sm:$0xff]  }
  0xb8   : > { %496 = vadd.xlane.f32.xlu1 %v495_v13  ;;  %v7078_v13 = vld [vmem:[%s8984_s3 + $0x1a0] sm:$0xff]  }
 0x141   : > { %v494_v21 = vpop.xlane.xlu1 %493 }
 0x142   : > { %v498_v22 = vmul.f32 0.020833334, %v494_v21  ;;  %v7085_v21 = vld [vmem:[%s8984_s3 + $0x188] sm:$0xff]  }
 0x144   : > { %v500_v23 = vadd.f32 1e-05, %v498_v22  ;;  %v7086_v22 = vld [vmem:[%s8984_s3 + $0x190] sm:$0xff]  }
 0x145   : > { %v497_v24 = vpop.xlane.xlu1 %496 }
 0x146   : > { %7186 = vrsqrt.f32 %v500_v23  ;;  %v499_v25 = vmul.f32 0.020833334, %v497_v24 }
 0x148   : > { %v501_v26 = vadd.f32 1e-05, %v499_v25 }
 0x14a   : > { %7188 = vrsqrt.f32 %v501_v26 }
 0x150   : > { %v7187_v27 = vpop.eup %7186 }
 0x151   : > { %v504_v28 = vmul.f32 %v7187_v27, %v488_v6  ;;  %v7071_v6 = vld [vmem:[%s8984_s3 + $0xf8] sm:$0xff]  }
 0x153   : > { %v512_v31 = vmul.f32 %v5788_v29, %v504_v28 }
 0x154   : > { %v7189_v30 = vpop.eup %7188 }
 0x155   : > { %v505_v32 = vmul.f32 %v7189_v30, %v489_v10  ;;  %v520_v35 = vadd.f32 %v5789_v33, %v512_v31  ;;  %v7075_v10 = vld [vmem:[%s8984_s3 + $0x120] sm:$0xff]  }
 0x157   : > { %v513_v34 = vmul.f32 %v5788_v29, %v505_v32 }
 0x159   : > { %v521_v36 = vadd.f32 %v5789_v33, %v513_v34 }
 0x15b   : > { %v7548_v39 = vpack.c.bf16 %v521_v36, %v520_v35 }
 0x15d   : > { %6410 = vmatmul.mubr.msk.bf16.vlgmr.msra.gmra.mrb[0].mxu0 %vm478_vm0, %v7548_v39  ;;  %6440 = vmatmul.mubr.msk.bf16.vlgmr.msra.gmra.mrb[0].mxu1 %vm478_vm0, %v7548_v39 }
 0x15e   : > { %6414 = vmatpush3.bf16.msra.mxu0 %v7039_v37  ;;  %6454 = vmatpush3.bf16.msra.mxu1 %v7040_v38 }
 0x15f   : > { %6415 = vmatprep.subr.bf16.mxu0 %v7364_v16  ;;  %6455 = vmatprep.subr.bf16.mxu1 %v7364_v16 }
 0x160   : > { %6419 = vmatprep.mubr.msk.bf16.mxu0 %vm7365_vm1, %v7364_v16  ;;  %6459 = vmatprep.mubr.msk.bf16.mxu1 %vm7365_vm1, %v7364_v16 }
 0x162   : > { %6416 = vmatpush3.bf16.msra.mxu0 %v7041_v40  ;;  %6456 = vmatpush3.bf16.msra.mxu1 %v7042_v41 }
 0x163   : > { %6417 = vmatprep.subr.bf16.mxu0 %v7364_v16  ;;  %6457 = vmatprep.subr.bf16.mxu1 %v7364_v16 }
 0x166   : > { %6418 = vmatpush3.bf16.msra.mxu0 %v7043_v42  ;;  %6458 = vmatpush3.bf16.msra.mxu1 %v7044_v43 }
 0x167   : > { %6423 = vmatprep.subr.bf16.mxu0 %v7364_v16  ;;  %6473 = vmatprep.subr.bf16.mxu1 %v7364_v16 }
 0x169   : > { %6420 = vmatmul.mubr.msk.bf16.vlgmr.msra.gmra.mrb[4].mxu0 %vm478_vm0, %v7548_v39  ;;  %6460 = vmatmul.mubr.msk.bf16.vlgmr.msra.gmra.mrb[4].mxu1 %vm478_vm0, %v7548_v39 }
 0x16a   : > { %6424 = vmatpush3.bf16.msra.mxu0 %v7045_v44  ;;  %6474 = vmatpush3.bf16.msra.mxu1 %v7046_v45 }
 0x16b   : > { %6425 = vmatprep.subr.bf16.mxu0 %v7364_v16  ;;  %6475 = vmatprep.subr.bf16.mxu1 %v7364_v16 }
 0x16c   : > { %6429 = vmatprep.mubr.msk.bf16.mxu0 %vm7365_vm1, %v7364_v16  ;;  %6479 = vmatprep.mubr.msk.bf16.mxu1 %vm7365_vm1, %v7364_v16 }
 0x16e   : > { %6426 = vmatpush3.bf16.msra.mxu0 %v7047_v46  ;;  %6476 = vmatpush3.bf16.msra.mxu1 %v7048_v47 }
 0x16f   : > { %6427 = vmatprep.subr.bf16.mxu0 %v7364_v16  ;;  %6477 = vmatprep.subr.bf16.mxu1 %v7364_v16 }
 0x172   : > { %6428 = vmatpush3.bf16.msra.mxu0 %v7049_v48  ;;  %6478 = vmatpush3.bf16.msra.mxu1 %v7050_v49 }
 0x173   : > { %6443 = vmatprep.subr.bf16.mxu0 %v7364_v16  ;;  %6493 = vmatprep.subr.bf16.mxu1 %v7364_v16 }
 0x175   : > { %6430 = vmatmul.mubr.msk.bf16.vlgmr.msra.gmra.mrb[8].mxu0 %vm478_vm0, %v7548_v39  ;;  %6480 = vmatmul.mubr.msk.bf16.vlgmr.msra.gmra.mrb[8].mxu1 %vm478_vm0, %v7548_v39 }
 0x176   : > { %6444 = vmatpush3.bf16.msra.mxu0 %v7051_v50  ;;  %6494 = vmatpush3.bf16.msra.mxu1 %v7052_v51 }
 0x177   : > { %6445 = vmatprep.subr.bf16.mxu0 %v7364_v16  ;;  %6495 = vmatprep.subr.bf16.mxu1 %v7364_v16 }
 0x178   : > { %6449 = vmatprep.mubr.msk.bf16.mxu0 %vm7365_vm1, %v7364_v16  ;;  %6499 = vmatprep.mubr.msk.bf16.mxu1 %vm7365_vm1, %v7364_v16 }
 0x17a   : > { %6446 = vmatpush3.bf16.msra.mxu0 %v7053_v52  ;;  %6496 = vmatpush3.bf16.msra.mxu1 %v7054_v53 }
 0x17b   : > { %6447 = vmatprep.subr.bf16.mxu0 %v7364_v16  ;;  %6497 = vmatprep.subr.bf16.mxu1 %v7364_v16 }
 0x17e   : > { %6448 = vmatpush3.bf16.msra.mxu0 %v7055_v54  ;;  %6498 = vmatpush3.bf16.msra.mxu1 %v7056_v55 }
 0x17f   : > { %6463 = vmatprep.subr.bf16.mxu0 %v7364_v16  ;;  %6513 = vmatprep.subr.bf16.mxu1 %v7364_v16 }
 0x181   : > { %6450 = vmatmul.mubr.msk.bf16.vlgmr.msra.gmra.mrb[12].mxu0 %vm478_vm0, %v7548_v39  ;;  %6500 = vmatmul.mubr.msk.bf16.vlgmr.msra.gmra.mrb[12].mxu1 %vm478_vm0, %v7548_v39 }
 0x182   : > { %6464 = vmatpush3.bf16.msra.mxu0 %v7057_v56  ;;  %6514 = vmatpush3.bf16.msra.mxu1 %v7058_v57 }
 0x183   : > { %6465 = vmatprep.subr.bf16.mxu0 %v7364_v16  ;;  %6515 = vmatprep.subr.bf16.mxu1 %v7364_v16 }
 0x184   : > { %6469 = vmatprep.mubr.msk.bf16.mxu0 %vm7365_vm1, %v7364_v16  ;;  %6519 = vmatprep.mubr.msk.bf16.mxu1 %vm7365_vm1, %v7364_v16 }
 0x186   : > { %6466 = vmatpush3.bf16.msra.mxu0 %v7059_v58  ;;  %6516 = vmatpush3.bf16.msra.mxu1 %v7060_v59 }
 0x187   : > { %6467 = vmatprep.subr.bf16.mxu0 %v7364_v16  ;;  %6517 = vmatprep.subr.bf16.mxu1 %v7364_v16 }
 0x18a   : > { %6468 = vmatpush3.bf16.msra.mxu0 %v7061_v60  ;;  %6518 = vmatpush3.bf16.msra.mxu1 %v7062_v61 }
 0x18b   : > { %6483 = vmatprep.subr.bf16.mxu0 %v7364_v16  ;;  %6533 = vmatprep.subr.bf16.mxu1 %v7364_v16 }
 0x18d   : > { %6470 = vmatmul.mubr.msk.bf16.vlgmr.msra.gmra.mrb[16].mxu0 %vm478_vm0, %v7548_v39  ;;  %6520 = vmatmul.mubr.msk.bf16.vlgmr.msra.gmra.mrb[16].mxu1 %vm478_vm0, %v7548_v39 }
 0x18e   : > { %6484 = vmatpush3.bf16.msra.mxu0 %v7063_v62  ;;  %6534 = vmatpush3.bf16.msra.mxu1 %v7064_v63 }
 0x18f   : > { %6485 = vmatprep.subr.bf16.mxu0 %v7364_v16  ;;  %6535 = vmatprep.subr.bf16.mxu1 %v7364_v16 }
 0x190   : > { %6489 = vmatprep.mubr.msk.bf16.mxu0 %vm7365_vm1, %v7364_v16  ;;  %6539 = vmatprep.mubr.msk.bf16.mxu1 %vm7365_vm1, %v7364_v16 }
 0x192   : > { %6486 = vmatpush3.bf16.msra.mxu0 %v7065_v0  ;;  %6536 = vmatpush3.bf16.msra.mxu1 %v7066_v1 }
 0x193   : > { %6487 = vmatprep.subr.bf16.mxu0 %v7364_v16  ;;  %6537 = vmatprep.subr.bf16.mxu1 %v7364_v16 }
 0x196   : > { %6488 = vmatpush3.bf16.msra.mxu0 %v7067_v2  ;;  %6538 = vmatpush3.bf16.msra.mxu1 %v7068_v3 }
 0x197   : > { %6503 = vmatprep.subr.bf16.mxu0 %v7364_v16  ;;  %6553 = vmatprep.subr.bf16.mxu1 %v7364_v16 }
 0x199   : > { %6490 = vmatmul.mubr.msk.bf16.vlgmr.msra.gmra.mrb[20].mxu0 %vm478_vm0, %v7548_v39  ;;  %6540 = vmatmul.mubr.msk.bf16.vlgmr.msra.gmra.mrb[20].mxu1 %vm478_vm0, %v7548_v39 }
 0x19a   : > { %6504 = vmatpush3.bf16.msra.mxu0 %v7069_v4  ;;  %6554 = vmatpush3.bf16.msra.mxu1 %v7070_v5 }
 0x19b   : > { %6505 = vmatprep.subr.bf16.mxu0 %v7364_v16  ;;  %6555 = vmatprep.subr.bf16.mxu1 %v7364_v16 }
 0x19c   : > { %6509 = vmatprep.mubr.msk.bf16.mxu0 %vm7365_vm1, %v7364_v16  ;;  %6559 = vmatprep.mubr.msk.bf16.mxu1 %vm7365_vm1, %v7364_v16 }
 0x19e   : > { %6506 = vmatpush3.bf16.msra.mxu0 %v7071_v6  ;;  %6556 = vmatpush3.bf16.msra.mxu1 %v7072_v7 }
 0x19f   : > { %6507 = vmatprep.subr.bf16.mxu0 %v7364_v16  ;;  %6557 = vmatprep.subr.bf16.mxu1 %v7364_v16 }
 0x1a2   : > { %6508 = vmatpush3.bf16.msra.mxu0 %v7073_v8  ;;  %6558 = vmatpush3.bf16.msra.mxu1 %v7074_v9 }
 0x1a3   : > { %6523 = vmatprep.subr.bf16.mxu0 %v7364_v16  ;;  %6573 = vmatprep.subr.bf16.mxu1 %v7364_v16 }
 0x1a5   : > { %6510 = vmatmul.mubr.msk.bf16.vlgmr.msra.gmra.mrb[24].mxu0 %vm478_vm0, %v7548_v39  ;;  %6560 = vmatmul.mubr.msk.bf16.vlgmr.msra.gmra.mrb[24].mxu1 %vm478_vm0, %v7548_v39 }
 0x1a6   : > { %6524 = vmatpush3.bf16.msra.mxu0 %v7075_v10  ;;  %6574 = vmatpush3.bf16.msra.mxu1 %v7076_v11 }
 0x1a7   : > { %6525 = vmatprep.subr.bf16.mxu0 %v7364_v16  ;;  %6575 = vmatprep.subr.bf16.mxu1 %v7364_v16 }
 0x1a8   : > { %6529 = vmatprep.mubr.msk.bf16.mxu0 %vm7365_vm1, %v7364_v16  ;;  %6579 = vmatprep.mubr.msk.bf16.mxu1 %vm7365_vm1, %v7364_v16 }
 0x1aa   : > { %6526 = vmatpush3.bf16.msra.mxu0 %v7077_v12  ;;  %6576 = vmatpush3.bf16.msra.mxu1 %v7078_v13 }
 0x1ab   : > { %6527 = vmatprep.subr.bf16.mxu0 %v7364_v16  ;;  %6577 = vmatprep.subr.bf16.mxu1 %v7364_v16 }
 0x1ae   : > { %6528 = vmatpush3.bf16.msra.mxu0 %v7079_v14  ;;  %6578 = vmatpush3.bf16.msra.mxu1 %v7080_v15 }
 0x1af   : > { %6543 = vmatprep.subr.bf16.mxu0 %v7364_v16  ;;  %6589 = vmatprep.subr.bf16.mxu1 %v7364_v16 }
 0x1b1   : > { %6530 = vmatmul.mubr.msk.bf16.vlgmr.msra.gmra.mrb[28].mxu0 %vm478_vm0, %v7548_v39  ;;  %6580 = vmatmul.mubr.msk.bf16.vlgmr.msra.gmra.mrb[28].mxu1 %vm478_vm0, %v7548_v39 }
 0x1b2   : > { %6544 = vmatpush3.bf16.msra.mxu0 %v7081_v17  ;;  %6549 = vmatprep.mubr.msk.bf16.mxu0 %vm7365_vm1, %v7364_v16 }
 0x1b3   : > { %6545 = vmatprep.subr.bf16.mxu0 %v7364_v16  ;;  %6591 = vmatprep.mubr.msk.bf16.mxu1 %vm7365_vm1, %v7364_v16 }
 0x1b6   : > { %6546 = vmatpush3.bf16.msra.mxu0 %v7082_v18 }
 0x1b7   : > { %6547 = vmatprep.subr.bf16.mxu0 %v7364_v16 }
 0x1ba   : > { %6548 = vmatpush3.bf16.msra.mxu0 %v7083_v19 }
 0x1bb   : > { %6563 = vmatprep.subr.bf16.mxu0 %v7364_v16 }
 0x1bd   : > { %6550 = vmatmul.mubr.msk.bf16.vlgmr.msra.gmra.mrb[32].mxu0 %vm478_vm0, %v7548_v39 }
 0x1be   : > { %6564 = vmatpush3.bf16.msra.mxu0 %v7084_v20  ;;  %6569 = vmatprep.mubr.msk.bf16.mxu0 %vm7365_vm1, %v7364_v16 }
 0x1bf   : > { %6565 = vmatprep.subr.bf16.mxu0 %v7364_v16 }
 0x1c2   : > { %6566 = vmatpush3.bf16.msra.mxu0 %v7085_v21 }
 0x1c3   : > { %6567 = vmatprep.subr.bf16.mxu0 %v7364_v16 }
 0x1c6   : > { %6568 = vmatpush3.bf16.msra.mxu0 %v7086_v22 }
 0x1c7   : > { %6583 = vmatprep.subr.bf16.mxu0 %v7364_v16 }
 0x1c9   : > { %6570 = vmatmul.mubr.msk.bf16.vlgmr.msra.gmra.mrb[36].mxu0 %vm478_vm0, %v7548_v39 }
 0x1ca   : > { %6585 = vmatprep.mubr.msk.bf16.mxu0 %vm7365_vm1, %v7364_v16 }
 0x230   : > { %v7808_v23 = vpop.f32.mrb[0].mxu0  ;;  %v863_v24 = vpop.f32.mrb[0].mxu1 }
 0x231   : > { %v6411_v25 = vpop.f32.mrb[1].mxu0  ;;  %v6441_v26 = vpop.f32.mrb[1].mxu1 }
 0x232   : > { %v7810_v27 = vpop.f32.mrb[2].mxu0  ;;  %v866_v28 = vpop.f32.mrb[2].mxu1 }
 0x233   : > { %v1696_v29 = vpack.c.bf16 %v7810_v27, %v7808_v23  ;;  %v1699_v30 = vpack.c.bf16 %v866_v28, %v863_v24  ;;  %v6412_v31 = vpop.f32.mrb[3].mxu0  ;;  %v6442_v32 = vpop.f32.mrb[3].mxu1 }
 0x23c   : > { %v745_v33 = vpop.f32.mrb[4].mxu0  ;;  %v981_v34 = vpop.f32.mrb[4].mxu1 }
 0x23d   : > { %v6421_v35 = vpop.f32.mrb[5].mxu0  ;;  %v6461_v36 = vpop.f32.mrb[5].mxu1 }
 0x23e   : > { %v748_v37 = vpop.f32.mrb[6].mxu0  ;;  %v984_v38 = vpop.f32.mrb[6].mxu1 }
 0x23f   : > { %v1697_v39 = vpack.c.bf16 %v748_v37, %v745_v33  ;;  %v1701_v40 = vpack.c.bf16 %v984_v38, %v981_v34  ;;  %v6422_v41 = vpop.f32.mrb[7].mxu0  ;;  %v6462_v42 = vpop.f32.mrb[7].mxu1 }
 0x248   : > { %v7814_v43 = vpop.f32.mrb[8].mxu0  ;;  %v1099_v44 = vpop.f32.mrb[8].mxu1 }
 0x249   : > { %v6431_v45 = vpop.f32.mrb[9].mxu0  ;;  %v6481_v46 = vpop.f32.mrb[9].mxu1 }
 0x24a   : > { %v7816_v47 = vpop.f32.mrb[10].mxu0  ;;  %v1102_v48 = vpop.f32.mrb[10].mxu1 }
 0x24b   : > { %v1698_v49 = vpack.c.bf16 %v7816_v47, %v7814_v43  ;;  %v1703_v50 = vpack.c.bf16 %v1102_v48, %v1099_v44  ;;  %v6432_v51 = vpop.f32.mrb[11].mxu0  ;;  %v6482_v52 = vpop.f32.mrb[11].mxu1 }
 0x24d   : > { %v1766_v53 = vsel %vm1714_vm2, %v1703_v50, 0 }
 0x24e   : > { %6590 = vmatpush3.bf16.xpose.msra.mxu1 %v1766_v53 }
 0x24f   : > { %6601 = vmatprep.subr.bf16.mxu1 %v7364_v16 }
 0x254   : > { %v7822_v54 = vpop.f32.mrb[12].mxu0  ;;  %v1217_v55 = vpop.f32.mrb[12].mxu1 }
 0x255   : > { %v6451_v56 = vpop.f32.mrb[13].mxu0  ;;  %v6501_v57 = vpop.f32.mrb[13].mxu1  ;;  %6592 = vmatmul.mubr.msk.bf16.vlgmr.msra.gmra.mrb[32].mxu1 %vm1714_vm2, %v1697_v39 }
 0x256   : > { %v7825_v58 = vpop.f32.mrb[14].mxu0  ;;  %v1220_v59 = vpop.f32.mrb[14].mxu1  ;;  %6603 = vmatprep.mubr.msk.bf16.mxu1 %vm7365_vm1, %v7364_v16 }
 0x257   : > { %v1700_v60 = vpack.c.bf16 %v7825_v58, %v7822_v54  ;;  %v1705_v61 = vpack.c.bf16 %v1220_v59, %v1217_v55  ;;  %v6452_v62 = vpop.f32.mrb[15].mxu0  ;;  %v6502_v63 = vpop.f32.mrb[15].mxu1 }
 0x259   : > { %v1860_v0 = vsel %vm1714_vm2, %v1705_v61, 0 }
 0x25a   : > { %6602 = vmatpush3.bf16.xpose.msra.mxu1 %v1860_v0  ;;  %v469_v0 = vlaneseq }
 0x25b   : > { %6613 = vmatprep.subr.bf16.mxu1 %v7364_v16 }
 0x260   : > { %v1040_v1 = vpop.f32.mrb[16].mxu0  ;;  %v1335_v2 = vpop.f32.mrb[16].mxu1 }
 0x261   : > { %v6471_v3 = vpop.f32.mrb[17].mxu0  ;;  %v6521_v4 = vpop.f32.mrb[17].mxu1  ;;  %6604 = vmatmul.mubr.msk.bf16.vlgmr.msra.gmra.mrb[36].mxu1 %vm1714_vm2, %v1699_v30 }
 0x262   : > { %v1043_v5 = vpop.f32.mrb[18].mxu0  ;;  %v1338_v6 = vpop.f32.mrb[18].mxu1  ;;  %6615 = vmatprep.mubr.msk.bf16.mxu1 %vm7365_vm1, %v7364_v16 }
 0x263   : > { %v1702_v7 = vpack.c.bf16 %v1043_v5, %v1040_v1  ;;  %v1707_v8 = vpack.c.bf16 %v1338_v6, %v1335_v2  ;;  %v6472_v9 = vpop.f32.mrb[19].mxu0  ;;  %v6522_v10 = vpop.f32.mrb[19].mxu1  ;;  %v7891_v1 = vshrl.u32 %v469_v0, 7  ;;  %v473_v2 = vand.u32 127, %v469_v0 }
 0x265   : > { %v1719_v11 = vsel %vm1714_vm2, %v1702_v7, 0  ;;  %v1954_v12 = vsel %vm1714_vm2, %v1707_v8, 0  ;;  %v471_v5 = vadd.s32 8, %v7891_v1  ;;  %vm7895_vm3 = vcmp.ge.s32.totalorder %v7891_v1, %v473_v2 }
 0x266   : > { %6584 = vmatpush3.bf16.xpose.msra.mxu0 %v1719_v11  ;;  %6614 = vmatpush3.bf16.xpose.msra.mxu1 %v1954_v12 }
 0x267   : > { %6625 = vmatprep.subr.bf16.mxu1 %v7364_v16  ;;  %6595 = vmatprep.subr.bf16.mxu0 %v7364_v16  ;;  %vm7901_vm5 = vcmp.ge.s32.totalorder %v471_v5, %v473_v2 }
 0x26c   : > { %v1158_v13 = vpop.f32.mrb[20].mxu0  ;;  %v1453_v14 = vpop.f32.mrb[20].mxu1 }
 0x26d   : > { %v6491_v15 = vpop.f32.mrb[21].mxu0  ;;  %v6541_v17 = vpop.f32.mrb[21].mxu1  ;;  %6586 = vmatmul.mubr.msk.bf16.vlgmr.msra.gmra.mrb[40].mxu0 %vm1714_vm2, %v1696_v29  ;;  %6616 = vmatmul.mubr.msk.bf16.vlgmr.msra.gmra.mrb[40].mxu1 %vm1714_vm2, %v1701_v40 }
 0x26e   : > { %v1161_v18 = vpop.f32.mrb[22].mxu0  ;;  %v1456_v19 = vpop.f32.mrb[22].mxu1  ;;  %6597 = vmatprep.mubr.msk.bf16.mxu0 %vm7365_vm1, %v7364_v16  ;;  %6627 = vmatprep.mubr.msk.bf16.mxu1 %vm7365_vm1, %v7364_v16 }
 0x26f   : > { %v1704_v20 = vpack.c.bf16 %v1161_v18, %v1158_v13  ;;  %v1709_v21 = vpack.c.bf16 %v1456_v19, %v1453_v14  ;;  %v6492_v22 = vpop.f32.mrb[23].mxu0  ;;  %v6542_v24 = vpop.f32.mrb[23].mxu1 }
 0x271   : > { %v1813_v25 = vsel %vm1714_vm2, %v1704_v20, 0  ;;  %6626 = vmatpush3.bf16.msra.mxu1 %v1709_v21 }
 0x272   : > { %6596 = vmatpush3.bf16.xpose.msra.mxu0 %v1813_v25  ;;  %6637 = vmatprep.subr.bf16.mxu1 %v7364_v16 }
 0x273   : > { %6607 = vmatprep.subr.bf16.mxu0 %v7364_v16 }
 0x278   : > { %v1276_v23 = vpop.f32.mrb[24].mxu0  ;;  %v7852_v26 = vpop.f32.mrb[24].mxu1 }
 0x279   : > { %v6511_v27 = vpop.f32.mrb[25].mxu0  ;;  %v6561_v28 = vpop.f32.mrb[25].mxu1  ;;  %6598 = vmatmul.mubr.msk.bf16.vlgmr.msra.gmra.mrb[44].mxu0 %vm1714_vm2, %v1698_v49 }
 0x27a   : > { %v1279_v29 = vpop.f32.mrb[26].mxu0  ;;  %v7858_v30 = vpop.f32.mrb[26].mxu1  ;;  %6609 = vmatprep.mubr.msk.bf16.mxu0 %vm7365_vm1, %v7364_v16 }
 0x27b   : > { %v1706_v31 = vpack.c.bf16 %v1279_v29, %v1276_v23  ;;  %v1711_v32 = vpack.c.bf16 %v7858_v30, %v7852_v26  ;;  %v6512_v33 = vpop.f32.mrb[27].mxu0  ;;  %v6562_v34 = vpop.f32.mrb[27].mxu1 }
 0x27d   : > { %v1907_v35 = vsel %vm1714_vm2, %v1706_v31, 0 }
 0x27e   : > { %6608 = vmatpush3.bf16.xpose.msra.mxu0 %v1907_v35 }
 0x27f   : > { %6619 = vmatprep.subr.bf16.mxu0 %v7364_v16 }
 0x284   : > { %v1394_v36 = vpop.f32.mrb[28].mxu0  ;;  %v7866_v37 = vpop.f32.mrb[28].mxu1 }
 0x285   : > { %v6531_v38 = vpop.f32.mrb[29].mxu0  ;;  %v6581_v39 = vpop.f32.mrb[29].mxu1  ;;  %6610 = vmatmul.mubr.msk.bf16.vlgmr.msra.gmra.mrb[48].mxu0 %vm1714_vm2, %v1700_v60 }
 0x286   : > { %v1397_v40 = vpop.f32.mrb[30].mxu0  ;;  %v7872_v41 = vpop.f32.mrb[30].mxu1  ;;  %6621 = vmatprep.mubr.msk.bf16.mxu0 %vm7365_vm1, %v7364_v16 }
 0x287   : > { %v1708_v42 = vpack.c.bf16 %v1397_v40, %v1394_v36  ;;  %v1713_v43 = vpack.c.bf16 %v7872_v41, %v7866_v37  ;;  %v6532_v44 = vpop.f32.mrb[31].mxu0  ;;  %v6582_v45 = vpop.f32.mrb[31].mxu1  ;;  %v2434_v41 = vld [vmem:[%s8985_s4] sm:$0xf] }
 0x289   : > { %6620 = vmatpush3.bf16.msra.mxu0 %v1708_v42 }
 0x28a   : > { %6631 = vmatprep.subr.bf16.mxu0 %v7364_v16 }
 0x290   : > { %v7879_v46 = vpop.f32.mrb[32].mxu0 }
 0x291   : > { %v6551_v47 = vpop.f32.mrb[33].mxu0 }
 0x292   : > { %v7881_v48 = vpop.f32.mrb[34].mxu0 }
 0x293   : > { %v1710_v49 = vpack.c.bf16 %v7881_v48, %v7879_v46  ;;  %v6552_v50 = vpop.f32.mrb[35].mxu0 }
 0x29c   : > { %v7885_v51 = vpop.f32.mrb[36].mxu0 }
 0x29d   : > { %v6571_v52 = vpop.f32.mrb[37].mxu0 }
 0x29e   : > { %v7887_v53 = vpop.f32.mrb[38].mxu0 }
 0x29f   : > { %v1712_v54 = vpack.c.bf16 %v7887_v53, %v7885_v51  ;;  %v6572_v55 = vpop.f32.mrb[39].mxu0 }
 0x328   : > { %v1802_v56 = vpop.f32.mrb[32].mxu1 }
 0x329   : > { %v6593_v57 = vpop.f32.mrb[33].mxu1  ;;  %v1999_v9 = vmul.f32 0.14433756, %v1802_v56 }
 0x32a   : > { %v1805_v58 = vpop.f32.mrb[34].mxu1 }
 0x32b   : > { %v6594_v59 = vpop.f32.mrb[35].mxu1  ;;  %v2000_v12 = vmul.f32 0.14433756, %v1805_v58  ;;  %v2015_v24 = vsel %vm7895_vm3, %v1999_v9, -1e+30 }
 0x32c   : > { %v2032_v23 = vsel %vm2025_vm4, %v2015_v24, -inf }
 0x32d   : > { %v2016_v25 = vsel %vm7901_vm5, %v2000_v12, -1e+30 }
 0x32e   : > { %v2035_v27 = vsel %vm2025_vm4, %v2016_v25, -inf }
 0x334   : > { %v1896_v60 = vpop.f32.mrb[36].mxu1 }
 0x335   : > { %v6605_v61 = vpop.f32.mrb[37].mxu1  ;;  %v2003_v29 = vmul.f32 0.14433756, %v1896_v60 }
 0x336   : > { %v1899_v62 = vpop.f32.mrb[38].mxu1 }
 0x337   : > { %v6606_v63 = vpop.f32.mrb[39].mxu1  ;;  %v2004_v34 = vmul.f32 0.14433756, %v1899_v62  ;;  %v2019_v44 = vsel %vm7895_vm3, %v2003_v29, -1e+30 }
 0x338   : > { %v2044_v50 = vsel %vm2025_vm4, %v2019_v44, -inf }
 0x339   : > { %v7925_v47 = vsel %vm7901_vm5, %v2004_v34, -1e+30 }
 0x33a   : > { %v2047_v52 = vsel %vm2025_vm4, %v7925_v47, -inf }
 0x340   : > { %v1755_v3 = vpop.f32.mrb[40].mxu0  ;;  %v1990_v4 = vpop.f32.mrb[40].mxu1 }
 0x341   : > { %v1997_v6 = vmul.f32 0.14433756, %v1755_v3  ;;  %v6587_v7 = vpop.f32.mrb[41].mxu0  ;;  %v6617_v8 = vpop.f32.mrb[41].mxu1  ;;  %v2007_v56 = vmul.f32 0.14433756, %v1990_v4 }
 0x342   : > { %v1758_v10 = vpop.f32.mrb[42].mxu0  ;;  %v1993_v11 = vpop.f32.mrb[42].mxu1 }
 0x343   : > { %v1998_v13 = vmul.f32 0.14433756, %v1758_v10  ;;  %v6588_v14 = vpop.f32.mrb[43].mxu0  ;;  %v6618_v15 = vpop.f32.mrb[43].mxu1  ;;  %v2013_v18 = vsel %vm7895_vm3, %v1997_v6, -1e+30 }
 0x344   : > { %v2026_v20 = vsel %vm2025_vm4, %v2013_v18, -inf  ;;  %v2008_v59 = vmul.f32 0.14433756, %v1993_v11  ;;  %v7939_v3 = vsel %vm7895_vm3, %v2007_v56, -1e+30 }
 0x345   : > { %v2014_v21 = vsel %vm7901_vm5, %v1998_v13, -1e+30  ;;  %2027 = vmax.xlane.f32.xlu0 %v2026_v20  ;;  %v2056_v6 = vsel %vm2025_vm4, %v7939_v3, -inf }
 0x346   : > { %v2029_v22 = vsel %vm2025_vm4, %v2014_v21, -inf  ;;  %v7945_v5 = vsel %vm7901_vm5, %v2008_v59, -1e+30 }
 0x347   : > { %2030 = vmax.xlane.f32.xlu1 %v2029_v22  ;;  %v2059_v7 = vsel %vm2025_vm4, %v7945_v5, -inf }
 0x349   : > { %2033 = vmax.xlane.f32.xlu0 %v2032_v23 }
 0x34b   : > { %2036 = vmax.xlane.f32.xlu1 %v2035_v27 }
 0x34c   : > { %v1849_v28 = vpop.f32.mrb[44].mxu0 }
 0x34d   : > { %v2001_v31 = vmul.f32 0.14433756, %v1849_v28  ;;  %v6599_v33 = vpop.f32.mrb[45].mxu0 }
 0x34e   : > { %v1852_v35 = vpop.f32.mrb[46].mxu0 }
 0x34f   : > { %v2002_v36 = vmul.f32 0.14433756, %v1852_v35  ;;  %v6600_v38 = vpop.f32.mrb[47].mxu0  ;;  %v2017_v39 = vsel %vm7895_vm3, %v2001_v31, -1e+30 }
 0x350   : > { %v2038_v40 = vsel %vm2025_vm4, %v2017_v39, -inf }
 0x351   : > { %2039 = vmax.xlane.f32.xlu0 %v2038_v40  ;;  %v2018_v42 = vsel %vm7901_vm5, %v2002_v36, -1e+30 }
 0x352   : > { %v2041_v45 = vsel %vm2025_vm4, %v2018_v42, -inf }
 0x353   : > { %2042 = vmax.xlane.f32.xlu1 %v2041_v45 }
 0x355   : > { %2045 = vmax.xlane.f32.xlu0 %v2044_v50 }
 0x357   : > { %2048 = vmax.xlane.f32.xlu1 %v2047_v52 }
 0x358   : > { %v1943_v55 = vpop.f32.mrb[48].mxu0 }
 0x359   : > { %v2005_v57 = vmul.f32 0.14433756, %v1943_v55  ;;  %v6611_v58 = vpop.f32.mrb[49].mxu0 }
 0x35a   : > { %v1946_v60 = vpop.f32.mrb[50].mxu0 }
 0x35b   : > { %v2006_v61 = vmul.f32 0.14433756, %v1946_v60  ;;  %v6612_v62 = vpop.f32.mrb[51].mxu0  ;;  %v2021_v63 = vsel %vm7895_vm3, %v2005_v57, -1e+30 }
 0x35c   : > { %v2050_v0 = vsel %vm2025_vm4, %v2021_v63, -inf }
 0x35d   : > { %2051 = vmax.xlane.f32.xlu0 %v2050_v0  ;;  %v7935_v2 = vsel %vm7901_vm5, %v2006_v61, -1e+30 }
 0x35e   : > { %v2053_v4 = vsel %vm2025_vm4, %v7935_v2, -inf }
 0x35f   : > { %2054 = vmax.xlane.f32.xlu1 %v2053_v4 }
 0x361   : > { %2057 = vmax.xlane.f32.xlu0 %v2056_v6 }
 0x363   : > { %2060 = vmax.xlane.f32.xlu1 %v2059_v7 }
 0x3d2   : > { %v2028_v8 = vpop.xlane.xlu0 %2027 }
 0x3d3   : > { %v2062_v9 = vsub.f32 %v2013_v18, %v2028_v8 }
 0x3d4   : > { %v2031_v10 = vpop.xlane.xlu1 %2030 }
 0x3d5   : > { %v2063_v11 = vsub.f32 %v2014_v21, %v2031_v10  ;;  %v2074_v12 = vmul.f32 1.442695, %v2062_v9 }
 0x3d6   : > { %v2034_v14 = vpop.xlane.xlu0 %2033 }
 0x3d7   : > { %v2076_v13 = vmul.f32 1.442695, %v2063_v11  ;;  %7190 = vpow2.f32 %v2074_v12  ;;  %v2064_v15 = vsub.f32 %v2015_v24, %v2034_v14 }
 0x3d8   : > { %v2037_v20 = vpop.xlane.xlu1 %2036 }
 0x3d9   : > { %7192 = vpow2.f32 %v2076_v13  ;;  %v2065_v22 = vsub.f32 %v2016_v25, %v2037_v20  ;;  %v2078_v23 = vmul.f32 1.442695, %v2064_v15 }
 0x3db   : > { %v2080_v27 = vmul.f32 1.442695, %v2065_v22  ;;  %7194 = vpow2.f32 %v2078_v23 }
 0x3dd   : > { %7196 = vpow2.f32 %v2080_v27 }
 0x3de   : > { %v2040_v28 = vpop.xlane.xlu0 %2039 }
 0x3df   : > { %v2066_v29 = vsub.f32 %v2017_v39, %v2040_v28 }
 0x3e0   : > { %v2043_v31 = vpop.xlane.xlu1 %2042 }
 0x3e1   : > { %v2082_v33 = vmul.f32 1.442695, %v2066_v29  ;;  %v2067_v34 = vsub.f32 %v2018_v42, %v2043_v31  ;;  %v7951_v18 = vpop.eup %7190 }
 0x3e2   : > { %v2046_v21 = vpop.xlane.xlu0 %2045  ;;  %v2098_v25 = vsel %vm2025_vm4, %v7951_v18, 0.0 }
 0x3e3   : > { %v7953_v35 = vpop.eup %7192  ;;  %7198 = vpow2.f32 %v2082_v33  ;;  %v2084_v36 = vmul.f32 1.442695, %v2067_v34  ;;  %v2068_v24 = vsub.f32 %v2019_v44, %v2046_v21  ;;  %2099 = vadd.xlane.f32.xlu0 %v2098_v25 }
 0x3e4   : > { %v2049_v38 = vpop.xlane.xlu1 %2048  ;;  %v2101_v40 = vsel %vm2025_vm4, %v7953_v35, 0.0 }
 0x3e5   : > { %7200 = vpow2.f32 %v2084_v36  ;;  %v2086_v39 = vmul.f32 1.442695, %v2068_v24  ;;  %v2069_v42 = vsub.f32 %v7925_v47, %v2049_v38  ;;  %2102 = vadd.xlane.f32.xlu1 %v2101_v40  ;;  %v7960_v45 = vpop.eup %7194 }
 0x3e6   : > { %v2104_v44 = vsel %vm2025_vm4, %v7960_v45, 0.0 }
 0x3e7   : > { %v7962_v50 = vpop.eup %7196  ;;  %7202 = vpow2.f32 %v2086_v39  ;;  %v2088_v52 = vmul.f32 1.442695, %v2069_v42  ;;  %2105 = vadd.xlane.f32.xlu0 %v2104_v44 }
 0x3e8   : > { %v2107_v55 = vsel %vm2025_vm4, %v7962_v50, 0.0 }
 0x3e9   : > { %7204 = vpow2.f32 %v2088_v52  ;;  %2108 = vadd.xlane.f32.xlu1 %v2107_v55 }
 0x3ea   : > { %v2052_v56 = vpop.xlane.xlu0 %2051 }
 0x3eb   : > { %v2070_v57 = vsub.f32 %v2021_v63, %v2052_v56 }
 0x3ec   : > { %v2055_v58 = vpop.xlane.xlu1 %2054 }
 0x3ed   : > { %v7968_v47 = vpop.eup %7198  ;;  %v2090_v59 = vmul.f32 1.442695, %v2070_v57  ;;  %v2071_v60 = vsub.f32 %v7935_v2, %v2055_v58 }
 0x3ee   : > { %v2058_v61 = vpop.xlane.xlu0 %2057  ;;  %v2110_v62 = vsel %vm2025_vm4, %v7968_v47, 0.0 }
 0x3ef   : > { %v7973_v0 = vpop.eup %7200  ;;  %7206 = vpow2.f32 %v2090_v59  ;;  %v2092_v4 = vmul.f32 1.442695, %v2071_v60  ;;  %v2072_v6 = vsub.f32 %v7939_v3, %v2058_v61  ;;  %2111 = vadd.xlane.f32.xlu0 %v2110_v62 }
 0x3f0   : > { %v2061_v7 = vpop.xlane.xlu1 %2060  ;;  %v2113_v63 = vsel %vm2025_vm4, %v7973_v0, 0.0 }
 0x3f1   : > { %v7978_v8 = vpop.eup %7202  ;;  %7208 = vpow2.f32 %v2092_v4  ;;  %v2094_v9 = vmul.f32 1.442695, %v2072_v6  ;;  %v2073_v2 = vsub.f32 %v7945_v5, %v2061_v7  ;;  %2114 = vadd.xlane.f32.xlu1 %v2113_v63  ;;  %v2435_v63 = vld [vmem:[%s8985_s4 + $0x4] sm:$0xf] }
 0x3f2   : > { %v2116_v10 = vsel %vm2025_vm4, %v7978_v8, 0.0 }
 0x3f3   : > { %v7983_v11 = vpop.eup %7204  ;;  %7210 = vpow2.f32 %v2094_v9  ;;  %v2096_v12 = vmul.f32 1.442695, %v2073_v2  ;;  %2117 = vadd.xlane.f32.xlu0 %v2116_v10  ;;  %v2436_v2 = vld [vmem:[%s8985_s4 + $0x8] sm:$0xf] }
 0x3f4   : > { %v2119_v3 = vsel %vm2025_vm4, %v7983_v11, 0.0 }
 0x3f5   : > { %7212 = vpow2.f32 %v2096_v12  ;;  %2120 = vadd.xlane.f32.xlu1 %v2119_v3 }
 0x3f9   : > { %v7987_v13 = vpop.eup %7206 }
 0x3fa   : > { %v2122_v14 = vsel %vm2025_vm4, %v7987_v13, 0.0 }
 0x3fb   : > { %v7991_v5 = vpop.eup %7208  ;;  %2123 = vadd.xlane.f32.xlu0 %v2122_v14 }
 0x3fc   : > { %v2125_v15 = vsel %vm2025_vm4, %v7991_v5, 0.0 }
 0x3fd   : > { %v7995_v20 = vpop.eup %7210  ;;  %2126 = vadd.xlane.f32.xlu1 %v2125_v15 }
 0x3fe   : > { %v2128_v22 = vsel %vm2025_vm4, %v7995_v20, 0.0 }
 0x3ff   : > { %v7999_v23 = vpop.eup %7212  ;;  %2129 = vadd.xlane.f32.xlu0 %v2128_v22 }
 0x400   : > { %v2131_v27 = vsel %vm2025_vm4, %v7999_v23, 0.0 }
 0x401   : > { %2132 = vadd.xlane.f32.xlu1 %v2131_v27 }
 0x470   : > { %v2100_v28 = vpop.xlane.xlu0 %2099 }
 0x471   : > { %7214 = vrcp.f32 %v2100_v28 }
 0x472   : > { %v2103_v29 = vpop.xlane.xlu1 %2102 }
 0x473   : > { %7216 = vrcp.f32 %v2103_v29  ;;  %v2438_v29 = vld [vmem:[%s8985_s4 + $0x10] sm:$0xf] }
 0x474   : > { %v2106_v31 = vpop.xlane.xlu0 %2105 }
 0x475   : > { %7218 = vrcp.f32 %v2106_v31 }
 0x476   : > { %v2109_v33 = vpop.xlane.xlu1 %2108 }
 0x477   : > { %7220 = vrcp.f32 %v2109_v33 }
 0x47b   : > { %v7215_v34 = vpop.eup %7214 }
 0x47c   : > { %v2112_v21 = vpop.xlane.xlu0 %2111  ;;  %v2146_v24 = vmul.f32 %v7215_v34, %v7951_v18 }
 0x47d   : > { %v7217_v36 = vpop.eup %7216  ;;  %7222 = vrcp.f32 %v2112_v21 }
 0x47e   : > { %v2147_v25 = vmul.f32 %v7217_v36, %v7953_v35  ;;  %v2115_v38 = vpop.xlane.xlu1 %2114  ;;  %v2633_v36 = vsel %vm2443_vm6, %v2438_v29, 0 }
 0x47f   : > { %7224 = vrcp.f32 %v2115_v38  ;;  %v7219_v40 = vpop.eup %7218 }
 0x480   : > { %v2118_v39 = vpop.xlane.xlu0 %2117  ;;  %v2158_v42 = vpack.c.bf16 %v2147_v25, %v2146_v24  ;;  %v2148_v44 = vmul.f32 %v7219_v40, %v7960_v45  ;;  %v2439_v25 = vld [vmem:[%s8985_s4 + $0x14] sm:$0xf] }
 0x481   : > { %v7221_v52 = vpop.eup %7220  ;;  %7226 = vrcp.f32 %v2118_v39 }
 0x482   : > { %v2149_v55 = vmul.f32 %v7221_v52, %v7962_v50  ;;  %6622 = vmatmul.mubr.msk.bf16.vlgmr.msra.gmra.mrb[52].mxu0 %vm2025_vm4, %v2158_v42  ;;  %v2121_v56 = vpop.xlane.xlu1 %2120  ;;  %v2680_v52 = vsel %vm2443_vm6, %v2439_v25, 0 }
 0x483   : > { %6632 = vmatpush3.bf16.msra.mxu0 %v1710_v49  ;;  %7228 = vrcp.f32 %v2121_v56  ;;  %6633 = vmatprep.mubr.msk.bf16.mxu0 %vm7365_vm1, %v7364_v16 }
 0x484   : > { %v2159_v18 = vpack.c.bf16 %v2149_v55, %v2148_v44  ;;  %6643 = vmatprep.subr.bf16.mxu0 %v7364_v16 }
 0x486   : > { %6628 = vmatmul.mubr.msk.bf16.vlgmr.msra.gmra.mrb[44].mxu1 %vm2025_vm4, %v2159_v18 }
 0x487   : > { %v7223_v35 = vpop.eup %7222  ;;  %6638 = vmatpush3.bf16.msra.mxu1 %v1711_v32  ;;  %6639 = vmatprep.mubr.msk.bf16.mxu1 %vm7365_vm1, %v7364_v16 }
 0x488   : > { %v2124_v45 = vpop.xlane.xlu0 %2123  ;;  %6649 = vmatprep.subr.bf16.mxu1 %v7364_v16  ;;  %v2150_v48 = vmul.f32 %v7223_v35, %v7968_v47 }
 0x489   : > { %v7225_v46 = vpop.eup %7224  ;;  %7230 = vrcp.f32 %v2124_v45 }
 0x48a   : > { %v2151_v49 = vmul.f32 %v7225_v46, %v7973_v0  ;;  %v2127_v50 = vpop.xlane.xlu1 %2126 }
 0x48b   : > { %v7227_v57 = vpop.eup %7226  ;;  %7232 = vrcp.f32 %v2127_v50 }
 0x48c   : > { %v2130_v58 = vpop.xlane.xlu0 %2129  ;;  %v2160_v59 = vpack.c.bf16 %v2151_v49, %v2150_v48  ;;  %v2152_v26 = vmul.f32 %v7227_v57, %v7978_v8  ;;  %v2492_v8 = vsel %vm2443_vm6, %v2435_v63, 0 }
 0x48d   : > { %v7229_v60 = vpop.eup %7228  ;;  %7234 = vrcp.f32 %v2130_v58 }
 0x48e   : > { %v2153_v30 = vmul.f32 %v7229_v60, %v7983_v11  ;;  %6634 = vmatmul.mubr.msk.bf16.vlgmr.msra.gmra.mrb[56].mxu0 %vm2025_vm4, %v2160_v59  ;;  %v2133_v32 = vpop.xlane.xlu1 %2132 }
 0x48f   : > { %6644 = vmatpush3.bf16.msra.mxu0 %v1712_v54  ;;  %7236 = vrcp.f32 %v2133_v32  ;;  %6645 = vmatprep.mubr.msk.bf16.mxu0 %vm7365_vm1, %v7364_v16 }
 0x490   : > { %v2161_v47 = vpack.c.bf16 %v2153_v30, %v2152_v26  ;;  %6655 = vmatprep.subr.bf16.mxu0 %v7364_v16 }
 0x492   : > { %6640 = vmatmul.mubr.msk.bf16.vlgmr.msra.gmra.mrb[48].mxu1 %vm2025_vm4, %v2161_v47 }
 0x493   : > { %v7231_v61 = vpop.eup %7230  ;;  %6650 = vmatpush3.bf16.msra.mxu1 %v1713_v43  ;;  %6651 = vmatprep.mubr.msk.bf16.mxu1 %vm7365_vm1, %v7364_v16  ;;  %v2445_v43 = vsel %vm2443_vm6, %v2434_v41, 0 }
 0x494   : > { %6661 = vmatprep.subr.bf16.mxu1 %v7364_v16  ;;  %v2154_v53 = vmul.f32 %v7231_v61, %v7987_v13  ;;  %v2539_v13 = vsel %vm2443_vm6, %v2436_v2, 0 }
 0x495   : > { %v7233_v51 = vpop.eup %7232 }
 0x496   : > { %v2155_v54 = vmul.f32 %v7233_v51, %v7991_v5  ;;  %v2437_v5 = vld [vmem:[%s8985_s4 + $0xc] sm:$0xf] }
 0x497   : > { %v7235_v62 = vpop.eup %7234  ;;  %v2586_v27 = vsel %vm2443_vm6, %v2437_v5, 0 }
 0x498   : > { %v2162_v0 = vpack.c.bf16 %v2155_v54, %v2154_v53  ;;  %v2156_v6 = vmul.f32 %v7235_v62, %v7995_v20 }
 0x499   : > { %v7237_v4 = vpop.eup %7236 }
 0x49a   : > { %v2157_v7 = vmul.f32 %v7237_v4, %v7999_v23  ;;  %6646 = vmatmul.mubr.msk.bf16.vlgmr.msra.gmra.mrb[60].mxu0 %vm2025_vm4, %v2162_v0 }
 0x49b   : > { %6657 = vmatprep.mubr.msk.bf16.mxu0 %vm7365_vm1, %v7364_v16  ;;  %6656 = vmatpush3.bf16.msra.mxu0 %v2445_v43 }
 0x49c   : > { %v2163_v37 = vpack.c.bf16 %v2157_v7, %v2156_v6  ;;  %6667 = vmatprep.subr.bf16.mxu0 %v7364_v16 }
 0x49e   : > { %6652 = vmatmul.mubr.msk.bf16.vlgmr.msra.gmra.mrb[52].mxu1 %vm2025_vm4, %v2163_v37 }
 0x49f   : > { %6663 = vmatprep.mubr.msk.bf16.mxu1 %vm7365_vm1, %v7364_v16  ;;  %6662 = vmatpush3.bf16.msra.mxu1 %v2492_v8 }
 0x4a0   : > { %6673 = vmatprep.subr.bf16.mxu1 %v7364_v16 }
 0x555   : > { %v2201_v9 = vpop.f32.mrb[52].mxu0 }
 0x556   : > { %v6623_v10 = vpop.f32.mrb[53].mxu0 }
 0x557   : > { %v2204_v11 = vpop.f32.mrb[54].mxu0 }
 0x558   : > { %v2428_v12 = vpack.c.bf16 %v2204_v11, %v2201_v9  ;;  %v6624_v3 = vpop.f32.mrb[55].mxu0 }
 0x559   : > { %v2245_v14 = vpop.f32.mrb[44].mxu1 }
 0x55a   : > { %v6629_v15 = vpop.f32.mrb[45].mxu1  ;;  %6658 = vmatmul.mubr.msk.bf16.vlgmr.msra.gmra.mrb[64].mxu0 %vm1714_vm2, %v2428_v12 }
 0x55b   : > { %v2248_v20 = vpop.f32.mrb[46].mxu1  ;;  %6668 = vmatpush3.bf16.msra.mxu0 %v2539_v13  ;;  %6669 = vmatprep.mubr.msk.bf16.mxu0 %vm7365_vm1, %v7364_v16 }
 0x55c   : > { %v2429_v22 = vpack.c.bf16 %v2248_v20, %v2245_v14  ;;  %v6630_v23 = vpop.f32.mrb[47].mxu1  ;;  %6679 = vmatprep.subr.bf16.mxu0 %v7364_v16 }
 0x55e   : > { %6664 = vmatmul.mubr.msk.bf16.vlgmr.msra.gmra.mrb[56].mxu1 %vm1714_vm2, %v2429_v22 }
 0x55f   : > { %6674 = vmatpush3.bf16.msra.mxu1 %v2586_v27  ;;  %6675 = vmatprep.mubr.msk.bf16.mxu1 %vm7365_vm1, %v7364_v16 }
 0x560   : > { %6685 = vmatprep.subr.bf16.mxu1 %v7364_v16 }
 0x561   : > { %v2289_v28 = vpop.f32.mrb[56].mxu0 }
 0x562   : > { %v6635_v31 = vpop.f32.mrb[57].mxu0 }
 0x563   : > { %v2292_v33 = vpop.f32.mrb[58].mxu0 }
 0x564   : > { %v2430_v34 = vpack.c.bf16 %v2292_v33, %v2289_v28  ;;  %v6636_v21 = vpop.f32.mrb[59].mxu0 }
 0x565   : > { %v2333_v24 = vpop.f32.mrb[48].mxu1 }
 0x566   : > { %v6641_v38 = vpop.f32.mrb[49].mxu1  ;;  %6670 = vmatmul.mubr.msk.bf16.vlgmr.msra.gmra.mrb[68].mxu0 %vm1714_vm2, %v2430_v34  ;;  %v5880_v34 = vld [vmem:[%s8986_s5] ss:$0 sm:$0xff] }
 0x567   : > { %v2336_v40 = vpop.f32.mrb[50].mxu1  ;;  %6680 = vmatpush3.bf16.msra.mxu0 %v2633_v36  ;;  %6681 = vmatprep.mubr.msk.bf16.mxu0 %vm7365_vm1, %v7364_v16 }
 0x568   : > { %v2431_v39 = vpack.c.bf16 %v2336_v40, %v2333_v24  ;;  %v6642_v42 = vpop.f32.mrb[51].mxu1 }
 0x56a   : > { %6676 = vmatmul.mubr.msk.bf16.vlgmr.msra.gmra.mrb[60].mxu1 %vm1714_vm2, %v2431_v39 }
 0x56b   : > { %6686 = vmatpush3.bf16.msra.mxu1 %v2680_v52  ;;  %6687 = vmatprep.mubr.msk.bf16.mxu1 %vm7365_vm1, %v7364_v16  ;;  %v7298_v52 = vld [vmem:[%s7498_s18] sm:$0xff] }
 0x56d   : > { %v2377_v44 = vpop.f32.mrb[60].mxu0 }
 0x56e   : > { %v6647_v55 = vpop.f32.mrb[61].mxu0 }
 0x56f   : > { %v2380_v56 = vpop.f32.mrb[62].mxu0 }
 0x570   : > { %v2432_v18 = vpack.c.bf16 %v2380_v56, %v2377_v44  ;;  %v6648_v35 = vpop.f32.mrb[63].mxu0  ;;  %v7299_v56 = vld [vmem:[%s7498_s18 + $0x8] sm:$0xff]  ;;  %s458_s18 = sand.u32 1, %s7354_s30  }
 0x571   : > { %v2421_v45 = vpop.f32.mrb[52].mxu1  ;;  %s5785_s27 = sshll.u32 %s458_s18, 4 }
 0x572   : > { %v6653_v46 = vpop.f32.mrb[53].mxu1  ;;  %6682 = vmatmul.mubr.msk.bf16.vlgmr.msra.gmra.mrb[72].mxu0 %vm1714_vm2, %v2432_v18  ;;  %s460_s15 = scalar_lea.vmem [#allocation2], %s5785_s27  ;;  %s8940_s27 = scalar_lea.sflag [#allocation3], %s458_s18 }
 0x573   : > { %v2424_v48 = vpop.f32.mrb[54].mxu1  ;;  %s5719_s21 = sshll.u32 %s460_s15, 4  ;;  %s8933_s21 = int_to_ptr.vmem [resolvable:$true] %s5719_s21 }
 0x574   : > { %v2433_v49 = vpack.c.bf16 %v2424_v48, %v2421_v45  ;;  %v6654_v50 = vpop.f32.mrb[55].mxu1  ;;  %s7300_s17 = scalar_lea.vmem %s8933_s21, 256  ;;  %p7307_p0 = scmp.lt.s32.totalorder %s8933_s21, %s7305_s20 }
 0x575   : > { %p7301_p11 = scmp.ne.s32.totalorder %s8933_s21, %s7300_s17 }
 0x576   : > { %6688 = vmatmul.mubr.msk.bf16.vlgmr.msra.gmra.mrb[64].mxu1 %vm1714_vm2, %v2433_v49 }
 0x577   : > { %p7302_p12 = pnand %p7301_p11, %p7483_p5 }
 0x579   : > { %p7303_p13 = pneg %p7302_p12 }
 0x62d   : > { %v2481_v57 = vpop.f32.mrb[64].mxu0 }
 0x62e   : > { %v6659_v58 = vpop.f32.mrb[65].mxu0  ;;  %v2723_v30 = vsel %vm478_vm0, %v2481_v57, 0.0 }
 0x62f   : > { %v2484_v59 = vpop.f32.mrb[66].mxu0 }
 0x630   : > { %v6660_v60 = vpop.f32.mrb[67].mxu0  ;;  %v2734_v53 = vsel %vm478_vm0, %v2484_v59, 0.0 }
 0x631   : > { %v2528_v26 = vpop.f32.mrb[56].mxu1 }
 0x632   : > { %v2724_v32 = vsel %vm478_vm0, %v2528_v26, 0.0  ;;  %v6665_v47 = vpop.f32.mrb[57].mxu1 }
 0x633   : > { %v2725_v61 = vadd.f32 %v2724_v32, %v2723_v30  ;;  %v2531_v51 = vpop.f32.mrb[58].mxu1  ;;  %v7089_v30 = vld [vmem:[%s8989_s8 + $0x4] ss:$8 sps:$4 sm:$0xff]   ;;  %v7087_v32 = vld [vmem:[%s8989_s8] ss:$8 sps:$4 sm:$0xff]  }
 0x634   : > { %v2735_v54 = vsel %vm478_vm0, %v2531_v51, 0.0  ;;  %v6666_v62 = vpop.f32.mrb[59].mxu1  ;;  %2852 = vmatprep.subr.bf16.mxu0 %v7089_v30  ;;  %v7092_v47 = vld [vmem:[%s8989_s8 + $0x14] ss:$8 sps:$4 sm:$0xff]   ;;  %v7093_v51 = vld [vmem:[%s8989_s8 + $0x20] ss:$8 sps:$4 sm:$0xff]  }
 0x635   : > { %v2736_v0 = vadd.f32 %v2735_v54, %v2734_v53  ;;  %2853 = vmatpush1.bf16.msra.mxu0 %v7087_v32  ;;  %v7095_v53 = vld [vmem:[%s8989_s8 + $0x24] ss:$8 sps:$4 sm:$0xff]   ;;  %v7366_v54 = vmov 0  }
 0x636   : > { %2854 = vmatprep.subr.bf16.mxu0 %v7092_v47  ;;  %2884 = vmatprep.mubr.bf16.mxu0 %v7366_v54  ;;  %v7096_v62 = vld [vmem:[%s8991_s10] sm:$0xff]  }
 0x637   : > { %3008 = vmatprep.subr.bf16.mxu1 %v7366_v54 }
 0x638   : > { %3009 = vmatpush1.bf16.msra.mxu1 %v7096_v62 }
 0x639   : > { %v2575_v4 = vpop.f32.mrb[68].mxu0  ;;  %3010 = vmatprep.subr.bf16.mxu1 %v7366_v54 }
 0x63a   : > { %v2726_v6 = vsel %vm478_vm0, %v2575_v4, 0.0  ;;  %v6671_v7 = vpop.f32.mrb[69].mxu0  ;;  %v7098_v4 = vld [vmem:[%s8991_s10 + $0x10] sm:$0xff]  }
 0x63b   : > { %v2727_v37 = vadd.f32 %v2726_v6, %v2725_v61  ;;  %v2578_v41 = vpop.f32.mrb[70].mxu0  ;;  %v7090_v61 = vld [vmem:[%s8989_s8 + $0x10] ss:$8 sps:$4 sm:$0xff]   ;;  %v7100_v7 = vld [vmem:[%s8991_s10 + $0x20] sm:$0xff]  }
 0x63c   : > { %v2737_v43 = vsel %vm478_vm0, %v2578_v41, 0.0  ;;  %v6672_v63 = vpop.f32.mrb[71].mxu0  ;;  %2855 = vmatpush1.bf16.msra.mxu0 %v7090_v61  ;;  %v7099_v6 = vld [vmem:[%s8991_s10 + $0x18] sm:$0xff]   ;;  %v7102_v41 = vld [vmem:[%s8991_s10 + $0x30] sm:$0xff]  }
 0x63d   : > { %v2738_v8 = vadd.f32 %v2737_v43, %v2736_v0  ;;  %v2622_v9 = vpop.f32.mrb[60].mxu1  ;;  %2856 = vmatprep.subr.bf16.mxu0 %v7095_v53  ;;  %v7097_v0 = vld [vmem:[%s8991_s10 + $0x8] sm:$0xff]   ;;  %v7103_v43 = vld [vmem:[%s8991_s10 + $0x38] sm:$0xff]   ;;  %v7104_v63 = vld [vmem:[%s8991_s10 + $0x40] sm:$0xff]  }
 0x63e   : > { %v2728_v2 = vsel %vm478_vm0, %v2622_v9, 0.0  ;;  %v6677_v10 = vpop.f32.mrb[61].mxu1  ;;  %3011 = vmatpush1.bf16.msra.mxu1 %v7097_v0 }
 0x63f   : > { %v2729_v11 = vadd.f32 %v2728_v2, %v2727_v37  ;;  %v2625_v12 = vpop.f32.mrb[62].mxu1  ;;  %3012 = vmatprep.subr.bf16.mxu1 %v7366_v54  ;;  %v7101_v37 = vld [vmem:[%s8991_s10 + $0x28] sm:$0xff]  }
 0x640   : > { %v2739_v3 = vsel %vm478_vm0, %v2625_v12, 0.0  ;;  %v6678_v13 = vpop.f32.mrb[63].mxu1  ;;  %2857 = vmatpush1.bf16.msra.mxu0 %v7093_v51 }
 0x641   : > { %v2740_v14 = vadd.f32 %v2739_v3, %v2738_v8  ;;  %6691 = vmatprep.subr.bf16.mxu0 %v7364_v16  ;;  %v5881_v13 = vld [vmem:[%s8987_s6] ss:$0 sm:$0xff] }
 0x642   : > { %3013 = vmatpush1.bf16.msra.mxu1 %v7098_v4 }
 0x643   : > { %3014 = vmatprep.subr.bf16.mxu1 %v7366_v54 }
 0x645   : > { %v2669_v5 = vpop.f32.mrb[72].mxu0 }
 0x646   : > { %v2730_v15 = vsel %vm478_vm0, %v2669_v5, 0.0  ;;  %v6683_v20 = vpop.f32.mrb[73].mxu0  ;;  %3015 = vmatpush1.bf16.msra.mxu1 %v7099_v6 }
 0x647   : > { %v2731_v22 = vadd.f32 %v2730_v15, %v2729_v11  ;;  %v2672_v23 = vpop.f32.mrb[74].mxu0  ;;  %3016 = vmatprep.subr.bf16.mxu1 %v7366_v54 }
 0x648   : > { %v2741_v27 = vsel %vm478_vm0, %v2672_v23, 0.0  ;;  %v6684_v28 = vpop.f32.mrb[75].mxu0 }
 0x649   : > { %v2742_v29 = vadd.f32 %v2741_v27, %v2740_v14  ;;  %v2716_v31 = vpop.f32.mrb[64].mxu1 }
 0x64a   : > { %v2732_v33 = vsel %vm478_vm0, %v2716_v31, 0.0  ;;  %v6689_v21 = vpop.f32.mrb[65].mxu1  ;;  %3017 = vmatpush1.bf16.msra.mxu1 %v7100_v7  ;;  %v7105_v31 = vld [vmem:[%s8991_s10 + $0x48] sm:$0xff]  }
 0x64b   : > { %v2733_v36 = vadd.f32 %v2732_v33, %v2731_v22  ;;  %v2719_v24 = vpop.f32.mrb[66].mxu1  ;;  %3018 = vmatprep.subr.bf16.mxu1 %v7366_v54  ;;  %v5882_v22 = vld [vmem:[%s8988_s7] ss:$0 sm:$0xff]  ;;  %v7106_v33 = vld [vmem:[%s8991_s10 + $0x50] sm:$0xff]   ;;  %v2811_v21 = vsub.s32 0, %v7891_v1 }
 0x64c   : > { %v2743_v25 = vsel %vm478_vm0, %v2719_v24, 0.0  ;;  %v6690_v38 = vpop.f32.mrb[67].mxu1  ;;  %v2815_v24 = vsub.s32 1, %v7891_v1  ;;  %v7184_v1 = vld [vmem:[%s8993_s12 + $0x8] sm:$0xff]  }
 0x64d   : > { %v2752_v40 = vadd.f32 %v5880_v34, %v2733_v36  ;;  %v2744_v39 = vadd.f32 %v2743_v25, %v2742_v29  ;;  %v2807_v36 = vld [vmem:[%s8990_s9] sm:$0x3] }
 0x64e   : > { %3019 = vmatpush1.bf16.msra.mxu1 %v7101_v37  ;;  %v2812_v25 = vrot.slane %v2807_v36, %v2811_v21  ;;  %v2816_v38 = vrot.slane %v2807_v36, %v2815_v24 }
 0x64f   : > { %v2753_v42 = vadd.f32 %v5880_v34, %v2744_v39  ;;  %v8107_v44 = vadd.f32 %v7298_v52, %v2752_v40  ;;  %3020 = vmatprep.subr.bf16.mxu1 %v7366_v54  ;;  %v7107_v34 = vld [vmem:[%s8991_s10 + $0x58] sm:$0xff]  }
 0x651   : > { %v2758_v55 = vsel %vm478_vm0, %v8107_v44, 0.0  ;;  %v8112_v18 = vadd.f32 %v7299_v56, %v2753_v42 }
 0x652   : > { %2759 = vadd.xlane.f32.xlu0 %v2758_v55  ;;  %3021 = vmatpush1.bf16.msra.mxu1 %v7102_v41 }
 0x653   : > { %v2761_v35 = vsel %vm478_vm0, %v8112_v18, 0.0  ;;  %3022 = vmatprep.subr.bf16.mxu1 %v7366_v54 }
 0x654   : > { %2762 = vadd.xlane.f32.xlu1 %v2761_v35 }
 0x656   : > { %3023 = vmatpush1.bf16.msra.mxu1 %v7103_v43 }
 0x657   : > { %3024 = vmatprep.subr.bf16.mxu1 %v7366_v54 }
 0x65a   : > { %3025 = vmatpush1.bf16.msra.mxu1 %v7104_v63 }
 0x65b   : > { %3026 = vmatprep.subr.bf16.mxu1 %v7366_v54 }
 0x65e   : > { %3027 = vmatpush1.bf16.msra.mxu1 %v7105_v31 }
 0x65f   : > { %3028 = vmatprep.subr.bf16.mxu1 %v7366_v54 }
 0x662   : > { %3029 = vmatpush1.bf16.msra.mxu1 %v7106_v33 }
 0x663   : > { %3030 = vmatprep.subr.bf16.mxu1 %v7366_v54 }
 0x666   : > { %3031 = vmatpush1.bf16.msra.mxu1 %v7107_v34  ;;  %v5907_v34 = vld [vmem:[%s8983_s2 + $0x1] ss:$0 sm:$0xff] }
 0x667   : > { %6731 = vmatprep.subr.bf16.mxu1 %v7364_v16 }
 0x6df   : > { %v2760_v45 = vpop.xlane.xlu0 %2759 }
 0x6e0   : > { %v2764_v46 = vmul.f32 0.020833334, %v2760_v45 }
 0x6e1   : > { %v2763_v48 = vpop.xlane.xlu1 %2762 }
 0x6e2   : > { %v2766_v49 = vsub.f32 %v8107_v44, %v2764_v46  ;;  %v2765_v50 = vmul.f32 0.020833334, %v2763_v48 }
 0x6e4   : > { %v8118_v57 = vsub.f32 %v8112_v18, %v2765_v50  ;;  %v2768_v58 = vmul.f32 %v2766_v49, %v2766_v49 }
 0x6e6   : > { %v2770_v59 = vsel %vm478_vm0, %v2768_v58, 0.0  ;;  %v2769_v60 = vmul.f32 %v8118_v57, %v8118_v57 }
 0x6e7   : > { %2771 = vadd.xlane.f32.xlu0 %v2770_v59  ;;  %v5890_v59 = vld [vmem:[%s8992_s11] ss:$0 sm:$0xff] }
 0x6e8   : > { %v2773_v26 = vsel %vm478_vm0, %v2769_v60, 0.0 }
 0x6e9   : > { %2774 = vadd.xlane.f32.xlu1 %v2773_v26 }
 0x774   : > { %v2772_v8 = vpop.xlane.xlu0 %2771 }
 0x775   : > { %v2776_v9 = vmul.f32 0.020833334, %v2772_v8 }
 0x776   : > { %v2775_v2 = vpop.xlane.xlu1 %2774 }
 0x777   : > { %v2778_v10 = vadd.f32 1e-05, %v2776_v9  ;;  %v2777_v11 = vmul.f32 0.020833334, %v2775_v2  ;;  %v7108_v9 = vld [vmem:[%s8984_s3 + $0x1b0] sm:$0xff]  }
 0x778   : > { %v7109_v2 = vld [vmem:[%s8984_s3 + $0x210] sm:$0xff]  }
 0x779   : > { %7238 = vrsqrt.f32 %v2778_v10  ;;  %v2779_v12 = vadd.f32 1e-05, %v2777_v11  ;;  %v7110_v10 = vld [vmem:[%s8984_s3 + $0x1b8] sm:$0xff]  }
 0x77a   : > { %v7111_v11 = vld [vmem:[%s8984_s3 + $0x218] sm:$0xff]  }
 0x77b   : > { %7240 = vrsqrt.f32 %v2779_v12  ;;  %v7112_v12 = vld [vmem:[%s8984_s3 + $0x1c0] sm:$0xff]  }
 0x783   : > { %v7239_v3 = vpop.eup %7238 }
 0x784   : > { %v2782_v14 = vmul.f32 %v7239_v3, %v2766_v49  ;;  %v7113_v3 = vld [vmem:[%s8984_s3 + $0x220] sm:$0xff]  }
 0x785   : > { %v7241_v5 = vpop.eup %7240 }
 0x786   : > { %v2790_v15 = vmul.f32 %v5881_v13, %v2782_v14  ;;  %v2783_v20 = vmul.f32 %v7241_v5, %v8118_v57 }
 0x788   : > { %v2791_v23 = vmul.f32 %v5881_v13, %v2783_v20  ;;  %v2798_v27 = vadd.f32 %v5882_v22, %v2790_v15 }
 0x78a   : > { %v2799_v28 = vadd.f32 %v5882_v22, %v2791_v23 }
 0x78c   : > { %v2800_v29 = vpack.c.bf16 %v2799_v28, %v2798_v27  ;;  %v5906_v27 = vld [vmem:[%s9004_s1 + $0x1] ss:$0 sm:$0xff]  ;;  %s7306_s1 = scalar_lea.vmem %s7305_s20, 512 }
 0x78d   : > { %p7308_p1 = scmp.lt.s32.totalorder %s7306_s1, %s7300_s17 }
 0x78e   : > { %5889 = vmatmul.mubr.msk.bf16.vlgmr.msra.gmra.mrb[76].mxu0 %vm478_vm0, %v2800_v29 }
 0x78f   : > { %6697 = vmatprep.mubr.msk.bf16.mxu0 %vm7365_vm1, %v7364_v16  ;;  %6692 = vmatpush3.bf16.msra.mxu0 %v7108_v9  ;;  %v7146_v9 = vld [vmem:[%s8984_s3 + $0x290] sm:$0xff]   ;;  %p7309_p2 = por %p7308_p1, %p7307_p0 }
 0x790   : > { %6693 = vmatprep.subr.bf16.mxu0 %v7364_v16 }
 0x791   : > { %p7310_p3 = pnand %p7309_p2, %p7303_p13 }
 0x793   : > { %6694 = vmatpush3.bf16.msra.mxu0 %v7110_v10  ;;  %v7148_v10 = vld [vmem:[%s8984_s3 + $0x298] sm:$0xff]  }
 0x794   : > { %6695 = vmatprep.subr.bf16.mxu0 %v7364_v16 }
 0x797   : > { %6696 = vmatpush3.bf16.msra.mxu0 %v7112_v12  ;;  %v7150_v12 = vld [vmem:[%s8984_s3 + $0x2b8] sm:$0xff]  }
 0x798   : > { %6701 = vmatprep.subr.bf16.mxu0 %v7364_v16 }
 0x861   : > { %v2886_v40 = vpop.f32.mrb[76].mxu0 }
 0x862   : > { %v2887_v39 = vadd.f32 %v2886_v40, %v2812_v25  ;;  %v2888_v42 = vpop.f32.mrb[77].mxu0  ;;  %v7114_v40 = vld [vmem:[%s8984_s3 + $0x1c8] sm:$0xff]  }
 0x863   : > { %v2889_v52 = vadd.f32 %v2888_v42, %v2816_v38  ;;  %v2890_v55 = vpop.f32.mrb[78].mxu0 }
 0x864   : > { %v2891_v56 = vadd.f32 %v2890_v55, %v2812_v25  ;;  %v2892_v35 = vpop.f32.mrb[79].mxu0  ;;  %v2895_v46 = vmax.f32 %v2887_v39, 0.0  ;;  %v7115_v39 = vld [vmem:[%s8984_s3 + $0x240] sm:$0xff]   ;;  %v7117_v55 = vld [vmem:[%s8984_s3 + $0x248] sm:$0xff]  }
 0x865   : > { %v2893_v45 = vadd.f32 %v2892_v35, %v2816_v38  ;;  %v2896_v49 = vmax.f32 %v2889_v52, 0.0  ;;  %v7116_v52 = vld [vmem:[%s8984_s3 + $0x1d0] sm:$0xff]  }
 0x866   : > { %v2897_v48 = vmax.f32 %v2891_v56, 0.0  ;;  %v7118_v56 = vld [vmem:[%s8984_s3 + $0x1d8] sm:$0xff]   ;;  %v7119_v35 = vld [vmem:[%s8984_s3 + $0x250] sm:$0xff]  }
 0x867   : > { %v2898_v50 = vmax.f32 %v2893_v45, 0.0  ;;  %v7120_v45 = vld [vmem:[%s8984_s3 + $0x1e0] sm:$0xff]  }
 0x868   : > { %v2899_v57 = vpack.c.bf16 %v2897_v48, %v2895_v46  ;;  %v7121_v46 = vld [vmem:[%s8984_s3 + $0x270] sm:$0xff]   ;;  %v7122_v48 = vld [vmem:[%s8984_s3 + $0x1e8] sm:$0xff]  }
 0x869   : > { %v2900_v58 = vpack.c.bf16 %v2898_v50, %v2896_v49  ;;  %v7123_v49 = vld [vmem:[%s8984_s3 + $0x278] sm:$0xff]   ;;  %v7124_v50 = vld [vmem:[%s8984_s3 + $0x1f0] sm:$0xff]  }
 0x86b   : > { %5903 = vmatprep.mubr.msk.bf16.mxu1 %vm3004_vm7, %v2900_v58  ;;  %v7126_v58 = vld [vmem:[%s8984_s3 + $0x1f8] sm:$0xff]  }
 0x86c   : > { %3041 = vmatmul.mubr.bf16.vlgmr.msra.gmra.mrb[68].mxu1 %v2899_v57  ;;  %v7125_v57 = vld [vmem:[%s8984_s3 + $0x280] sm:$0xff]  }
 0x86d   : > { %6737 = vmatprep.mubr.msk.bf16.mxu1 %vm7365_vm1, %v7364_v16  ;;  %6732 = vmatpush3.bf16.msra.mxu1 %v7109_v2  ;;  %v7147_v2 = vld [vmem:[%s8984_s3 + $0x338] sm:$0xff]  }
 0x86e   : > { %6733 = vmatprep.subr.bf16.mxu1 %v7364_v16 }
 0x871   : > { %6734 = vmatpush3.bf16.msra.mxu1 %v7111_v11  ;;  %v7149_v11 = vld [vmem:[%s8984_s3 + $0x340] sm:$0xff]  }
 0x872   : > { %6735 = vmatprep.subr.bf16.mxu1 %v7364_v16 }
 0x875   : > { %6736 = vmatpush3.bf16.msra.mxu1 %v7113_v3  ;;  %v7151_v3 = vld [vmem:[%s8984_s3 + $0x2c0] sm:$0xff]  }
 0x876   : > { %6751 = vmatprep.subr.bf16.mxu1 %v7364_v16 }
 0x93f   : > { %v3042_v60 = vpop.f32.mrb[68].mxu1 }
 0x940   : > { %v3043_v26 = vadd.f32 %v5890_v59, %v3042_v60  ;;  %v3044_v30 = vpop.f32.mrb[69].mxu1  ;;  %v7128_v60 = vld [vmem:[%s8984_s3 + $0x200] sm:$0xff]  }
 0x941   : > { %v3045_v32 = vpop.f32.mrb[70].mxu1  ;;  %v7130_v30 = vld [vmem:[%s8984_s3 + $0x208] sm:$0xff]  }
 0x942   : > { %v8219_v47 = vadd.f32 %v3043_v26, %v8107_v44  ;;  %v3046_v61 = vadd.f32 %v5890_v59, %v3045_v32  ;;  %v3047_v51 = vpop.f32.mrb[71].mxu1  ;;  %v7127_v59 = vld [vmem:[%s8984_s3 + $0x2a0] sm:$0xff]   ;;  %v7129_v26 = vld [vmem:[%s8984_s3 + $0x2a8] sm:$0xff]   ;;  %v7131_v32 = vld [vmem:[%s8984_s3 + $0x2b0] sm:$0xff]  }
 0x943   : > { %v7133_v51 = vld [vmem:[%s8984_s3 + $0x2d0] sm:$0xff]  }
 0x944   : > { %v8222_v53 = vadd.f32 %v3046_v61, %v8112_v18  ;;  %v3055_v62 = vsel %vm478_vm0, %v8219_v47, 0.0  ;;  %v7132_v61 = vld [vmem:[%s8984_s3 + $0x228] sm:$0xff]  }
 0x945   : > { %3056 = vadd.xlane.f32.xlu0 %v3055_v62  ;;  %v7134_v62 = vld [vmem:[%s8984_s3 + $0x230] sm:$0xff]  }
 0x946   : > { %v3058_v0 = vsel %vm478_vm0, %v8222_v53, 0.0 }
 0x947   : > { %3059 = vadd.xlane.f32.xlu1 %v3058_v0  ;;  %v7135_v0 = vld [vmem:[%s8984_s3 + $0x2d8] sm:$0xff]  }
 0x9d2   : > { %v3057_v4 = vpop.xlane.xlu0 %3056 }
 0x9d3   : > { %v3061_v6 = vmul.f32 0.020833334, %v3057_v4  ;;  %v7136_v4 = vld [vmem:[%s8984_s3 + $0x238] sm:$0xff]  }
 0x9d4   : > { %v3060_v7 = vpop.xlane.xlu1 %3059 }
 0x9d5   : > { %v3063_v37 = vsub.f32 %v8219_v47, %v3061_v6  ;;  %v3062_v44 = vmul.f32 0.020833334, %v3060_v7  ;;  %v7137_v6 = vld [vmem:[%s8984_s3 + $0x2e0] sm:$0xff]   ;;  %v7138_v7 = vld [vmem:[%s8984_s3 + $0x258] sm:$0xff]  }
 0x9d7   : > { %v3064_v41 = vsub.f32 %v8222_v53, %v3062_v44  ;;  %v3065_v43 = vmul.f32 %v3063_v37, %v3063_v37  ;;  %v7140_v44 = vld [vmem:[%s8984_s3 + $0x260] sm:$0xff]  }
 0x9d9   : > { %v3067_v18 = vsel %vm478_vm0, %v3065_v43, 0.0  ;;  %v3066_v63 = vmul.f32 %v3064_v41, %v3064_v41  ;;  %v7142_v43 = vld [vmem:[%s8984_s3 + $0x268] sm:$0xff]  }
 0x9da   : > { %3068 = vadd.xlane.f32.xlu0 %v3067_v18  ;;  %v7143_v18 = vld [vmem:[%s8984_s3 + $0x310] sm:$0xff]  }
 0x9db   : > { %v3070_v8 = vsel %vm478_vm0, %v3066_v63, 0.0  ;;  %v7144_v63 = vld [vmem:[%s8984_s3 + $0x288] sm:$0xff]  }
 0x9dc   : > { %3071 = vadd.xlane.f32.xlu1 %v3070_v8  ;;  %v7145_v8 = vld [vmem:[%s8984_s3 + $0x330] sm:$0xff]  }
 0xa67   : > { %v3069_v13 = vpop.xlane.xlu0 %3068 }
 0xa68   : > { %v3073_v14 = vmul.f32 0.020833334, %v3069_v13  ;;  %v7152_v13 = vld [vmem:[%s8984_s3 + $0x2c8] sm:$0xff]  }
 0xa69   : > { %v3072_v5 = vpop.xlane.xlu1 %3071 }
 0xa6a   : > { %v3075_v15 = vadd.f32 1e-05, %v3073_v14  ;;  %v3074_v20 = vmul.f32 0.020833334, %v3072_v5  ;;  %v7153_v14 = vld [vmem:[%s8984_s3 + $0x2e8] sm:$0xff]   ;;  %v7154_v5 = vld [vmem:[%s8984_s3 + $0x2f0] sm:$0xff]  }
 0xa6c   : > { %7242 = vrsqrt.f32 %v3075_v15  ;;  %v3076_v22 = vadd.f32 1e-05, %v3074_v20  ;;  %v7155_v15 = vld [vmem:[%s8984_s3 + $0x2f8] sm:$0xff]  }
 0xa6d   : > { %v7156_v20 = vld [vmem:[%s8984_s3 + $0x318] sm:$0xff]  }
 0xa6e   : > { %7244 = vrsqrt.f32 %v3076_v22  ;;  %v7157_v22 = vld [vmem:[%s8984_s3 + $0x320] sm:$0xff]  }
 0xa76   : > { %v7243_v23 = vpop.eup %7242 }
 0xa77   : > { %v3079_v28 = vmul.f32 %v7243_v23, %v3063_v37  ;;  %v7139_v37 = vld [vmem:[%s8984_s3 + $0x300] sm:$0xff]   ;;  %v7158_v23 = vld [vmem:[%s8984_s3 + $0x328] sm:$0xff]  }
 0xa78   : > { %v7245_v29 = vpop.eup %7244 }
 0xa79   : > { %v3087_v31 = vmul.f32 %v5906_v27, %v3079_v28  ;;  %v3080_v33 = vmul.f32 %v7245_v29, %v3064_v41  ;;  %v7141_v41 = vld [vmem:[%s8984_s3 + $0x308] sm:$0xff]   ;;  %v7160_v28 = vld [vmem:[%s8984_s3 + $0x350] sm:$0xff]   ;;  %v7161_v29 = vld [vmem:[%s8984_s3 + $0x358] sm:$0xff]  }
 0xa7b   : > { %v3088_v36 = vmul.f32 %v5906_v27, %v3080_v33  ;;  %v3095_v25 = vadd.f32 %v5907_v34, %v3087_v31  ;;  %v7159_v27 = vld [vmem:[%s8984_s3 + $0x348] sm:$0xff]  }
 0xa7d   : > { %v3096_v38 = vadd.f32 %v5907_v34, %v3088_v36 }
 0xa7f   : > { %v8268_v42 = vpack.c.bf16 %v3096_v38, %v3095_v25 }
 0xa81   : > { %6698 = vmatmul.mubr.msk.bf16.vlgmr.msra.gmra.mrb[80].mxu0 %vm478_vm0, %v8268_v42  ;;  %6738 = vmatmul.mubr.msk.bf16.vlgmr.msra.gmra.mrb[72].mxu1 %vm478_vm0, %v8268_v42 }
 0xa82   : > { %6702 = vmatpush3.bf16.msra.mxu0 %v7114_v40  ;;  %6752 = vmatpush3.bf16.msra.mxu1 %v7115_v39 }
 0xa83   : > { %6703 = vmatprep.subr.bf16.mxu0 %v7364_v16  ;;  %6753 = vmatprep.subr.bf16.mxu1 %v7364_v16 }
 0xa84   : > { %6707 = vmatprep.mubr.msk.bf16.mxu0 %vm7365_vm1, %v7364_v16  ;;  %6757 = vmatprep.mubr.msk.bf16.mxu1 %vm7365_vm1, %v7364_v16 }
 0xa86   : > { %6704 = vmatpush3.bf16.msra.mxu0 %v7116_v52  ;;  %6754 = vmatpush3.bf16.msra.mxu1 %v7117_v55 }
 0xa87   : > { %6705 = vmatprep.subr.bf16.mxu0 %v7364_v16  ;;  %6755 = vmatprep.subr.bf16.mxu1 %v7364_v16 }
 0xa8a   : > { %6706 = vmatpush3.bf16.msra.mxu0 %v7118_v56  ;;  %6756 = vmatpush3.bf16.msra.mxu1 %v7119_v35 }
 0xa8b   : > { %6711 = vmatprep.subr.bf16.mxu0 %v7364_v16  ;;  %6771 = vmatprep.subr.bf16.mxu1 %v7364_v16 }
 0xa8d   : > { %6708 = vmatmul.mubr.msk.bf16.vlgmr.msra.gmra.mrb[84].mxu0 %vm478_vm0, %v8268_v42  ;;  %6758 = vmatmul.mubr.msk.bf16.vlgmr.msra.gmra.mrb[76].mxu1 %vm478_vm0, %v8268_v42 }
 0xa8e   : > { %6712 = vmatpush3.bf16.msra.mxu0 %v7120_v45  ;;  %6772 = vmatpush3.bf16.msra.mxu1 %v7121_v46 }
 0xa8f   : > { %6713 = vmatprep.subr.bf16.mxu0 %v7364_v16  ;;  %6773 = vmatprep.subr.bf16.mxu1 %v7364_v16 }
 0xa90   : > { %6717 = vmatprep.mubr.msk.bf16.mxu0 %vm7365_vm1, %v7364_v16  ;;  %6777 = vmatprep.mubr.msk.bf16.mxu1 %vm7365_vm1, %v7364_v16 }
 0xa92   : > { %6714 = vmatpush3.bf16.msra.mxu0 %v7122_v48  ;;  %6774 = vmatpush3.bf16.msra.mxu1 %v7123_v49 }
 0xa93   : > { %6715 = vmatprep.subr.bf16.mxu0 %v7364_v16  ;;  %6775 = vmatprep.subr.bf16.mxu1 %v7364_v16 }
 0xa96   : > { %6716 = vmatpush3.bf16.msra.mxu0 %v7124_v50  ;;  %6776 = vmatpush3.bf16.msra.mxu1 %v7125_v57 }
 0xa97   : > { %6721 = vmatprep.subr.bf16.mxu0 %v7364_v16  ;;  %6791 = vmatprep.subr.bf16.mxu1 %v7364_v16 }
 0xa99   : > { %6718 = vmatmul.mubr.msk.bf16.vlgmr.msra.gmra.mrb[88].mxu0 %vm478_vm0, %v8268_v42  ;;  %6778 = vmatmul.mubr.msk.bf16.vlgmr.msra.gmra.mrb[80].mxu1 %vm478_vm0, %v8268_v42 }
 0xa9a   : > { %6722 = vmatpush3.bf16.msra.mxu0 %v7126_v58  ;;  %6792 = vmatpush3.bf16.msra.mxu1 %v7127_v59 }
 0xa9b   : > { %6723 = vmatprep.subr.bf16.mxu0 %v7364_v16  ;;  %6793 = vmatprep.subr.bf16.mxu1 %v7364_v16 }
 0xa9c   : > { %6727 = vmatprep.mubr.msk.bf16.mxu0 %vm7365_vm1, %v7364_v16  ;;  %6797 = vmatprep.mubr.msk.bf16.mxu1 %vm7365_vm1, %v7364_v16 }
 0xa9e   : > { %6724 = vmatpush3.bf16.msra.mxu0 %v7128_v60  ;;  %6794 = vmatpush3.bf16.msra.mxu1 %v7129_v26 }
 0xa9f   : > { %6725 = vmatprep.subr.bf16.mxu0 %v7364_v16  ;;  %6795 = vmatprep.subr.bf16.mxu1 %v7364_v16 }
 0xaa2   : > { %6726 = vmatpush3.bf16.msra.mxu0 %v7130_v30  ;;  %6796 = vmatpush3.bf16.msra.mxu1 %v7131_v32 }
 0xaa3   : > { %6741 = vmatprep.subr.bf16.mxu0 %v7364_v16  ;;  %6811 = vmatprep.subr.bf16.mxu1 %v7364_v16 }
 0xaa5   : > { %6728 = vmatmul.mubr.msk.bf16.vlgmr.msra.gmra.mrb[92].mxu0 %vm478_vm0, %v8268_v42  ;;  %6798 = vmatmul.mubr.msk.bf16.vlgmr.msra.gmra.mrb[84].mxu1 %vm478_vm0, %v8268_v42 }
 0xaa6   : > { %6742 = vmatpush3.bf16.msra.mxu0 %v7132_v61  ;;  %6812 = vmatpush3.bf16.msra.mxu1 %v7133_v51 }
 0xaa7   : > { %6743 = vmatprep.subr.bf16.mxu0 %v7364_v16  ;;  %6813 = vmatprep.subr.bf16.mxu1 %v7364_v16 }
 0xaa8   : > { %6747 = vmatprep.mubr.msk.bf16.mxu0 %vm7365_vm1, %v7364_v16  ;;  %6817 = vmatprep.mubr.msk.bf16.mxu1 %vm7365_vm1, %v7364_v16 }
 0xaaa   : > { %6744 = vmatpush3.bf16.msra.mxu0 %v7134_v62  ;;  %6814 = vmatpush3.bf16.msra.mxu1 %v7135_v0 }
 0xaab   : > { %6745 = vmatprep.subr.bf16.mxu0 %v7364_v16  ;;  %6815 = vmatprep.subr.bf16.mxu1 %v7364_v16 }
 0xaae   : > { %6746 = vmatpush3.bf16.msra.mxu0 %v7136_v4  ;;  %6816 = vmatpush3.bf16.msra.mxu1 %v7137_v6 }
 0xaaf   : > { %6761 = vmatprep.subr.bf16.mxu0 %v7364_v16  ;;  %6831 = vmatprep.subr.bf16.mxu1 %v7364_v16 }
 0xab1   : > { %6748 = vmatmul.mubr.msk.bf16.vlgmr.msra.gmra.mrb[96].mxu0 %vm478_vm0, %v8268_v42  ;;  %6818 = vmatmul.mubr.msk.bf16.vlgmr.msra.gmra.mrb[88].mxu1 %vm478_vm0, %v8268_v42 }
 0xab2   : > { %6762 = vmatpush3.bf16.msra.mxu0 %v7138_v7  ;;  %6832 = vmatpush3.bf16.msra.mxu1 %v7139_v37 }
 0xab3   : > { %6763 = vmatprep.subr.bf16.mxu0 %v7364_v16  ;;  %6833 = vmatprep.subr.bf16.mxu1 %v7364_v16 }
 0xab4   : > { %6767 = vmatprep.mubr.msk.bf16.mxu0 %vm7365_vm1, %v7364_v16  ;;  %6837 = vmatprep.mubr.msk.bf16.mxu1 %vm7365_vm1, %v7364_v16 }
 0xab6   : > { %6764 = vmatpush3.bf16.msra.mxu0 %v7140_v44  ;;  %6834 = vmatpush3.bf16.msra.mxu1 %v7141_v41 }
 0xab7   : > { %6765 = vmatprep.subr.bf16.mxu0 %v7364_v16  ;;  %6835 = vmatprep.subr.bf16.mxu1 %v7364_v16 }
 0xaba   : > { %6766 = vmatpush3.bf16.msra.mxu0 %v7142_v43  ;;  %6836 = vmatpush3.bf16.msra.mxu1 %v7143_v18 }
 0xabb   : > { %6781 = vmatprep.subr.bf16.mxu0 %v7364_v16  ;;  %6851 = vmatprep.subr.bf16.mxu1 %v7364_v16 }
 0xabd   : > { %6768 = vmatmul.mubr.msk.bf16.vlgmr.msra.gmra.mrb[100].mxu0 %vm478_vm0, %v8268_v42  ;;  %6838 = vmatmul.mubr.msk.bf16.vlgmr.msra.gmra.mrb[92].mxu1 %vm478_vm0, %v8268_v42 }
 0xabe   : > { %6782 = vmatpush3.bf16.msra.mxu0 %v7144_v63  ;;  %6852 = vmatpush3.bf16.msra.mxu1 %v7145_v8 }
 0xabf   : > { %6783 = vmatprep.subr.bf16.mxu0 %v7364_v16  ;;  %6853 = vmatprep.subr.bf16.mxu1 %v7364_v16 }
 0xac0   : > { %6787 = vmatprep.mubr.msk.bf16.mxu0 %vm7365_vm1, %v7364_v16  ;;  %6857 = vmatprep.mubr.msk.bf16.mxu1 %vm7365_vm1, %v7364_v16 }
 0xac2   : > { %6784 = vmatpush3.bf16.msra.mxu0 %v7146_v9  ;;  %6854 = vmatpush3.bf16.msra.mxu1 %v7147_v2 }
 0xac3   : > { %6785 = vmatprep.subr.bf16.mxu0 %v7364_v16  ;;  %6855 = vmatprep.subr.bf16.mxu1 %v7364_v16 }
 0xac6   : > { %6786 = vmatpush3.bf16.msra.mxu0 %v7148_v10  ;;  %6856 = vmatpush3.bf16.msra.mxu1 %v7149_v11 }
 0xac7   : > { %6801 = vmatprep.subr.bf16.mxu0 %v7364_v16  ;;  %6871 = vmatprep.subr.bf16.mxu1 %v7364_v16 }
 0xac9   : > { %6788 = vmatmul.mubr.msk.bf16.vlgmr.msra.gmra.mrb[104].mxu0 %vm478_vm0, %v8268_v42  ;;  %6858 = vmatmul.mubr.msk.bf16.vlgmr.msra.gmra.mrb[96].mxu1 %vm478_vm0, %v8268_v42 }
 0xaca   : > { %6802 = vmatpush3.bf16.msra.mxu0 %v7150_v12  ;;  %6807 = vmatprep.mubr.msk.bf16.mxu0 %vm7365_vm1, %v7364_v16 }
 0xacb   : > { %6803 = vmatprep.subr.bf16.mxu0 %v7364_v16  ;;  %6873 = vmatprep.mubr.msk.bf16.mxu1 %vm7365_vm1, %v7364_v16 }
 0xace   : > { %6804 = vmatpush3.bf16.msra.mxu0 %v7151_v3 }
 0xacf   : > { %6805 = vmatprep.subr.bf16.mxu0 %v7364_v16 }
 0xad2   : > { %6806 = vmatpush3.bf16.msra.mxu0 %v7152_v13 }
 0xad3   : > { %6821 = vmatprep.subr.bf16.mxu0 %v7364_v16 }
 0xad5   : > { %6808 = vmatmul.mubr.msk.bf16.vlgmr.msra.gmra.mrb[108].mxu0 %vm478_vm0, %v8268_v42 }
 0xad6   : > { %6822 = vmatpush3.bf16.msra.mxu0 %v7153_v14  ;;  %6827 = vmatprep.mubr.msk.bf16.mxu0 %vm7365_vm1, %v7364_v16 }
 0xad7   : > { %6823 = vmatprep.subr.bf16.mxu0 %v7364_v16 }
 0xada   : > { %6824 = vmatpush3.bf16.msra.mxu0 %v7154_v5 }
 0xadb   : > { %6825 = vmatprep.subr.bf16.mxu0 %v7364_v16 }
 0xade   : > { %6826 = vmatpush3.bf16.msra.mxu0 %v7155_v15 }
 0xadf   : > { %6841 = vmatprep.subr.bf16.mxu0 %v7364_v16 }
 0xae1   : > { %6828 = vmatmul.mubr.msk.bf16.vlgmr.msra.gmra.mrb[112].mxu0 %vm478_vm0, %v8268_v42 }
 0xae2   : > { %6842 = vmatpush3.bf16.msra.mxu0 %v7156_v20  ;;  %6847 = vmatprep.mubr.msk.bf16.mxu0 %vm7365_vm1, %v7364_v16 }
 0xae3   : > { %6843 = vmatprep.subr.bf16.mxu0 %v7364_v16 }
 0xae6   : > { %6844 = vmatpush3.bf16.msra.mxu0 %v7157_v22 }
 0xae7   : > { %6845 = vmatprep.subr.bf16.mxu0 %v7364_v16 }
 0xaea   : > { %6846 = vmatpush3.bf16.msra.mxu0 %v7158_v23 }
 0xaeb   : > { %6861 = vmatprep.subr.bf16.mxu0 %v7364_v16 }
 0xaed   : > { %6848 = vmatmul.mubr.msk.bf16.vlgmr.msra.gmra.mrb[116].mxu0 %vm478_vm0, %v8268_v42 }
 0xaee   : > { %6862 = vmatpush3.bf16.msra.mxu0 %v7159_v27  ;;  %6867 = vmatprep.mubr.msk.bf16.mxu0 %vm7365_vm1, %v7364_v16 }
 0xaef   : > { %6863 = vmatprep.subr.bf16.mxu0 %v7364_v16 }
 0xaf2   : > { %6864 = vmatpush3.bf16.msra.mxu0 %v7160_v28 }
 0xaf3   : > { %6865 = vmatprep.subr.bf16.mxu0 %v7364_v16 }
 0xaf6   : > { %6866 = vmatpush3.bf16.msra.mxu0 %v7161_v29 }
 0xaf7   : > { %6883 = vmatprep.subr.bf16.mxu0 %v7364_v16 }
 0xaf9   : > { %6868 = vmatmul.mubr.msk.bf16.vlgmr.msra.gmra.mrb[120].mxu0 %vm478_vm0, %v8268_v42 }
 0xafa   : > { %6885 = vmatprep.mubr.msk.bf16.mxu0 %vm7365_vm1, %v7364_v16 }
 0xb54   : > { %v3262_v31 = vpop.f32.mrb[80].mxu0  ;;  %v3498_v33 = vpop.f32.mrb[72].mxu1 }
 0xb55   : > { %v6699_v34 = vpop.f32.mrb[81].mxu0  ;;  %v6739_v36 = vpop.f32.mrb[73].mxu1 }
 0xb56   : > { %v3265_v25 = vpop.f32.mrb[82].mxu0  ;;  %v3501_v38 = vpop.f32.mrb[74].mxu1 }
 0xb57   : > { %v4272_v40 = vpack.c.bf16 %v3265_v25, %v3262_v31  ;;  %v4276_v39 = vpack.c.bf16 %v3501_v38, %v3498_v33  ;;  %v6700_v52 = vpop.f32.mrb[83].mxu0  ;;  %v6740_v55 = vpop.f32.mrb[75].mxu1 }
 0xb60   : > { %v8528_v56 = vpop.f32.mrb[84].mxu0  ;;  %v3616_v35 = vpop.f32.mrb[76].mxu1 }
 0xb61   : > { %v6709_v45 = vpop.f32.mrb[85].mxu0  ;;  %v6759_v46 = vpop.f32.mrb[77].mxu1 }
 0xb62   : > { %v8530_v48 = vpop.f32.mrb[86].mxu0  ;;  %v3619_v42 = vpop.f32.mrb[78].mxu1 }
 0xb63   : > { %v4273_v49 = vpack.c.bf16 %v8530_v48, %v8528_v56  ;;  %v4278_v50 = vpack.c.bf16 %v3619_v42, %v3616_v35  ;;  %v6710_v57 = vpop.f32.mrb[87].mxu0  ;;  %v6760_v58 = vpop.f32.mrb[79].mxu1 }
 0xb65   : > { %v4294_v59 = vsel %vm1714_vm2, %v4278_v50, 0 }
 0xb66   : > { %6872 = vmatpush3.bf16.xpose.msra.mxu1 %v4294_v59 }
 0xb67   : > { %6877 = vmatprep.subr.bf16.mxu1 %v7364_v16 }
 0xb6c   : > { %v3380_v60 = vpop.f32.mrb[88].mxu0  ;;  %v3734_v26 = vpop.f32.mrb[80].mxu1 }
 0xb6d   : > { %v6719_v30 = vpop.f32.mrb[89].mxu0  ;;  %v6779_v32 = vpop.f32.mrb[81].mxu1  ;;  %6874 = vmatmul.mubr.msk.bf16.vlgmr.msra.gmra.mrb[100].mxu1 %vm1714_vm2, %v4272_v40 }
 0xb6e   : > { %v3383_v61 = vpop.f32.mrb[90].mxu0  ;;  %v3737_v51 = vpop.f32.mrb[82].mxu1  ;;  %6879 = vmatprep.mubr.msk.bf16.mxu1 %vm7365_vm1, %v7364_v16 }
 0xb6f   : > { %v4274_v62 = vpack.c.bf16 %v3383_v61, %v3380_v60  ;;  %v4280_v0 = vpack.c.bf16 %v3737_v51, %v3734_v26  ;;  %v6720_v4 = vpop.f32.mrb[91].mxu0  ;;  %v6780_v6 = vpop.f32.mrb[83].mxu1 }
 0xb71   : > { %v4388_v7 = vsel %vm1714_vm2, %v4280_v0, 0 }
 0xb72   : > { %6884 = vmatpush3.bf16.xpose.msra.mxu0 %v4388_v7 }
 0xb73   : > { %6895 = vmatprep.subr.bf16.mxu0 %v7364_v16 }
 0xb78   : > { %v3439_v37 = vpop.f32.mrb[92].mxu0  ;;  %v3852_v44 = vpop.f32.mrb[84].mxu1 }
 0xb79   : > { %v6729_v41 = vpop.f32.mrb[93].mxu0  ;;  %v6799_v43 = vpop.f32.mrb[85].mxu1  ;;  %6886 = vmatmul.mubr.msk.bf16.vlgmr.msra.gmra.mrb[124].mxu0 %vm1714_vm2, %v4274_v62 }
 0xb7a   : > { %v3442_v18 = vpop.f32.mrb[94].mxu0  ;;  %v3855_v63 = vpop.f32.mrb[86].mxu1  ;;  %6897 = vmatprep.mubr.msk.bf16.mxu0 %vm7365_vm1, %v7364_v16 }
 0xb7b   : > { %v4275_v8 = vpack.c.bf16 %v3442_v18, %v3439_v37  ;;  %v4282_v9 = vpack.c.bf16 %v3855_v63, %v3852_v44  ;;  %v6730_v2 = vpop.f32.mrb[95].mxu0  ;;  %v6800_v10 = vpop.f32.mrb[87].mxu1 }
 0xb7d   : > { %v4482_v11 = vsel %vm1714_vm2, %v4282_v9, 0 }
 0xb7e   : > { %6896 = vmatpush3.bf16.xpose.msra.mxu0 %v4482_v11 }
 0xb7f   : > { %6907 = vmatprep.subr.bf16.mxu0 %v7364_v16 }
 0xb84   : > { %v3557_v12 = vpop.f32.mrb[96].mxu0  ;;  %v3970_v3 = vpop.f32.mrb[88].mxu1 }
 0xb85   : > { %v6749_v13 = vpop.f32.mrb[97].mxu0  ;;  %v6819_v14 = vpop.f32.mrb[89].mxu1  ;;  %6898 = vmatmul.mubr.msk.bf16.vlgmr.msra.gmra.mrb[128].mxu0 %vm1714_vm2, %v4276_v39 }
 0xb86   : > { %v3560_v5 = vpop.f32.mrb[98].mxu0  ;;  %v3973_v15 = vpop.f32.mrb[90].mxu1  ;;  %6909 = vmatprep.mubr.msk.bf16.mxu0 %vm7365_vm1, %v7364_v16 }
 0xb87   : > { %v4277_v20 = vpack.c.bf16 %v3560_v5, %v3557_v12  ;;  %v4284_v22 = vpack.c.bf16 %v3973_v15, %v3970_v3  ;;  %v6750_v23 = vpop.f32.mrb[99].mxu0  ;;  %v6820_v27 = vpop.f32.mrb[91].mxu1 }
 0xb89   : > { %6908 = vmatpush3.bf16.msra.mxu0 %v4284_v22 }
 0xb8a   : > { %6919 = vmatprep.subr.bf16.mxu0 %v7364_v16 }
 0xb90   : > { %v3675_v28 = vpop.f32.mrb[100].mxu0  ;;  %v8550_v29 = vpop.f32.mrb[92].mxu1 }
 0xb91   : > { %v6769_v31 = vpop.f32.mrb[101].mxu0  ;;  %v6839_v33 = vpop.f32.mrb[93].mxu1 }
 0xb92   : > { %v3678_v34 = vpop.f32.mrb[102].mxu0  ;;  %v8552_v36 = vpop.f32.mrb[94].mxu1 }
 0xb93   : > { %v4279_v25 = vpack.c.bf16 %v3678_v34, %v3675_v28  ;;  %v4286_v38 = vpack.c.bf16 %v8552_v36, %v8550_v29  ;;  %v6770_v40 = vpop.f32.mrb[103].mxu0  ;;  %v6840_v39 = vpop.f32.mrb[95].mxu1 }
 0xb95   : > { %v4341_v52 = vsel %vm1714_vm2, %v4279_v25, 0 }
 0xb96   : > { %6878 = vmatpush3.bf16.xpose.msra.mxu1 %v4341_v52 }
 0xb97   : > { %6889 = vmatprep.subr.bf16.mxu1 %v7364_v16 }
 0xb9c   : > { %v3793_v55 = vpop.f32.mrb[104].mxu0  ;;  %v8558_v35 = vpop.f32.mrb[96].mxu1 }
 0xb9d   : > { %v6789_v45 = vpop.f32.mrb[105].mxu0  ;;  %v6859_v46 = vpop.f32.mrb[97].mxu1  ;;  %6880 = vmatmul.mubr.msk.bf16.vlgmr.msra.gmra.mrb[104].mxu1 %vm1714_vm2, %v4273_v49 }
 0xb9e   : > { %v3796_v42 = vpop.f32.mrb[106].mxu0  ;;  %v8564_v50 = vpop.f32.mrb[98].mxu1  ;;  %6891 = vmatprep.mubr.msk.bf16.mxu1 %vm7365_vm1, %v7364_v16 }
 0xb9f   : > { %v4281_v57 = vpack.c.bf16 %v3796_v42, %v3793_v55  ;;  %v4288_v58 = vpack.c.bf16 %v8564_v50, %v8558_v35  ;;  %v6790_v59 = vpop.f32.mrb[107].mxu0  ;;  %v6860_v60 = vpop.f32.mrb[99].mxu1 }
 0xba1   : > { %v4435_v26 = vsel %vm1714_vm2, %v4281_v57, 0 }
 0xba2   : > { %6890 = vmatpush3.bf16.xpose.msra.mxu1 %v4435_v26 }
 0xba3   : > { %6901 = vmatprep.subr.bf16.mxu1 %v7364_v16 }
 0xba8   : > { %v3911_v56 = vpop.f32.mrb[108].mxu0 }
 0xba9   : > { %v6809_v48 = vpop.f32.mrb[109].mxu0  ;;  %6892 = vmatmul.mubr.msk.bf16.vlgmr.msra.gmra.mrb[108].mxu1 %vm1714_vm2, %v4275_v8 }
 0xbaa   : > { %v3914_v49 = vpop.f32.mrb[110].mxu0  ;;  %6903 = vmatprep.mubr.msk.bf16.mxu1 %vm7365_vm1, %v7364_v16 }
 0xbab   : > { %v4283_v30 = vpack.c.bf16 %v3914_v49, %v3911_v56  ;;  %v6810_v32 = vpop.f32.mrb[111].mxu0 }
 0xbad   : > { %v4529_v61 = vsel %vm1714_vm2, %v4283_v30, 0 }
 0xbae   : > { %6902 = vmatpush3.bf16.xpose.msra.mxu1 %v4529_v61 }
 0xbaf   : > { %6913 = vmatprep.subr.bf16.mxu1 %v7364_v16 }
 0xbb4   : > { %v4029_v51 = vpop.f32.mrb[112].mxu0 }
 0xbb5   : > { %v6829_v62 = vpop.f32.mrb[113].mxu0  ;;  %6904 = vmatmul.mubr.msk.bf16.vlgmr.msra.gmra.mrb[112].mxu1 %vm1714_vm2, %v4277_v20 }
 0xbb6   : > { %v4032_v0 = vpop.f32.mrb[114].mxu0  ;;  %6915 = vmatprep.mubr.msk.bf16.mxu1 %vm7365_vm1, %v7364_v16 }
 0xbb7   : > { %v4285_v4 = vpack.c.bf16 %v4032_v0, %v4029_v51  ;;  %v6830_v6 = vpop.f32.mrb[115].mxu0 }
 0xbb9   : > { %6914 = vmatpush3.bf16.msra.mxu1 %v4285_v4 }
 0xbba   : > { %6925 = vmatprep.subr.bf16.mxu1 %v7364_v16 }
 0xbc0   : > { %v8581_v7 = vpop.f32.mrb[116].mxu0 }
 0xbc1   : > { %v6849_v37 = vpop.f32.mrb[117].mxu0 }
 0xbc2   : > { %v8583_v44 = vpop.f32.mrb[118].mxu0 }
 0xbc3   : > { %v4287_v41 = vpack.c.bf16 %v8583_v44, %v8581_v7  ;;  %v6850_v43 = vpop.f32.mrb[119].mxu0 }
 0xbcc   : > { %v8587_v18 = vpop.f32.mrb[120].mxu0 }
 0xbcd   : > { %v6869_v63 = vpop.f32.mrb[121].mxu0 }
 0xbce   : > { %v8589_v8 = vpop.f32.mrb[122].mxu0 }
 0xbcf   : > { %v4289_v9 = vpack.c.bf16 %v8589_v8, %v8587_v18  ;;  %v6870_v2 = vpop.f32.mrb[123].mxu0  ;;  %v6100_v18 = vld [vmem:[%s8985_s4 + $0x18] sm:$0xf] }
 0xbd0   : > { %v5015_v8 = vsel %vm2443_vm6, %v6100_v18, 0 }
 0xc40   : > { %v4330_v10 = vpop.f32.mrb[100].mxu1 }
 0xc41   : > { %v4572_v11 = vmul.f32 0.14433756, %v4330_v10  ;;  %v6875_v12 = vpop.f32.mrb[101].mxu1 }
 0xc42   : > { %v4333_v3 = vpop.f32.mrb[102].mxu1 }
 0xc43   : > { %v4573_v13 = vmul.f32 0.14433756, %v4333_v3  ;;  %v6876_v14 = vpop.f32.mrb[103].mxu1  ;;  %v8595_v5 = vsel %vm7895_vm3, %v4572_v11, -1e+30 }
 0xc44   : > { %v4596_v15 = vsel %vm2025_vm4, %v8595_v5, -inf }
 0xc45   : > { %4597 = vmax.xlane.f32.xlu0 %v4596_v15  ;;  %v8601_v20 = vsel %vm7901_vm5, %v4573_v13, -1e+30 }
 0xc46   : > { %v4599_v22 = vsel %vm2025_vm4, %v8601_v20, -inf }
 0xc47   : > { %4600 = vmax.xlane.f32.xlu1 %v4599_v22 }
 0xc4c   : > { %v4424_v23 = vpop.f32.mrb[124].mxu0 }
 0xc4d   : > { %v6887_v27 = vpop.f32.mrb[125].mxu0  ;;  %v4576_v52 = vmul.f32 0.14433756, %v4424_v23 }
 0xc4e   : > { %v4427_v28 = vpop.f32.mrb[126].mxu0 }
 0xc4f   : > { %v6888_v31 = vpop.f32.mrb[127].mxu0  ;;  %v4577_v46 = vmul.f32 0.14433756, %v4427_v28  ;;  %v8612_v48 = vsel %vm7895_vm3, %v4576_v52, -1e+30 }
 0xc50   : > { %v4608_v32 = vsel %vm2025_vm4, %v8612_v48, -inf }
 0xc51   : > { %v8617_v30 = vsel %vm7901_vm5, %v4577_v46, -1e+30 }
 0xc52   : > { %v4611_v61 = vsel %vm2025_vm4, %v8617_v30, -inf }
 0xc58   : > { %v4518_v33 = vpop.f32.mrb[128].mxu0 }
 0xc59   : > { %v6899_v34 = vpop.f32.mrb[129].mxu0  ;;  %v4580_v62 = vmul.f32 0.14433756, %v4518_v33 }
 0xc5a   : > { %v4521_v25 = vpop.f32.mrb[130].mxu0 }
 0xc5b   : > { %v6900_v40 = vpop.f32.mrb[131].mxu0  ;;  %v4581_v6 = vmul.f32 0.14433756, %v4521_v25  ;;  %v8630_v12 = vsel %vm7895_vm3, %v4580_v62, -1e+30 }
 0xc5c   : > { %v4620_v14 = vsel %vm2025_vm4, %v8630_v12, -inf }
 0xc5d   : > { %v8635_v13 = vsel %vm7901_vm5, %v4581_v6, -1e+30 }
 0xc5e   : > { %v4623_v15 = vsel %vm2025_vm4, %v8635_v13, -inf }
 0xc70   : > { %v4377_v39 = vpop.f32.mrb[104].mxu1 }
 0xc71   : > { %v4574_v55 = vmul.f32 0.14433756, %v4377_v39  ;;  %v6881_v45 = vpop.f32.mrb[105].mxu1 }
 0xc72   : > { %v4380_v42 = vpop.f32.mrb[106].mxu1 }
 0xc73   : > { %v4575_v57 = vmul.f32 0.14433756, %v4380_v42  ;;  %v6882_v59 = vpop.f32.mrb[107].mxu1  ;;  %v4586_v60 = vsel %vm7895_vm3, %v4574_v55, -1e+30 }
 0xc74   : > { %v4602_v26 = vsel %vm2025_vm4, %v4586_v60, -inf }
 0xc75   : > { %4603 = vmax.xlane.f32.xlu0 %v4602_v26  ;;  %v4587_v56 = vsel %vm7901_vm5, %v4575_v57, -1e+30 }
 0xc76   : > { %v4605_v49 = vsel %vm2025_vm4, %v4587_v56, -inf }
 0xc77   : > { %4606 = vmax.xlane.f32.xlu1 %v4605_v49 }
 0xc79   : > { %4609 = vmax.xlane.f32.xlu0 %v4608_v32 }
 0xc7b   : > { %4612 = vmax.xlane.f32.xlu1 %v4611_v61 }
 0xc7c   : > { %v4471_v51 = vpop.f32.mrb[108].mxu1 }
 0xc7d   : > { %v4578_v0 = vmul.f32 0.14433756, %v4471_v51  ;;  %v6893_v4 = vpop.f32.mrb[109].mxu1 }
 0xc7e   : > { %v4474_v37 = vpop.f32.mrb[110].mxu1 }
 0xc7f   : > { %v4579_v43 = vmul.f32 0.14433756, %v4474_v37  ;;  %v6894_v63 = vpop.f32.mrb[111].mxu1  ;;  %v4590_v2 = vsel %vm7895_vm3, %v4578_v0, -1e+30 }
 0xc80   : > { %v4614_v10 = vsel %vm2025_vm4, %v4590_v2, -inf }
 0xc81   : > { %4615 = vmax.xlane.f32.xlu0 %v4614_v10  ;;  %v4591_v11 = vsel %vm7901_vm5, %v4579_v43, -1e+30 }
 0xc82   : > { %v4617_v3 = vsel %vm2025_vm4, %v4591_v11, -inf }
 0xc83   : > { %4618 = vmax.xlane.f32.xlu1 %v4617_v3 }
 0xc85   : > { %4621 = vmax.xlane.f32.xlu0 %v4620_v14 }
 0xc87   : > { %4624 = vmax.xlane.f32.xlu1 %v4623_v15 }
 0xc88   : > { %v4565_v22 = vpop.f32.mrb[112].mxu1 }
 0xc89   : > { %v4582_v23 = vmul.f32 0.14433756, %v4565_v22  ;;  %v6905_v27 = vpop.f32.mrb[113].mxu1 }
 0xc8a   : > { %v4568_v28 = vpop.f32.mrb[114].mxu1 }
 0xc8b   : > { %v4583_v31 = vmul.f32 0.14433756, %v4568_v28  ;;  %v6906_v33 = vpop.f32.mrb[115].mxu1  ;;  %v8643_v34 = vsel %vm7895_vm3, %v4582_v23, -1e+30 }
 0xc8c   : > { %v4626_v25 = vsel %vm2025_vm4, %v8643_v34, -inf }
 0xc8d   : > { %4627 = vmax.xlane.f32.xlu0 %v4626_v25  ;;  %v8649_v40 = vsel %vm7901_vm5, %v4583_v31, -1e+30 }
 0xc8e   : > { %v4629_v39 = vsel %vm2025_vm4, %v8649_v40, -inf }
 0xc8f   : > { %4630 = vmax.xlane.f32.xlu1 %v4629_v39 }
 0xcd2   : > { %v4598_v52 = vpop.xlane.xlu0 %4597 }
 0xcd3   : > { %v4632_v55 = vsub.f32 %v8595_v5, %v4598_v52 }
 0xcd4   : > { %v4601_v45 = vpop.xlane.xlu1 %4600 }
 0xcd5   : > { %v4644_v46 = vmul.f32 1.442695, %v4632_v55  ;;  %v4633_v17 = vsub.f32 %v8601_v20, %v4601_v45 }
 0xcd7   : > { %7246 = vpow2.f32 %v4644_v46  ;;  %v4646_v42 = vmul.f32 1.442695, %v4633_v17 }
 0xcd9   : > { %7248 = vpow2.f32 %v4646_v42 }
 0xce1   : > { %v8655_v57 = vpop.eup %7246 }
 0xce2   : > { %v4668_v19 = vsel %vm2025_vm4, %v8655_v57, 0.0 }
 0xce3   : > { %v8659_v59 = vpop.eup %7248  ;;  %4669 = vadd.xlane.f32.xlu0 %v4668_v19 }
 0xce4   : > { %v4671_v26 = vsel %vm2025_vm4, %v8659_v59, 0.0 }
 0xce5   : > { %4672 = vadd.xlane.f32.xlu1 %v4671_v26 }
 0xd02   : > { %v4604_v5 = vpop.xlane.xlu0 %4603 }
 0xd03   : > { %v4634_v49 = vsub.f32 %v4586_v60, %v4604_v5 }
 0xd04   : > { %v4607_v32 = vpop.xlane.xlu1 %4606 }
 0xd05   : > { %v4648_v61 = vmul.f32 1.442695, %v4634_v49  ;;  %v4635_v20 = vsub.f32 %v4587_v56, %v4607_v32 }
 0xd06   : > { %v4610_v51 = vpop.xlane.xlu0 %4609 }
 0xd07   : > { %7250 = vpow2.f32 %v4648_v61  ;;  %v4650_v62 = vmul.f32 1.442695, %v4635_v20  ;;  %v4636_v0 = vsub.f32 %v8612_v48, %v4610_v51 }
 0xd08   : > { %v4613_v4 = vpop.xlane.xlu1 %4612 }
 0xd09   : > { %7252 = vpow2.f32 %v4650_v62  ;;  %v4652_v6 = vmul.f32 1.442695, %v4636_v0  ;;  %v4637_v37 = vsub.f32 %v8617_v30, %v4613_v4 }
 0xd0b   : > { %7254 = vpow2.f32 %v4652_v6  ;;  %v4654_v43 = vmul.f32 1.442695, %v4637_v37 }
 0xd0d   : > { %7256 = vpow2.f32 %v4654_v43 }
 0xd0e   : > { %v4616_v63 = vpop.xlane.xlu0 %4615 }
 0xd0f   : > { %v4638_v10 = vsub.f32 %v4590_v2, %v4616_v63 }
 0xd10   : > { %v4619_v3 = vpop.xlane.xlu1 %4618 }
 0xd11   : > { %v8665_v60 = vpop.eup %7250  ;;  %v4656_v14 = vmul.f32 1.442695, %v4638_v10  ;;  %v4639_v56 = vsub.f32 %v4591_v11, %v4619_v3 }
 0xd12   : > { %v4622_v15 = vpop.xlane.xlu0 %4621  ;;  %v4674_v22 = vsel %vm2025_vm4, %v8665_v60, 0.0 }
 0xd13   : > { %v8669_v48 = vpop.eup %7252  ;;  %7258 = vpow2.f32 %v4656_v14  ;;  %v4658_v23 = vmul.f32 1.442695, %v4639_v56  ;;  %v4640_v30 = vsub.f32 %v8630_v12, %v4622_v15  ;;  %4675 = vadd.xlane.f32.xlu0 %v4674_v22 }
 0xd14   : > { %v4625_v27 = vpop.xlane.xlu1 %4624  ;;  %v4677_v2 = vsel %vm2025_vm4, %v8669_v48, 0.0 }
 0xd15   : > { %v8674_v28 = vpop.eup %7254  ;;  %7260 = vpow2.f32 %v4658_v23  ;;  %v4660_v31 = vmul.f32 1.442695, %v4640_v30  ;;  %v4641_v11 = vsub.f32 %v8635_v13, %v4625_v27  ;;  %4678 = vadd.xlane.f32.xlu1 %v4677_v2 }
 0xd16   : > { %v4680_v33 = vsel %vm2025_vm4, %v8674_v28, 0.0 }
 0xd17   : > { %v8679_v25 = vpop.eup %7256  ;;  %7262 = vpow2.f32 %v4660_v31  ;;  %v4662_v39 = vmul.f32 1.442695, %v4641_v11  ;;  %4681 = vadd.xlane.f32.xlu0 %v4680_v33 }
 0xd18   : > { %v4683_v12 = vsel %vm2025_vm4, %v8679_v25, 0.0 }
 0xd19   : > { %7264 = vpow2.f32 %v4662_v39  ;;  %4684 = vadd.xlane.f32.xlu1 %v4683_v12 }
 0xd1a   : > { %v4628_v52 = vpop.xlane.xlu0 %4627 }
 0xd1b   : > { %v4642_v55 = vsub.f32 %v8643_v34, %v4628_v52 }
 0xd1c   : > { %v4631_v45 = vpop.xlane.xlu1 %4630 }
 0xd1d   : > { %v8684_v46 = vpop.eup %7258  ;;  %v4664_v13 = vmul.f32 1.442695, %v4642_v55  ;;  %v4643_v17 = vsub.f32 %v8649_v40, %v4631_v45 }
 0xd1e   : > { %v4686_v42 = vsel %vm2025_vm4, %v8684_v46, 0.0 }
 0xd1f   : > { %v8689_v19 = vpop.eup %7260  ;;  %7266 = vpow2.f32 %v4664_v13  ;;  %v4666_v26 = vmul.f32 1.442695, %v4643_v17  ;;  %4687 = vadd.xlane.f32.xlu0 %v4686_v42 }
 0xd20   : > { %v4689_v5 = vsel %vm2025_vm4, %v8689_v19, 0.0 }
 0xd21   : > { %v8693_v49 = vpop.eup %7262  ;;  %7268 = vpow2.f32 %v4666_v26  ;;  %4690 = vadd.xlane.f32.xlu1 %v4689_v5  ;;  %v6102_v26 = vld [vmem:[%s8985_s4 + $0x20] sm:$0xf] }
 0xd22   : > { %v4692_v34 = vsel %vm2025_vm4, %v8693_v49, 0.0 }
 0xd23   : > { %v8697_v32 = vpop.eup %7264  ;;  %4693 = vadd.xlane.f32.xlu0 %v4692_v34 }
 0xd24   : > { %v4695_v40 = vsel %vm2025_vm4, %v8697_v32, 0.0 }
 0xd25   : > { %4696 = vadd.xlane.f32.xlu1 %v4695_v40  ;;  %v5109_v40 = vsel %vm2443_vm6, %v6102_v26, 0 }
 0xd29   : > { %v8701_v61 = vpop.eup %7266 }
 0xd2a   : > { %v4698_v20 = vsel %vm2025_vm4, %v8701_v61, 0.0 }
 0xd2b   : > { %v8705_v51 = vpop.eup %7268  ;;  %4699 = vadd.xlane.f32.xlu0 %v4698_v20  ;;  %v6103_v20 = vld [vmem:[%s8985_s4 + $0x24] sm:$0xf] }
 0xd2c   : > { %v4701_v62 = vsel %vm2025_vm4, %v8705_v51, 0.0 }
 0xd2d   : > { %4702 = vadd.xlane.f32.xlu1 %v4701_v62 }
 0xd70   : > { %v4670_v0 = vpop.xlane.xlu0 %4669 }
 0xd71   : > { %7270 = vrcp.f32 %v4670_v0 }
 0xd72   : > { %v4673_v4 = vpop.xlane.xlu1 %4672 }
 0xd73   : > { %7272 = vrcp.f32 %v4673_v4 }
 0xd7b   : > { %v7271_v6 = vpop.eup %7270 }
 0xd7c   : > { %v4716_v43 = vmul.f32 %v7271_v6, %v8655_v57  ;;  %v5156_v6 = vsel %vm2443_vm6, %v6103_v20, 0 }
 0xd7d   : > { %v7273_v37 = vpop.eup %7272 }
 0xd7e   : > { %v4717_v63 = vmul.f32 %v7273_v37, %v8659_v59 }
 0xd80   : > { %v4728_v10 = vpack.c.bf16 %v4717_v63, %v4716_v43  ;;  %v6104_v43 = vld [vmem:[%s8985_s4 + $0x28] sm:$0xf] }
 0xd82   : > { %6910 = vmatmul.mubr.msk.bf16.vlgmr.msra.gmra.mrb[132].mxu0 %vm2025_vm4, %v4728_v10 }
 0xd83   : > { %6920 = vmatpush3.bf16.msra.mxu0 %v4286_v38  ;;  %6921 = vmatprep.mubr.msk.bf16.mxu0 %vm7365_vm1, %v7364_v16 }
 0xd84   : > { %6931 = vmatprep.subr.bf16.mxu0 %v7364_v16 }
 0xda0   : > { %v4676_v3 = vpop.xlane.xlu0 %4675 }
 0xda1   : > { %7274 = vrcp.f32 %v4676_v3 }
 0xda2   : > { %v4679_v14 = vpop.xlane.xlu1 %4678 }
 0xda3   : > { %7276 = vrcp.f32 %v4679_v14 }
 0xda4   : > { %v4682_v56 = vpop.xlane.xlu0 %4681 }
 0xda5   : > { %7278 = vrcp.f32 %v4682_v56  ;;  %v5203_v56 = vsel %vm2443_vm6, %v6104_v43, 0 }
 0xda6   : > { %v4685_v57 = vpop.xlane.xlu1 %4684 }
 0xda7   : > { %7280 = vrcp.f32 %v4685_v57 }
 0xdab   : > { %v7275_v59 = vpop.eup %7274 }
 0xdac   : > { %v4688_v15 = vpop.xlane.xlu0 %4687  ;;  %v4718_v29 = vmul.f32 %v7275_v59, %v8665_v60  ;;  %v6105_v59 = vld [vmem:[%s8985_s4 + $0x2c] sm:$0xf] }
 0xdad   : > { %v7277_v22 = vpop.eup %7276  ;;  %7282 = vrcp.f32 %v4688_v15 }
 0xdae   : > { %v4719_v36 = vmul.f32 %v7277_v22, %v8669_v48  ;;  %v4691_v38 = vpop.xlane.xlu1 %4690 }
 0xdaf   : > { %v7279_v23 = vpop.eup %7278  ;;  %7284 = vrcp.f32 %v4691_v38  ;;  %v5250_v38 = vsel %vm2443_vm6, %v6105_v59, 0 }
 0xdb0   : > { %v4694_v30 = vpop.xlane.xlu0 %4693  ;;  %v4729_v27 = vpack.c.bf16 %v4719_v36, %v4718_v29  ;;  %v4720_v31 = vmul.f32 %v7279_v23, %v8674_v28 }
 0xdb1   : > { %v7281_v2 = vpop.eup %7280  ;;  %7286 = vrcp.f32 %v4694_v30 }
 0xdb2   : > { %v4721_v11 = vmul.f32 %v7281_v2, %v8679_v25  ;;  %6916 = vmatmul.mubr.msk.bf16.vlgmr.msra.gmra.mrb[116].mxu1 %vm2025_vm4, %v4729_v27  ;;  %v4697_v33 = vpop.xlane.xlu1 %4696 }
 0xdb3   : > { %6926 = vmatpush3.bf16.msra.mxu1 %v4287_v41  ;;  %7288 = vrcp.f32 %v4697_v33  ;;  %6927 = vmatprep.mubr.msk.bf16.mxu1 %vm7365_vm1, %v7364_v16 }
 0xdb4   : > { %v4730_v60 = vpack.c.bf16 %v4721_v11, %v4720_v31  ;;  %6937 = vmatprep.subr.bf16.mxu1 %v7364_v16 }
 0xdb6   : > { %6922 = vmatmul.mubr.msk.bf16.vlgmr.msra.gmra.mrb[136].mxu0 %vm2025_vm4, %v4730_v60 }
 0xdb7   : > { %v7283_v48 = vpop.eup %7282  ;;  %6932 = vmatpush3.bf16.msra.mxu0 %v4288_v58  ;;  %6933 = vmatprep.mubr.msk.bf16.mxu0 %vm7365_vm1, %v7364_v16 }
 0xdb8   : > { %v4700_v28 = vpop.xlane.xlu0 %4699  ;;  %6943 = vmatprep.subr.bf16.mxu0 %v7364_v16  ;;  %v4722_v44 = vmul.f32 %v7283_v48, %v8684_v46 }
 0xdb9   : > { %v7285_v7 = vpop.eup %7284  ;;  %7290 = vrcp.f32 %v4700_v28 }
 0xdba   : > { %v4723_v41 = vmul.f32 %v7285_v7, %v8689_v19  ;;  %v4703_v25 = vpop.xlane.xlu1 %4702 }
 0xdbb   : > { %v7287_v39 = vpop.eup %7286  ;;  %7292 = vrcp.f32 %v4703_v25 }
 0xdbc   : > { %v4731_v12 = vpack.c.bf16 %v4723_v41, %v4722_v44  ;;  %v4724_v35 = vmul.f32 %v7287_v39, %v8693_v49 }
 0xdbd   : > { %v7289_v52 = vpop.eup %7288 }
 0xdbe   : > { %v4725_v50 = vmul.f32 %v7289_v52, %v8697_v32  ;;  %6928 = vmatmul.mubr.msk.bf16.vlgmr.msra.gmra.mrb[120].mxu1 %vm2025_vm4, %v4731_v12 }
 0xdbf   : > { %6938 = vmatpush3.bf16.msra.mxu1 %v4289_v9  ;;  %6939 = vmatprep.mubr.msk.bf16.mxu1 %vm7365_vm1, %v7364_v16  ;;  %v6101_v9 = vld [vmem:[%s8985_s4 + $0x1c] sm:$0xf] }
 0xdc0   : > { %v4732_v58 = vpack.c.bf16 %v4725_v50, %v4724_v35  ;;  %6949 = vmatprep.subr.bf16.mxu1 %v7364_v16  ;;  %v5062_v42 = vsel %vm2443_vm6, %v6101_v9, 0 }
 0xdc2   : > { %6934 = vmatmul.mubr.msk.bf16.vlgmr.msra.gmra.mrb[140].mxu0 %vm2025_vm4, %v4732_v58 }
 0xdc3   : > { %v7291_v55 = vpop.eup %7290  ;;  %6945 = vmatprep.mubr.msk.bf16.mxu0 %vm7365_vm1, %v7364_v16  ;;  %6944 = vmatpush3.bf16.msra.mxu0 %v5015_v8 }
 0xdc4   : > { %v4726_v46 = vmul.f32 %v7291_v55, %v8701_v61  ;;  %6955 = vmatprep.subr.bf16.mxu0 %v7364_v16 }
 0xdc5   : > { %v7293_v45 = vpop.eup %7292 }
 0xdc6   : > { %v4727_v13 = vmul.f32 %v7293_v45, %v8705_v51 }
 0xdc8   : > { %v4733_v17 = vpack.c.bf16 %v4727_v13, %v4726_v46 }
 0xdca   : > { %6940 = vmatmul.mubr.msk.bf16.vlgmr.msra.gmra.mrb[124].mxu1 %vm2025_vm4, %v4733_v17 }
 0xdcb   : > { %6951 = vmatprep.mubr.msk.bf16.mxu1 %vm7365_vm1, %v7364_v16  ;;  %6950 = vmatpush3.bf16.msra.mxu1 %v5062_v42 }
 0xdcc   : > { %6961 = vmatprep.subr.bf16.mxu1 %v7364_v16 }
 0xe55   : > { %v4771_v19 = vpop.f32.mrb[132].mxu0 }
 0xe56   : > { %v6911_v5 = vpop.f32.mrb[133].mxu0 }
 0xe57   : > { %v4774_v49 = vpop.f32.mrb[134].mxu0 }
 0xe58   : > { %v4998_v34 = vpack.c.bf16 %v4774_v49, %v4771_v19  ;;  %v6912_v32 = vpop.f32.mrb[135].mxu0 }
 0xe5a   : > { %6946 = vmatmul.mubr.msk.bf16.vlgmr.msra.gmra.mrb[144].mxu0 %vm1714_vm2, %v4998_v34 }
 0xe5b   : > { %6956 = vmatpush3.bf16.msra.mxu0 %v5109_v40  ;;  %6957 = vmatprep.mubr.msk.bf16.mxu0 %vm7365_vm1, %v7364_v16 }
 0xe5c   : > { %6967 = vmatprep.subr.bf16.mxu0 %v7364_v16 }
 0xe85   : > { %v4815_v61 = vpop.f32.mrb[116].mxu1 }
 0xe86   : > { %v6917_v51 = vpop.f32.mrb[117].mxu1 }
 0xe87   : > { %v4818_v62 = vpop.f32.mrb[118].mxu1 }
 0xe88   : > { %v4999_v0 = vpack.c.bf16 %v4818_v62, %v4815_v61  ;;  %v6918_v4 = vpop.f32.mrb[119].mxu1 }
 0xe89   : > { %v4859_v37 = vpop.f32.mrb[136].mxu0 }
 0xe8a   : > { %v6923_v63 = vpop.f32.mrb[137].mxu0  ;;  %6952 = vmatmul.mubr.msk.bf16.vlgmr.msra.gmra.mrb[128].mxu1 %vm1714_vm2, %v4999_v0 }
 0xe8b   : > { %v4862_v10 = vpop.f32.mrb[138].mxu0  ;;  %6962 = vmatpush3.bf16.msra.mxu1 %v5156_v6  ;;  %6963 = vmatprep.mubr.msk.bf16.mxu1 %vm7365_vm1, %v7364_v16 }
 0xe8c   : > { %v5000_v3 = vpack.c.bf16 %v4862_v10, %v4859_v37  ;;  %v6924_v14 = vpop.f32.mrb[139].mxu0  ;;  %6973 = vmatprep.subr.bf16.mxu1 %v7364_v16 }
 0xe8e   : > { %6958 = vmatmul.mubr.msk.bf16.vlgmr.msra.gmra.mrb[148].mxu0 %vm1714_vm2, %v5000_v3 }
 0xe8f   : > { %6968 = vmatpush3.bf16.msra.mxu0 %v5203_v56  ;;  %6969 = vmatprep.mubr.msk.bf16.mxu0 %vm7365_vm1, %v7364_v16 }
 0xe91   : > { %v4903_v57 = vpop.f32.mrb[120].mxu1 }
 0xe92   : > { %v6929_v15 = vpop.f32.mrb[121].mxu1 }
 0xe93   : > { %v4906_v22 = vpop.f32.mrb[122].mxu1 }
 0xe94   : > { %v5001_v29 = vpack.c.bf16 %v4906_v22, %v4903_v57  ;;  %v6930_v36 = vpop.f32.mrb[123].mxu1  ;;  %v6113_v57 = vld [vmem:[%s8986_s5 + $0x1] ss:$0 sm:$0xff] }
 0xe95   : > { %v4947_v23 = vpop.f32.mrb[140].mxu0 }
 0xe96   : > { %v6935_v30 = vpop.f32.mrb[141].mxu0  ;;  %6964 = vmatmul.mubr.msk.bf16.vlgmr.msra.gmra.mrb[132].mxu1 %vm1714_vm2, %v5001_v29 }
 0xe97   : > { %v4950_v27 = vpop.f32.mrb[142].mxu0  ;;  %6974 = vmatpush3.bf16.msra.mxu1 %v5250_v38  ;;  %6975 = vmatprep.mubr.msk.bf16.mxu1 %vm7365_vm1, %v7364_v16 }
 0xe98   : > { %v5002_v2 = vpack.c.bf16 %v4950_v27, %v4947_v23  ;;  %v6936_v31 = vpop.f32.mrb[143].mxu0  ;;  %5584 = vmatprep.subr.bf16.mxu1 %v7366_v54 }
 0xe9a   : > { %6970 = vmatmul.mubr.msk.bf16.vlgmr.msra.gmra.mrb[152].mxu0 %vm1714_vm2, %v5002_v2 }
 0xe9b   : > { %5459 = vmatprep.mubr.bf16.mxu0 %v7366_v54 }
 0xe9d   : > { %v4991_v11 = vpop.f32.mrb[124].mxu1 }
 0xe9e   : > { %v6941_v33 = vpop.f32.mrb[125].mxu1 }
 0xe9f   : > { %v4994_v60 = vpop.f32.mrb[126].mxu1 }
 0xea0   : > { %v5003_v48 = vpack.c.bf16 %v4994_v60, %v4991_v11  ;;  %v6942_v28 = vpop.f32.mrb[127].mxu1 }
 0xea2   : > { %6976 = vmatmul.mubr.msk.bf16.vlgmr.msra.gmra.mrb[136].mxu1 %vm1714_vm2, %v5003_v48 }
 0xf2d   : > { %v5051_v7 = vpop.f32.mrb[144].mxu0 }
 0xf2e   : > { %v6947_v44 = vpop.f32.mrb[145].mxu0  ;;  %v5293_v12 = vsel %vm478_vm0, %v5051_v7, 0.0 }
 0xf2f   : > { %v5054_v41 = vpop.f32.mrb[146].mxu0 }
 0xf30   : > { %v6948_v25 = vpop.f32.mrb[147].mxu0  ;;  %v5304_v55 = vsel %vm478_vm0, %v5054_v41, 0.0 }
 0xf5d   : > { %v5098_v39 = vpop.f32.mrb[128].mxu1 }
 0xf5e   : > { %v5294_v52 = vsel %vm478_vm0, %v5098_v39, 0.0  ;;  %v6953_v35 = vpop.f32.mrb[129].mxu1  ;;  %v7164_v39 = vld [vmem:[%s8989_s8 + $0x34] ss:$8 sps:$4 sm:$0xff]  }
 0xf5f   : > { %v5295_v50 = vadd.f32 %v5294_v52, %v5293_v12  ;;  %v5101_v58 = vpop.f32.mrb[130].mxu1  ;;  %v7162_v12 = vld [vmem:[%s8989_s8 + $0x30] ss:$8 sps:$4 sm:$0xff]   ;;  %5427 = vmatprep.subr.bf16.mxu0 %v7164_v39  ;;  %v7167_v52 = vld [vmem:[%s8989_s8 + $0x44] ss:$8 sps:$4 sm:$0xff]  }
 0xf60   : > { %v5305_v45 = vsel %vm478_vm0, %v5101_v58, 0.0  ;;  %v6954_v46 = vpop.f32.mrb[131].mxu1  ;;  %5428 = vmatpush1.bf16.msra.mxu0 %v7162_v12  ;;  %v7165_v35 = vld [vmem:[%s8989_s8 + $0x40] ss:$8 sps:$4 sm:$0xff]   ;;  %v7170_v58 = vld [vmem:[%s8989_s8 + $0x54] ss:$8 sps:$4 sm:$0xff]  }
 0xf61   : > { %v5306_v13 = vadd.f32 %v5305_v45, %v5304_v55  ;;  %v5145_v17 = vpop.f32.mrb[148].mxu0  ;;  %5429 = vmatprep.subr.bf16.mxu0 %v7167_v52  ;;  %v7171_v55 = vld [vmem:[%s8991_s10 + $0x60] sm:$0xff]   ;;  %v7172_v45 = vld [vmem:[%s8991_s10 + $0x68] sm:$0xff]   ;;  %v7173_v46 = vld [vmem:[%s8991_s10 + $0x70] sm:$0xff]  }
 0xf62   : > { %v5296_v18 = vsel %vm478_vm0, %v5145_v17, 0.0  ;;  %v6959_v8 = vpop.f32.mrb[149].mxu0  ;;  %5585 = vmatpush1.bf16.msra.mxu1 %v7171_v55  ;;  %v7175_v17 = vld [vmem:[%s8991_s10 + $0x80] sm:$0xff]  }
 0xf63   : > { %v5297_v9 = vadd.f32 %v5296_v18, %v5295_v50  ;;  %v5148_v42 = vpop.f32.mrb[150].mxu0  ;;  %v7168_v50 = vld [vmem:[%s8989_s8 + $0x50] ss:$8 sps:$4 sm:$0xff]   ;;  %5586 = vmatprep.subr.bf16.mxu1 %v7366_v54  ;;  %v7176_v18 = vld [vmem:[%s8991_s10 + $0x88] sm:$0xff]  }
 0xf64   : > { %v5307_v19 = vsel %vm478_vm0, %v5148_v42, 0.0  ;;  %v6960_v26 = vpop.f32.mrb[151].mxu0  ;;  %5430 = vmatpush1.bf16.msra.mxu0 %v7165_v35  ;;  %v7177_v8 = vld [vmem:[%s8991_s10 + $0x90] sm:$0xff]   ;;  %v7179_v42 = vld [vmem:[%s8991_s10 + $0xa0] sm:$0xff]  }
 0xf65   : > { %v5308_v5 = vadd.f32 %v5307_v19, %v5306_v13  ;;  %5431 = vmatprep.subr.bf16.mxu0 %v7170_v58  ;;  %v7174_v13 = vld [vmem:[%s8991_s10 + $0x78] sm:$0xff]   ;;  %v6171_v35 = vld [vmem:[%s8994_s13] ss:$0 sm:$0xff] }
 0xf66   : > { %5587 = vmatpush1.bf16.msra.mxu1 %v7172_v45 }
 0xf67   : > { %5588 = vmatprep.subr.bf16.mxu1 %v7366_v54 }
 0xf68   : > { %5432 = vmatpush1.bf16.msra.mxu0 %v7168_v50 }
 0xf69   : > { %v5192_v49 = vpop.f32.mrb[132].mxu1  ;;  %6979 = vmatprep.subr.bf16.mxu0 %v7364_v16 }
 0xf6a   : > { %v5298_v34 = vsel %vm478_vm0, %v5192_v49, 0.0  ;;  %v6965_v32 = vpop.f32.mrb[133].mxu1  ;;  %5589 = vmatpush1.bf16.msra.mxu1 %v7173_v46 }
 0xf6b   : > { %v5299_v40 = vadd.f32 %v5298_v34, %v5297_v9  ;;  %v5195_v61 = vpop.f32.mrb[134].mxu1  ;;  %5590 = vmatprep.subr.bf16.mxu1 %v7366_v54  ;;  %v7178_v9 = vld [vmem:[%s8991_s10 + $0x98] sm:$0xff]  }
 0xf6c   : > { %v5309_v20 = vsel %vm478_vm0, %v5195_v61, 0.0  ;;  %v6966_v51 = vpop.f32.mrb[135].mxu1  ;;  %v6116_v61 = vld [vmem:[%s8987_s6 + $0x1] ss:$0 sm:$0xff] }
 0xf6d   : > { %v5310_v62 = vadd.f32 %v5309_v20, %v5308_v5  ;;  %v5239_v0 = vpop.f32.mrb[152].mxu0 }
 0xf6e   : > { %v5300_v4 = vsel %vm478_vm0, %v5239_v0, 0.0  ;;  %v6971_v6 = vpop.f32.mrb[153].mxu0  ;;  %5591 = vmatpush1.bf16.msra.mxu1 %v7174_v13 }
 0xf6f   : > { %v5301_v37 = vadd.f32 %v5300_v4, %v5299_v40  ;;  %v5242_v43 = vpop.f32.mrb[154].mxu0  ;;  %5592 = vmatprep.subr.bf16.mxu1 %v7366_v54  ;;  %v6117_v4 = vld [vmem:[%s8988_s7 + $0x1] ss:$0 sm:$0xff] }
 0xf70   : > { %v5311_v63 = vsel %vm478_vm0, %v5242_v43, 0.0  ;;  %v6972_v10 = vpop.f32.mrb[155].mxu0 }
 0xf71   : > { %v5312_v3 = vadd.f32 %v5311_v63, %v5310_v62  ;;  %v7180_v10 = vld [vmem:[%s8991_s10 + $0xa8] sm:$0xff]  }
 0xf72   : > { %5593 = vmatpush1.bf16.msra.mxu1 %v7175_v17 }
 0xf73   : > { %5594 = vmatprep.subr.bf16.mxu1 %v7366_v54 }
 0xf75   : > { %v5286_v14 = vpop.f32.mrb[136].mxu1 }
 0xf76   : > { %v5302_v56 = vsel %vm478_vm0, %v5286_v14, 0.0  ;;  %v6977_v59 = vpop.f32.mrb[137].mxu1  ;;  %5595 = vmatpush1.bf16.msra.mxu1 %v7176_v18  ;;  %v7182_v14 = vld [vmem:[%s8991_s10 + $0xb8] sm:$0xff]  }
 0xf77   : > { %v5303_v15 = vadd.f32 %v5302_v56, %v5301_v37  ;;  %v5289_v22 = vpop.f32.mrb[138].mxu1  ;;  %5596 = vmatprep.subr.bf16.mxu1 %v7366_v54  ;;  %v7183_v56 = vld [vmem:[%s8993_s12] sm:$0xff]  }
 0xf78   : > { %v5313_v29 = vsel %vm478_vm0, %v5289_v22, 0.0  ;;  %v6978_v36 = vpop.f32.mrb[139].mxu1 }
 0xf79   : > { %v5323_v38 = vadd.f32 %v6113_v57, %v5303_v15  ;;  %v5314_v23 = vadd.f32 %v5313_v29, %v5312_v3  ;;  %v7181_v3 = vld [vmem:[%s8991_s10 + $0xb0] sm:$0xff]  }
 0xf7a   : > { %5597 = vmatpush1.bf16.msra.mxu1 %v7177_v8 }
 0xf7b   : > { %v5324_v30 = vadd.f32 %v6113_v57, %v5314_v23  ;;  %v8815_v27 = vadd.f32 %v5323_v38, %v8219_v47  ;;  %5598 = vmatprep.subr.bf16.mxu1 %v7366_v54  ;;  %v6124_v57 = vld [vmem:[%s8990_s9 + $0x2] sm:$0x3] }
 0xf7c   : > { %v5387_v59 = vrot.slane %v6124_v57, %v2811_v21  ;;  %v7185_v21 = vld [vmem:[%s8993_s12 + $0x10] sm:$0xff]  }
 0xf7d   : > { %v5331_v2 = vsel %vm478_vm0, %v8815_v27, 0.0  ;;  %v8820_v31 = vadd.f32 %v5324_v30, %v8222_v53 }
 0xf7e   : > { %5332 = vadd.xlane.f32.xlu0 %v5331_v2  ;;  %5599 = vmatpush1.bf16.msra.mxu1 %v7178_v9 }
 0xf7f   : > { %v5334_v11 = vsel %vm478_vm0, %v8820_v31, 0.0  ;;  %5600 = vmatprep.subr.bf16.mxu1 %v7366_v54 }
 0xf80   : > { %5335 = vadd.xlane.f32.xlu1 %v5334_v11 }
 0xf82   : > { %5601 = vmatpush1.bf16.msra.mxu1 %v7179_v42 }
 0xf83   : > { %5602 = vmatprep.subr.bf16.mxu1 %v7366_v54 }
 0xf86   : > { %5603 = vmatpush1.bf16.msra.mxu1 %v7180_v10 }
 0xf87   : > { %5604 = vmatprep.subr.bf16.mxu1 %v7366_v54 }
 0xf8a   : > { %5605 = vmatpush1.bf16.msra.mxu1 %v7181_v3 }
 0xf8b   : > { %5606 = vmatprep.subr.bf16.mxu1 %v7366_v54  ;;  %v5391_v54 = vrot.slane %v6124_v57, %v2815_v24  ;;  %v6157_v24 = vld [vmem:[%s8992_s11 + $0x1] ss:$0 sm:$0xff] }
 0xf8e   : > { %5607 = vmatpush1.bf16.msra.mxu1 %v7182_v14 }
0x100b   : > { %v5333_v33 = vpop.xlane.xlu0 %5332 }
0x100c   : > { %v5337_v60 = vmul.f32 0.020833334, %v5333_v33 }
0x100d   : > { %v5336_v48 = vpop.xlane.xlu1 %5335 }
0x100e   : > { %v5339_v28 = vsub.f32 %v8815_v27, %v5337_v60  ;;  %v5338_v7 = vmul.f32 0.020833334, %v5336_v48 }
0x1010   : > { %v5340_v47 = vsub.f32 %v8820_v31, %v5338_v7  ;;  %v5341_v44 = vmul.f32 %v5339_v28, %v5339_v28 }
0x1012   : > { %v5343_v41 = vsel %vm478_vm0, %v5341_v44, 0.0  ;;  %v5342_v25 = vmul.f32 %v5340_v47, %v5340_v47 }
0x1013   : > { %5344 = vadd.xlane.f32.xlu0 %v5343_v41 }
0x1014   : > { %v5346_v53 = vsel %vm478_vm0, %v5342_v25, 0.0 }
0x1015   : > { %5347 = vadd.xlane.f32.xlu1 %v5346_v53 }
0x10a0   : > { %v5345_v19 = vpop.xlane.xlu0 %5344 }
0x10a1   : > { %v5349_v26 = vmul.f32 0.020833334, %v5345_v19 }
0x10a2   : > { %v5348_v5 = vpop.xlane.xlu1 %5347 }
0x10a3   : > { %v5351_v49 = vadd.f32 1e-05, %v5349_v26  ;;  %v5350_v34 = vmul.f32 0.020833334, %v5348_v5 }
0x10a5   : > { %7294 = vrsqrt.f32 %v5351_v49  ;;  %v5352_v32 = vadd.f32 1e-05, %v5350_v34 }
0x10a7   : > { %7296 = vrsqrt.f32 %v5352_v32 }
0x10af   : > { %v7295_v40 = vpop.eup %7294 }
0x10b0   : > { %v5355_v20 = vmul.f32 %v7295_v40, %v5339_v28 }
0x10b1   : > { %v7297_v51 = vpop.eup %7296 }
0x10b2   : > { %v5363_v62 = vmul.f32 %v6116_v61, %v5355_v20  ;;  %v5356_v0 = vmul.f32 %v7297_v51, %v5340_v47 }
0x10b4   : > { %v5364_v6 = vmul.f32 %v6116_v61, %v5356_v0  ;;  %v5371_v37 = vadd.f32 %v6117_v4, %v5363_v62 }
0x10b6   : > { %v5372_v43 = vadd.f32 %v6117_v4, %v5364_v6 }
0x10b8   : > { %v5373_v63 = vpack.c.bf16 %v5372_v43, %v5371_v37 }
0x10ba   : > { %6131 = vmatmul.mubr.msk.bf16.vlgmr.msra.gmra.mrb[156].mxu0 %vm478_vm0, %v5373_v63 }
0x10bb   : > { %6985 = vmatprep.mubr.msk.bf16.mxu0 %vm7365_vm1, %v7364_v16  ;;  %6980 = vmatpush3.bf16.msra.mxu0 %v7183_v56 }
0x10bc   : > { %6981 = vmatprep.subr.bf16.mxu0 %v7364_v16 }
0x10bf   : > { %6982 = vmatpush3.bf16.msra.mxu0 %v7184_v1 }
0x10c0   : > { %6983 = vmatprep.subr.bf16.mxu0 %v7364_v16 }
0x10c3   : > { %6984 = vmatpush3.bf16.msra.mxu0 %v7185_v21 }
0x118d   : > { %v5461_v15 = vpop.f32.mrb[156].mxu0 }
0x118e   : > { %v5462_v22 = vadd.f32 %v5461_v15, %v5387_v59  ;;  %v5463_v29 = vpop.f32.mrb[157].mxu0 }
0x118f   : > { %v5464_v36 = vadd.f32 %v5463_v29, %v5391_v54  ;;  %v5465_v38 = vpop.f32.mrb[158].mxu0 }
0x1190   : > { %v5466_v23 = vadd.f32 %v5465_v38, %v5387_v59  ;;  %v5467_v30 = vpop.f32.mrb[159].mxu0  ;;  %v5470_v11 = vmax.f32 %v5462_v22, 0.0 }
0x1191   : > { %v5468_v2 = vadd.f32 %v5467_v30, %v5391_v54  ;;  %v5471_v60 = vmax.f32 %v5464_v36, 0.0 }
0x1192   : > { %v5472_v33 = vmax.f32 %v5466_v23, 0.0 }
0x1193   : > { %v5473_v48 = vmax.f32 %v5468_v2, 0.0 }
0x1194   : > { %v5474_v28 = vpack.c.bf16 %v5472_v33, %v5470_v11 }
0x1195   : > { %v5475_v7 = vpack.c.bf16 %v5473_v48, %v5471_v60 }
0x1197   : > { %6170 = vmatprep.mubr.msk.bf16.mxu1 %vm3004_vm7, %v5475_v7 }
0x1198   : > { %5617 = vmatmul.mubr.bf16.vlgmr.msra.gmra.mrb[140].mxu1 %v5474_v28 }
0x126b   : > { %v5618_v47 = vpop.f32.mrb[140].mxu1 }
0x126c   : > { %v5619_v44 = vadd.f32 %v6157_v24, %v5618_v47  ;;  %v5620_v41 = vpop.f32.mrb[141].mxu1 }
0x126d   : > { %v5621_v25 = vpop.f32.mrb[142].mxu1 }
0x126e   : > { %v5622_v53 = vadd.f32 %v6157_v24, %v5621_v25  ;;  %v5623_v39 = vpop.f32.mrb[143].mxu1  ;;  %v5625_v12 = vadd.f32 %v5619_v44, %v8815_v27 }
0x1270   : > { %v5626_v16 = vadd.f32 %v5622_v53, %v8820_v31 }
0x1272   : > { %v5627_v52 = vpack.c.bf16 %v5626_v16, %v5625_v12 }
0x1274   : > { %6986 = vmatmul.mubr.msk.bf16.vlgmr.msra.gmra.mrb[160].mxu0 %vm478_vm0, %v5627_v52 }
0x1347   : > { %v5696_v50 = vpop.f32.mrb[160].mxu0 }
0x1348   : > { %v5697_v58 = vadd.f32 %v6171_v35, %v5696_v50  ;;  %v6987_v55 = vpop.f32.mrb[161].mxu0 }
0x1349   : > { %v5699_v27 = vpop.f32.mrb[162].mxu0 }
0x134a   : > { %5703 = vst [vmem:[%s460_s15] sm:$0xff] %v5697_v58  ;;  %v5700_v31 = vadd.f32 %v6171_v35, %v5699_v27  ;;  %v6988_v45 = vpop.f32.mrb[163].mxu0 }
0x134c   : > { %5704 = vst [vmem:[%s460_s15 + $0x8] sm:$0xff] %v5700_v31 }
0x134d   : > { %7313 = shalt.err (!%p7310_p3)
}
0x134e   : > { %s7314_s18 = scalar_lea.hbm %s8938_s22, 256  ;;  %s7318_s26 = scalar_lea.hbm %s8995_s14, 512 }
0x134f   : > { %p7315_p4 = scmp.ne.s32.totalorder %s8938_s22, %s7314_s18  ;;  %p7319_p9 = scmp.lt.u32.totalorder %s8938_s22, %s8995_s14 }
0x1350   : > { %p7320_p10 = scmp.lt.u32.totalorder %s7318_s26, %s7314_s18  ;;  %p7322_p12 = scmp.lt.u32.totalorder %s7314_s18, %s8938_s22 }
0x1351   : > { %p7316_p7 = pnand %p7315_p4, %p7483_p5 }
0x1352   : > { %p7321_p11 = por %p7320_p10, %p7319_p9 }
0x1353   : > { %p7317_p8 = pneg %p7316_p7 }
0x1354   : > { %p7323_p13 = por %p7322_p12, %p7321_p11 }
0x1356   : > { %p7324_p0 = pnand %p7323_p13, %p7317_p8 }
0x1358   : > { %7327 = shalt.err (!%p7324_p0)
}
0x1359   : > { %s7368_s1 = smov 128   ;;  %s7369_s17 = smov 8  }
0x135a   : > { %6989 = dma.vmem_to_hbm [thread:$0]  (%p7483_p5), %s8933_s21, 256, %s8938_s22, %s8940_s27, %s7368_s1, %s7368_s1, %s7369_s17  }
0x135b PF: > { %p6995_p1 = scmp.ge.s32.totalorder %s7362_s16, 2  ;;  %s5734_s20 = sand.u32 1, %s7350_s29  }
0x135c   : > { %s5735_s18 = scalar_lea.sflag [#allocation3], %s5734_s20 }
0x135d   : > { %p6992_p2 = pnand %p6995_p1, %p7487_p6 }
0x135f   : > { %7345 = dma.done.wait (!%p6992_p2), %s5735_s18, 256  }
0x1360   : > { %7347 = vsyncadd (!%p6992_p2), %s5735_s18, 4294967040  ;;  %s9009_s15 = sld [smem:[#allocation5_spill]]  ;;  %s9010_s25 = sld [smem:[#allocation6_spill]] }
0x1361   : > { %p24_p3 = scmp.ge.s32.totalorder %s7470_s19, 4   ;;  %s9011_s29 = smov %s7354_s30 }
0x1362   : > { %s9014_s16 = smov %s7470_s19 }
0x1363   :  { %26 = sbr.rel (!%p24_p3) target bundleno = 6 (0x6), region = 122 }
0x1366   : > { %s9012_s30 = smov %s9009_s15  ;;  %s9013_s15 = smov %s9010_s25 }
0x136a   :  { %5740 = vsyncpa [#allocation3], 1 }
0x136b   :  { %5742 = vsyncpa [#allocation3 + $0x1], 1 }

</bundles_post_ra>
